<compile_context>
chip_gen: v5e
topology: v5e:2x2
jax: 0.10.0
libtpu: 0.0.40
codegen_flags: <defaults>
</compile_context>

<pallas_src>
import numpy as np
import jax
import jax.numpy as jnp
from jax.experimental import pallas as pl
from jax.experimental.pallas import tpu as pltpu

F32 = jnp.float32
L_IN = 10          # input sequence length
HID = 50           # lstm_hidden_dim
NEG_BIG = -1e30    # padding bias for the fc2 lanes beyond the 3 real classes


def _mm(a, b):
    return jnp.dot(a, b, preferred_element_type=F32)


# ----------------------------------------------------------------------------
# Kernel: one batch tile (BT rows) per grid step; everything is (BT, features).
# Stage-1 feature layout: l*16 + c (l in [0,10)); stage-2 layout: l*32 + c (l in [0,5)).
def emoma_kernel(x_ref, m1_ref, cg1a_ref, cg1b_ref, g1_ref, p1_ref,
                 m2_ref, cg2a_ref, cg2b_ref, g2_ref, p2_ref,
                 wigo_ref, wfc1_ref, wfc2_ref, bias_ref, out_ref):
    x = x_ref[...]                      # (BT, 10) batch on sublanes
    bank = bias_ref[...]                # (11, 160) packed biases

    # conv1 (1->16, k=3, p=1) + ReLU, folded into a single (10, 160) matrix
    h1 = jnp.maximum(_mm(x, m1_ref[...]) + bank[0:1, :], 0.0)              # (BT, 160)

    # CBAM1: x * (channel_scale + spatial_scale)  (the module adds the two branches)
    t1 = jnp.maximum(_mm(h1, cg1a_ref[...]) + bank[1:2, 0:1], 0.0)         # (BT, 1)
    cs1 = jax.nn.sigmoid(_mm(t1, cg1b_ref[...]) + bank[2:3, :])            # (BT, 160)
    ss1 = jax.nn.sigmoid(_mm(h1, g1_ref[...]) + bank[3:4, :])              # (BT, 160)
    h1 = h1 * (cs1 + ss1)

    # MaxPool1d(2,2): even/odd position selectors fused into one matmul, then max
    r1 = _mm(h1, p1_ref[...])                                              # (BT, 160)
    pooled1 = jnp.maximum(r1[:, 0:80], r1[:, 80:160])                      # (BT, 80)

    # conv2 (16->32, k=3, p=1) + ReLU, folded into (80, 160)
    h2 = jnp.maximum(_mm(pooled1, m2_ref[...]) + bank[4:5, :], 0.0)        # (BT, 160)

    # CBAM2
    t2 = jnp.maximum(_mm(h2, cg2a_ref[...]) + bank[5:6, 0:2], 0.0)         # (BT, 2)
    cs2 = jax.nn.sigmoid(_mm(t2, cg2b_ref[...]) + bank[6:7, :])            # (BT, 160)
    ss2 = jax.nn.sigmoid(_mm(h2, g2_ref[...]) + bank[7:8, :])              # (BT, 160)
    h2 = h2 * (cs2 + ss2)

    # MaxPool1d(2,2) on L=5 -> L=2 (last position dropped, matching PyTorch's floor)
    r2 = _mm(h2, p2_ref[...])                                              # (BT, 128)
    pooled2 = jnp.maximum(r2[:, 0:64], r2[:, 64:128])                      # (BT, 64)

    # LSTM, seq_len=1, h0=c0=0.  Wigo holds only the i/g/o gate rows, with the input
    # columns pre-permuted from PyTorch flatten order (c*2 + j) to ours (j*32 + c).
    pre = _mm(pooled2, wigo_ref[...]) + bank[8:9, 0:150]                   # (BT, 150)
    i_g = jax.nn.sigmoid(pre[:, 0:50])
    g_g = jnp.tanh(pre[:, 50:100])
    o_g = jax.nn.sigmoid(pre[:, 100:150])
    hl = o_g * jnp.tanh(i_g * g_g)                                         # (BT, 50)

    # Attention over a length-1 sequence: softmax(dim=1) == 1 -> exact identity (skipped).

    # fc1 + ReLU (dropout = identity in eval); fc2 padded to 128 output lanes with
    # -1e30 bias on the padding so the 128-lane log_softmax equals the 3-class one.
    z = jnp.maximum(_mm(hl, wfc1_ref[...]) + bank[9:10, 0:128], 0.0)       # (BT, 128)
    logits = _mm(z, wfc2_ref[...]) + bank[10:11, 0:128]                    # (BT, 128)

    mx = jnp.max(logits, axis=-1, keepdims=True)
    lse = mx + jnp.log(jnp.sum(jnp.exp(logits - mx), axis=-1, keepdims=True))
    out_ref[...] = logits - lse


# ----------------------------------------------------------------------------
# Deterministic parameter init (PyTorch-shaped), stand-in for torch defaults.
def init_pytorch_params(key):
    ks = iter(jax.random.split(key, 32))

    def u(shape, fan_in):
        b = 1.0 / np.sqrt(fan_in)
        return jax.random.uniform(next(ks), shape, F32, -b, b)

    p = {}
    p['conv1_w'] = u((16, 1, 3), 3);      p['conv1_b'] = u((16,), 3)
    p['cg1a_w'] = u((1, 16, 1), 16);      p['cg1a_b'] = u((1,), 16)
    p['cg1b_w'] = u((16, 1, 1), 1);       p['cg1b_b'] = u((16,), 1)
    p['sg1_w'] = u((1, 16, 7), 16 * 7);   p['sg1_b'] = u((1,), 16 * 7)
    p['conv2_w'] = u((32, 16, 3), 48);    p['conv2_b'] = u((32,), 48)
    p['cg2a_w'] = u((2, 32, 1), 32);      p['cg2a_b'] = u((2,), 32)
    p['cg2b_w'] = u((32, 2, 1), 2);       p['cg2b_b'] = u((32,), 2)
    p['sg2_w'] = u((1, 32, 7), 32 * 7);   p['sg2_b'] = u((1,), 32 * 7)
    p['w_ih'] = u((4 * HID, 64), HID);    p['w_hh'] = u((4 * HID, HID), HID)
    p['b_ih'] = u((4 * HID,), HID);       p['b_hh'] = u((4 * HID,), HID)
    p['attn_w'] = u((1, HID), HID)        # unused: softmax over length-1 seq == 1
    p['fc1_w'] = u((128, HID), HID);      p['fc1_b'] = u((128,), HID)
    p['fc2_w'] = u((3, 128), 128);        p['fc2_b'] = u((3,), 128)
    return p


# ----------------------------------------------------------------------------
# Host-side folding of PyTorch params into dense, MXU-friendly matrices.
def to_kernel_params(p):
    pn = {k: np.asarray(v, np.float32) for k, v in p.items()}

    def fold_conv(w, b, L):
        # Conv1d(Cin->Cout, k=3, s=1, p=1) as (L*Cin, L*Cout); feature layout pos*C + c.
        Cout, Cin, K = w.shape
        M = np.zeros((L * Cin, L * Cout), np.float32)
        for l in range(L):
            for k in range(K):
                pos = l + k - 1
                if 0 <= pos < L:
                    M[pos * Cin:(pos + 1) * Cin, l * Cout:(l + 1) * Cout] += w[:, :, k].T
        return M, np.tile(b, L).reshape(1, L * Cout)

    def fold_channel_gate(wa, ba, wb, bb, L, C):
        # AdaptiveAvgPool1d(1) folded into the first 1x1 conv; second 1x1 conv's
        # per-channel output replicated over the L positions.
        H = wa.shape[0]
        CGA = np.zeros((L * C, H), np.float32)
        CGB = np.zeros((H, L * C), np.float32)
        for l in range(L):
            CGA[l * C:(l + 1) * C, :] = wa[:, :, 0].T / float(L)
            CGB[:, l * C:(l + 1) * C] = wb[:, :, 0].T
        return CGA, ba.reshape(1, H), CGB, np.tile(bb, L).reshape(1, L * C)

    def fold_spatial_gate(w, b, L, C):
        # Conv1d(C->1, k=7, p=3); the per-position gate is replicated over channels.
        G = np.zeros((L * C, L * C), np.float32)
        for pos in range(L):
            for l in range(L):
                k = pos - l + 3
                if 0 <= k < 7:
                    for cc in range(C):
                        G[pos * C + cc, l * C:(l + 1) * C] = w[0, cc, k]
        return G, np.full((1, L * C), float(b[0]), np.float32)

    def fold_pool_sel(L, C):
        # MaxPool1d(2,2): even positions -> columns [0, Lout*C), odd -> [Lout*C, 2*Lout*C)
        Lout = L // 2
        S = np.zeros((L * C, 2 * Lout * C), np.float32)
        for j in range(Lout):
            for c in range(C):
                S[(2 * j) * C + c, j * C + c] = 1.0
                S[(2 * j + 1) * C + c, Lout * C + j * C + c] = 1.0
        return S

    M1, b1f = fold_conv(pn['conv1_w'], pn['conv1_b'], 10)
    CG1A, cg1a_bb, CG1B, cg1b_bf = fold_channel_gate(
        pn['cg1a_w'], pn['cg1a_b'], pn['cg1b_w'], pn['cg1b_b'], 10, 16)
    G1, sg1_bf = fold_spatial_gate(pn['sg1_w'], pn['sg1_b'], 10, 16)
    P1 = fold_pool_sel(10, 16)

    M2, b2f = fold_conv(pn['conv2_w'], pn['conv2_b'], 5)
    CG2A, cg2a_bb, CG2B, cg2b_bf = fold_channel_gate(
        pn['cg2a_w'], pn['cg2a_b'], pn['cg2b_w'], pn['cg2b_b'], 5, 32)
    G2, sg2_bf = fold_spatial_gate(pn['sg2_w'], pn['sg2_b'], 5, 32)
    P2 = fold_pool_sel(5, 32)

    # LSTM: keep only i/g/o gate rows (forget gate multiplies c0 == 0, W_hh @ h0 == 0);
    # permute input columns from PyTorch flatten order f = c*2 + j to ours j*32 + c.
    rows = np.concatenate([np.arange(0, HID), np.arange(2 * HID, 3 * HID),
                           np.arange(3 * HID, 4 * HID)])
    wih = pn['w_ih'][rows, :]                              # (150, 64)
    Wigo = np.zeros((64, 3 * HID), np.float32)
    for j in range(2):
        for c in range(32):
            Wigo[j * 32 + c, :] = wih[:, c * 2 + j]
    bigo = (pn['b_ih'] + pn['b_hh'])[rows].reshape(1, 3 * HID)

    Wfc1 = pn['fc1_w'].T.copy()                            # (50, 128)
    bfc1 = pn['fc1_b'].reshape(1, 128)
    Wfc2p = np.zeros((128, 128), np.float32)               # pad 3 classes -> 128 lanes
    Wfc2p[:, 0:3] = pn['fc2_w'].T
    bfc2p = np.full((1, 128), NEG_BIG, np.float32)
    bfc2p[0, 0:3] = pn['fc2_b']

    # Packed bias bank: one row per bias vector (each <= 160 lanes).
    bank = np.zeros((11, 160), np.float32)
    for row, vec in enumerate([b1f, cg1a_bb, cg1b_bf, sg1_bf, b2f, cg2a_bb,
                               cg2b_bf, sg2_bf, bigo, bfc1, bfc2p]):
        v = np.asarray(vec, np.float32).reshape(-1)
        bank[row, :v.shape[0]] = v

    weights = [M1, CG1A, CG1B, G1, P1, M2, CG2A, CG2B, G2, P2,
               Wigo, Wfc1, Wfc2p, bank]
    return [jnp.asarray(w) for w in weights]


# ----------------------------------------------------------------------------
def _round_up(n, m):
    return ((n + m - 1) // m) * m


def cnn_lstm_forward(x_ncl, kernel_params, b_tile=512):
    """x_ncl: (B, 1, 10) float32, PyTorch NCL layout. Returns (B, 3) log-probs."""
    B = x_ncl.shape[0]
    x = x_ncl.reshape(B, L_IN).astype(F32)                 # drop the size-1 channel dim
    bt = int(min(b_tile, _round_up(B, 8)))                 # batch tile, multiple of 8
    Bp = _round_up(B, bt)
    if Bp != B:
        x = jnp.pad(x, ((0, Bp - B), (0, 0)))              # zero rows, sliced off below

    def const_spec(shape):                                 # weights: VMEM-resident, one block
        return pl.BlockSpec(shape, lambda b: (0, 0))

    in_specs = [pl.BlockSpec((bt, L_IN), lambda b: (b, 0))]
    in_specs += [const_spec(tuple(w.shape)) for w in kernel_params]

    out = pl.pallas_call(
        emoma_kernel,
        grid=(Bp // bt,),
        in_specs=in_specs,
        out_specs=pl.BlockSpec((bt, 128), lambda b: (b, 0)),   # lane-dense output slab
        out_shape=jax.ShapeDtypeStruct((Bp, 128), F32),
        compiler_params=pltpu.CompilerParams(dimension_semantics=("parallel",)),
    )(x, *kernel_params)
    return out[:B, 0:3]


# ----------------------------------------------------------------------------
# Pure-JAX reference of the PyTorch module (eval mode) for validation.
def reference_forward(x_ncl, p):
    def conv1d(x, w, b, pad):
        y = jax.lax.conv_general_dilated(
            x, w, window_strides=(1,), padding=[(pad, pad)],
            dimension_numbers=('NCH', 'OIH', 'NCH'))
        return y + b[None, :, None]

    def cbam(h, ga_w, ga_b, gb_w, gb_b, sg_w, sg_b):
        ch = jnp.mean(h, axis=2, keepdims=True)
        t = jax.nn.relu(conv1d(ch, ga_w, ga_b, 0))
        cscale = jax.nn.sigmoid(conv1d(t, gb_w, gb_b, 0))
        sscale = jax.nn.sigmoid(conv1d(h, sg_w, sg_b, 3))
        return cscale * h + sscale * h

    def pool(h):
        B, C, L = h.shape
        L2 = L // 2
        return jnp.max(h[:, :, :2 * L2].reshape(B, C, L2, 2), axis=3)

    x = x_ncl.astype(F32)
    h = jax.nn.relu(conv1d(x, p['conv1_w'], p['conv1_b'], 1))
    h = cbam(h, p['cg1a_w'], p['cg1a_b'], p['cg1b_w'], p['cg1b_b'], p['sg1_w'], p['sg1_b'])
    h = pool(h)
    h = jax.nn.relu(conv1d(h, p['conv2_w'], p['conv2_b'], 1))
    h = cbam(h, p['cg2a_w'], p['cg2a_b'], p['cg2b_w'], p['cg2b_b'], p['sg2_w'], p['sg2_b'])
    h = pool(h)
    feat = h.reshape(h.shape[0], -1)                       # PyTorch flatten order (c, j)
    gates = feat @ p['w_ih'].T + p['b_ih'] + p['b_hh']     # h0 = c0 = 0, seq_len = 1
    i = jax.nn.sigmoid(gates[:, 0:HID])
    g = jnp.tanh(gates[:, 2 * HID:3 * HID])
    o = jax.nn.sigmoid(gates[:, 3 * HID:4 * HID])
    hl = o * jnp.tanh(i * g)
    # attention over a length-1 sequence is the identity
    z = jax.nn.relu(hl @ p['fc1_w'].T + p['fc1_b'])        # dropout: identity in eval
    logits = z @ p['fc2_w'].T + p['fc2_b']
    return jax.nn.log_softmax(logits, axis=1)


if __name__ == "__main__":
    B = 64
    x = jax.random.normal(jax.random.PRNGKey(0), (B, 1, L_IN), dtype=F32)  # PyTorch NCL input
    torch_params = init_pytorch_params(jax.random.PRNGKey(1))
    kernel_params = to_kernel_params(torch_params)

    logp = jax.block_until_ready(cnn_lstm_forward(x, kernel_params))
    assert logp.shape == (B, 3)
    assert bool(jnp.all(jnp.isfinite(logp)))
    # log_softmax rows must (numerically) sum to 1 in prob space
    assert bool(jnp.all(jnp.abs(jnp.sum(jnp.exp(logp), axis=1) - 1.0) < 1e-4))

    # validate the folded-weight kernel against a pure-JAX reference of the module
    ref = jax.block_until_ready(reference_forward(x, torch_params))
    assert bool(jnp.max(jnp.abs(logp - ref)) < 5e-2)

    print("KERNEL_OK")
</pallas_src>

<mosaic_0001>
module attributes {stable_mosaic.version = 11 : i64} {
  func.func @emoma_kernel(%arg0: i32, %arg1: memref<64x10xf32, #tpu.memory_space<vmem>>, %arg2: memref<10x160xf32, #tpu.memory_space<vmem>>, %arg3: memref<160x1xf32, #tpu.memory_space<vmem>>, %arg4: memref<1x160xf32, #tpu.memory_space<vmem>>, %arg5: memref<160x160xf32, #tpu.memory_space<vmem>>, %arg6: memref<160x160xf32, #tpu.memory_space<vmem>>, %arg7: memref<80x160xf32, #tpu.memory_space<vmem>>, %arg8: memref<160x2xf32, #tpu.memory_space<vmem>>, %arg9: memref<2x160xf32, #tpu.memory_space<vmem>>, %arg10: memref<160x160xf32, #tpu.memory_space<vmem>>, %arg11: memref<160x128xf32, #tpu.memory_space<vmem>>, %arg12: memref<64x150xf32, #tpu.memory_space<vmem>>, %arg13: memref<50x128xf32, #tpu.memory_space<vmem>>, %arg14: memref<128x128xf32, #tpu.memory_space<vmem>>, %arg15: memref<11x160xf32, #tpu.memory_space<vmem>>, %arg16: memref<64x128xf32, #tpu.memory_space<vmem>>) attributes {dimension_semantics = [#tpu.dimension_semantics<parallel>], iteration_bounds = array<i64: 1>, scalar_prefetch = 0 : i64, scratch_operands = 0 : i64, tpu.core_type = #tpu.core_type<tc>, window_params = [{transform_indices = @transform_0, window_bounds = array<i64: 64, 10>}, {pipeline_mode = #tpu.pipeline_mode<synchronous>, transform_indices = @transform_1, window_bounds = array<i64: 10, 160>}, {pipeline_mode = #tpu.pipeline_mode<synchronous>, transform_indices = @transform_2, window_bounds = array<i64: 160, 1>}, {pipeline_mode = #tpu.pipeline_mode<synchronous>, transform_indices = @transform_3, window_bounds = array<i64: 1, 160>}, {pipeline_mode = #tpu.pipeline_mode<synchronous>, transform_indices = @transform_4, window_bounds = array<i64: 160, 160>}, {pipeline_mode = #tpu.pipeline_mode<synchronous>, transform_indices = @transform_5, window_bounds = array<i64: 160, 160>}, {pipeline_mode = #tpu.pipeline_mode<synchronous>, transform_indices = @transform_6, window_bounds = array<i64: 80, 160>}, {pipeline_mode = #tpu.pipeline_mode<synchronous>, transform_indices = @transform_7, window_bounds = array<i64: 160, 2>}, {pipeline_mode = #tpu.pipeline_mode<synchronous>, transform_indices = @transform_8, window_bounds = array<i64: 2, 160>}, {pipeline_mode = #tpu.pipeline_mode<synchronous>, transform_indices = @transform_9, window_bounds = array<i64: 160, 160>}, {pipeline_mode = #tpu.pipeline_mode<synchronous>, transform_indices = @transform_10, window_bounds = array<i64: 160, 128>}, {pipeline_mode = #tpu.pipeline_mode<synchronous>, transform_indices = @transform_11, window_bounds = array<i64: 64, 150>}, {pipeline_mode = #tpu.pipeline_mode<synchronous>, transform_indices = @transform_12, window_bounds = array<i64: 50, 128>}, {pipeline_mode = #tpu.pipeline_mode<synchronous>, transform_indices = @transform_13, window_bounds = array<i64: 128, 128>}, {pipeline_mode = #tpu.pipeline_mode<synchronous>, transform_indices = @transform_14, window_bounds = array<i64: 11, 160>}, {transform_indices = @transform_15, window_bounds = array<i64: 64, 128>}]} {
    %c0 = arith.constant 0 : index
    %c0_0 = arith.constant 0 : index
    %0 = vector.load %arg1[%c0, %c0_0] : memref<64x10xf32, #tpu.memory_space<vmem>>, vector<64x10xf32>
    %c0_1 = arith.constant 0 : index
    %c0_2 = arith.constant 0 : index
    %1 = vector.load %arg15[%c0_1, %c0_2] : memref<11x160xf32, #tpu.memory_space<vmem>>, vector<11x160xf32>
    %c0_3 = arith.constant 0 : index
    %c0_4 = arith.constant 0 : index
    %2 = vector.load %arg2[%c0_3, %c0_4] : memref<10x160xf32, #tpu.memory_space<vmem>>, vector<10x160xf32>
    %cst = arith.constant dense<0.000000e+00> : vector<64x160xf32>
    %3 = tpu.matmul %0, %2, %cst {dimension_numbers = #tpu.dot_dimension_numbers<[1], [0], [0], [1], [0, 0, 1, 1], [], []>} : vector<64x10xf32>, vector<10x160xf32>, vector<64x160xf32> -> vector<64x160xf32>
    %4 = vector.extract_strided_slice %1 {offsets = [0, 0], sizes = [1, 160], strides = [1, 1]} : vector<11x160xf32> to vector<1x160xf32>
    %5 = vector.broadcast %4 : vector<1x160xf32> to vector<64x160xf32>
    %6 = arith.addf %3, %5 : vector<64x160xf32>
    %cst_5 = arith.constant 0.000000e+00 : f32
    %7 = vector.broadcast %cst_5 : f32 to vector<64x160xf32>
    %8 = arith.maximumf %6, %7 : vector<64x160xf32>
    %c0_6 = arith.constant 0 : index
    %c0_7 = arith.constant 0 : index
    %9 = vector.load %arg3[%c0_6, %c0_7] : memref<160x1xf32, #tpu.memory_space<vmem>>, vector<160x1xf32>
    %cst_8 = arith.constant dense<0.000000e+00> : vector<64x1xf32>
    %10 = tpu.matmul %8, %9, %cst_8 {dimension_numbers = #tpu.dot_dimension_numbers<[1], [0], [0], [1], [0, 0, 1, 1], [], []>} : vector<64x160xf32>, vector<160x1xf32>, vector<64x1xf32> -> vector<64x1xf32>
    %11 = vector.extract_strided_slice %1 {offsets = [1, 0], sizes = [1, 1], strides = [1, 1]} : vector<11x160xf32> to vector<1x1xf32>
    %12 = vector.broadcast %11 : vector<1x1xf32> to vector<64x1xf32>
    %13 = arith.addf %10, %12 : vector<64x1xf32>
    %cst_9 = arith.constant 0.000000e+00 : f32
    %14 = vector.broadcast %cst_9 : f32 to vector<64x1xf32>
    %15 = arith.maximumf %13, %14 : vector<64x1xf32>
    %c0_10 = arith.constant 0 : index
    %c0_11 = arith.constant 0 : index
    %16 = vector.load %arg4[%c0_10, %c0_11] : memref<1x160xf32, #tpu.memory_space<vmem>>, vector<1x160xf32>
    %cst_12 = arith.constant dense<0.000000e+00> : vector<64x160xf32>
    %17 = tpu.matmul %15, %16, %cst_12 {dimension_numbers = #tpu.dot_dimension_numbers<[1], [0], [0], [1], [0, 0, 1, 1], [], []>} : vector<64x1xf32>, vector<1x160xf32>, vector<64x160xf32> -> vector<64x160xf32>
    %18 = vector.extract_strided_slice %1 {offsets = [2, 0], sizes = [1, 160], strides = [1, 1]} : vector<11x160xf32> to vector<1x160xf32>
    %19 = vector.broadcast %18 : vector<1x160xf32> to vector<64x160xf32>
    %20 = arith.addf %17, %19 : vector<64x160xf32>
    %21 = arith.negf %20 : vector<64x160xf32>
    %22 = math.exp %21 : vector<64x160xf32>
    %cst_13 = arith.constant 1.000000e+00 : f32
    %23 = vector.broadcast %cst_13 : f32 to vector<64x160xf32>
    %24 = arith.addf %23, %22 : vector<64x160xf32>
    %25 = arith.divf %23, %24 : vector<64x160xf32>
    %c0_14 = arith.constant 0 : index
    %c0_15 = arith.constant 0 : index
    %26 = vector.load %arg5[%c0_14, %c0_15] : memref<160x160xf32, #tpu.memory_space<vmem>>, vector<160x160xf32>
    %cst_16 = arith.constant dense<0.000000e+00> : vector<64x160xf32>
    %27 = tpu.matmul %8, %26, %cst_16 {dimension_numbers = #tpu.dot_dimension_numbers<[1], [0], [0], [1], [0, 0, 1, 1], [], []>} : vector<64x160xf32>, vector<160x160xf32>, vector<64x160xf32> -> vector<64x160xf32>
    %28 = vector.extract_strided_slice %1 {offsets = [3, 0], sizes = [1, 160], strides = [1, 1]} : vector<11x160xf32> to vector<1x160xf32>
    %29 = vector.broadcast %28 : vector<1x160xf32> to vector<64x160xf32>
    %30 = arith.addf %27, %29 : vector<64x160xf32>
    %31 = arith.negf %30 : vector<64x160xf32>
    %32 = math.exp %31 : vector<64x160xf32>
    %cst_17 = arith.constant 1.000000e+00 : f32
    %33 = vector.broadcast %cst_17 : f32 to vector<64x160xf32>
    %34 = arith.addf %33, %32 : vector<64x160xf32>
    %35 = arith.divf %33, %34 : vector<64x160xf32>
    %36 = arith.addf %25, %35 : vector<64x160xf32>
    %37 = arith.mulf %8, %36 : vector<64x160xf32>
    %c0_18 = arith.constant 0 : index
    %c0_19 = arith.constant 0 : index
    %38 = vector.load %arg6[%c0_18, %c0_19] : memref<160x160xf32, #tpu.memory_space<vmem>>, vector<160x160xf32>
    %cst_20 = arith.constant dense<0.000000e+00> : vector<64x160xf32>
    %39 = tpu.matmul %37, %38, %cst_20 {dimension_numbers = #tpu.dot_dimension_numbers<[1], [0], [0], [1], [0, 0, 1, 1], [], []>} : vector<64x160xf32>, vector<160x160xf32>, vector<64x160xf32> -> vector<64x160xf32>
    %40 = vector.extract_strided_slice %39 {offsets = [0, 0], sizes = [64, 80], strides = [1, 1]} : vector<64x160xf32> to vector<64x80xf32>
    %41 = vector.extract_strided_slice %39 {offsets = [0, 80], sizes = [64, 80], strides = [1, 1]} : vector<64x160xf32> to vector<64x80xf32>
    %42 = arith.maximumf %40, %41 : vector<64x80xf32>
    %c0_21 = arith.constant 0 : index
    %c0_22 = arith.constant 0 : index
    %43 = vector.load %arg7[%c0_21, %c0_22] : memref<80x160xf32, #tpu.memory_space<vmem>>, vector<80x160xf32>
    %cst_23 = arith.constant dense<0.000000e+00> : vector<64x160xf32>
    %44 = tpu.matmul %42, %43, %cst_23 {dimension_numbers = #tpu.dot_dimension_numbers<[1], [0], [0], [1], [0, 0, 1, 1], [], []>} : vector<64x80xf32>, vector<80x160xf32>, vector<64x160xf32> -> vector<64x160xf32>
    %45 = vector.extract_strided_slice %1 {offsets = [4, 0], sizes = [1, 160], strides = [1, 1]} : vector<11x160xf32> to vector<1x160xf32>
    %46 = vector.broadcast %45 : vector<1x160xf32> to vector<64x160xf32>
    %47 = arith.addf %44, %46 : vector<64x160xf32>
    %cst_24 = arith.constant 0.000000e+00 : f32
    %48 = vector.broadcast %cst_24 : f32 to vector<64x160xf32>
    %49 = arith.maximumf %47, %48 : vector<64x160xf32>
    %c0_25 = arith.constant 0 : index
    %c0_26 = arith.constant 0 : index
    %50 = vector.load %arg8[%c0_25, %c0_26] : memref<160x2xf32, #tpu.memory_space<vmem>>, vector<160x2xf32>
    %cst_27 = arith.constant dense<0.000000e+00> : vector<64x2xf32>
    %51 = tpu.matmul %49, %50, %cst_27 {dimension_numbers = #tpu.dot_dimension_numbers<[1], [0], [0], [1], [0, 0, 1, 1], [], []>} : vector<64x160xf32>, vector<160x2xf32>, vector<64x2xf32> -> vector<64x2xf32>
    %52 = vector.extract_strided_slice %1 {offsets = [5, 0], sizes = [1, 2], strides = [1, 1]} : vector<11x160xf32> to vector<1x2xf32>
    %53 = vector.broadcast %52 : vector<1x2xf32> to vector<64x2xf32>
    %54 = arith.addf %51, %53 : vector<64x2xf32>
    %cst_28 = arith.constant 0.000000e+00 : f32
    %55 = vector.broadcast %cst_28 : f32 to vector<64x2xf32>
    %56 = arith.maximumf %54, %55 : vector<64x2xf32>
    %c0_29 = arith.constant 0 : index
    %c0_30 = arith.constant 0 : index
    %57 = vector.load %arg9[%c0_29, %c0_30] : memref<2x160xf32, #tpu.memory_space<vmem>>, vector<2x160xf32>
    %cst_31 = arith.constant dense<0.000000e+00> : vector<64x160xf32>
    %58 = tpu.matmul %56, %57, %cst_31 {dimension_numbers = #tpu.dot_dimension_numbers<[1], [0], [0], [1], [0, 0, 1, 1], [], []>} : vector<64x2xf32>, vector<2x160xf32>, vector<64x160xf32> -> vector<64x160xf32>
    %59 = vector.extract_strided_slice %1 {offsets = [6, 0], sizes = [1, 160], strides = [1, 1]} : vector<11x160xf32> to vector<1x160xf32>
    %60 = vector.broadcast %59 : vector<1x160xf32> to vector<64x160xf32>
    %61 = arith.addf %58, %60 : vector<64x160xf32>
    %62 = arith.negf %61 : vector<64x160xf32>
    %63 = math.exp %62 : vector<64x160xf32>
    %cst_32 = arith.constant 1.000000e+00 : f32
    %64 = vector.broadcast %cst_32 : f32 to vector<64x160xf32>
    %65 = arith.addf %64, %63 : vector<64x160xf32>
    %66 = arith.divf %64, %65 : vector<64x160xf32>
    %c0_33 = arith.constant 0 : index
    %c0_34 = arith.constant 0 : index
    %67 = vector.load %arg10[%c0_33, %c0_34] : memref<160x160xf32, #tpu.memory_space<vmem>>, vector<160x160xf32>
    %cst_35 = arith.constant dense<0.000000e+00> : vector<64x160xf32>
    %68 = tpu.matmul %49, %67, %cst_35 {dimension_numbers = #tpu.dot_dimension_numbers<[1], [0], [0], [1], [0, 0, 1, 1], [], []>} : vector<64x160xf32>, vector<160x160xf32>, vector<64x160xf32> -> vector<64x160xf32>
    %69 = vector.extract_strided_slice %1 {offsets = [7, 0], sizes = [1, 160], strides = [1, 1]} : vector<11x160xf32> to vector<1x160xf32>
    %70 = vector.broadcast %69 : vector<1x160xf32> to vector<64x160xf32>
    %71 = arith.addf %68, %70 : vector<64x160xf32>
    %72 = arith.negf %71 : vector<64x160xf32>
    %73 = math.exp %72 : vector<64x160xf32>
    %cst_36 = arith.constant 1.000000e+00 : f32
    %74 = vector.broadcast %cst_36 : f32 to vector<64x160xf32>
    %75 = arith.addf %74, %73 : vector<64x160xf32>
    %76 = arith.divf %74, %75 : vector<64x160xf32>
    %77 = arith.addf %66, %76 : vector<64x160xf32>
    %78 = arith.mulf %49, %77 : vector<64x160xf32>
    %c0_37 = arith.constant 0 : index
    %c0_38 = arith.constant 0 : index
    %79 = vector.load %arg11[%c0_37, %c0_38] : memref<160x128xf32, #tpu.memory_space<vmem>>, vector<160x128xf32>
    %cst_39 = arith.constant dense<0.000000e+00> : vector<64x128xf32>
    %80 = tpu.matmul %78, %79, %cst_39 {dimension_numbers = #tpu.dot_dimension_numbers<[1], [0], [0], [1], [0, 0, 1, 1], [], []>} : vector<64x160xf32>, vector<160x128xf32>, vector<64x128xf32> -> vector<64x128xf32>
    %81 = vector.extract_strided_slice %80 {offsets = [0, 0], sizes = [64, 64], strides = [1, 1]} : vector<64x128xf32> to vector<64x64xf32>
    %82 = vector.extract_strided_slice %80 {offsets = [0, 64], sizes = [64, 64], strides = [1, 1]} : vector<64x128xf32> to vector<64x64xf32>
    %83 = arith.maximumf %81, %82 : vector<64x64xf32>
    %c0_40 = arith.constant 0 : index
    %c0_41 = arith.constant 0 : index
    %84 = vector.load %arg12[%c0_40, %c0_41] : memref<64x150xf32, #tpu.memory_space<vmem>>, vector<64x150xf32>
    %cst_42 = arith.constant dense<0.000000e+00> : vector<64x150xf32>
    %85 = tpu.matmul %83, %84, %cst_42 {dimension_numbers = #tpu.dot_dimension_numbers<[1], [0], [0], [1], [0, 0, 1, 1], [], []>} : vector<64x64xf32>, vector<64x150xf32>, vector<64x150xf32> -> vector<64x150xf32>
    %86 = vector.extract_strided_slice %1 {offsets = [8, 0], sizes = [1, 150], strides = [1, 1]} : vector<11x160xf32> to vector<1x150xf32>
    %87 = vector.broadcast %86 : vector<1x150xf32> to vector<64x150xf32>
    %88 = arith.addf %85, %87 : vector<64x150xf32>
    %89 = vector.extract_strided_slice %88 {offsets = [0, 0], sizes = [64, 50], strides = [1, 1]} : vector<64x150xf32> to vector<64x50xf32>
    %90 = arith.negf %89 : vector<64x50xf32>
    %91 = math.exp %90 : vector<64x50xf32>
    %cst_43 = arith.constant 1.000000e+00 : f32
    %92 = vector.broadcast %cst_43 : f32 to vector<64x50xf32>
    %93 = arith.addf %92, %91 : vector<64x50xf32>
    %94 = arith.divf %92, %93 : vector<64x50xf32>
    %95 = vector.extract_strided_slice %88 {offsets = [0, 50], sizes = [64, 50], strides = [1, 1]} : vector<64x150xf32> to vector<64x50xf32>
    %96 = math.tanh %95 : vector<64x50xf32>
    %97 = vector.extract_strided_slice %88 {offsets = [0, 100], sizes = [64, 50], strides = [1, 1]} : vector<64x150xf32> to vector<64x50xf32>
    %98 = arith.negf %97 : vector<64x50xf32>
    %99 = math.exp %98 : vector<64x50xf32>
    %cst_44 = arith.constant 1.000000e+00 : f32
    %100 = vector.broadcast %cst_44 : f32 to vector<64x50xf32>
    %101 = arith.addf %100, %99 : vector<64x50xf32>
    %102 = arith.divf %100, %101 : vector<64x50xf32>
    %103 = arith.mulf %94, %96 : vector<64x50xf32>
    %104 = math.tanh %103 : vector<64x50xf32>
    %105 = arith.mulf %102, %104 : vector<64x50xf32>
    %c0_45 = arith.constant 0 : index
    %c0_46 = arith.constant 0 : index
    %106 = vector.load %arg13[%c0_45, %c0_46] : memref<50x128xf32, #tpu.memory_space<vmem>>, vector<50x128xf32>
    %cst_47 = arith.constant dense<0.000000e+00> : vector<64x128xf32>
    %107 = tpu.matmul %105, %106, %cst_47 {dimension_numbers = #tpu.dot_dimension_numbers<[1], [0], [0], [1], [0, 0, 1, 1], [], []>} : vector<64x50xf32>, vector<50x128xf32>, vector<64x128xf32> -> vector<64x128xf32>
    %108 = vector.extract_strided_slice %1 {offsets = [9, 0], sizes = [1, 128], strides = [1, 1]} : vector<11x160xf32> to vector<1x128xf32>
    %109 = vector.broadcast %108 : vector<1x128xf32> to vector<64x128xf32>
    %110 = arith.addf %107, %109 : vector<64x128xf32>
    %cst_48 = arith.constant 0.000000e+00 : f32
    %111 = vector.broadcast %cst_48 : f32 to vector<64x128xf32>
    %112 = arith.maximumf %110, %111 : vector<64x128xf32>
    %c0_49 = arith.constant 0 : index
    %c0_50 = arith.constant 0 : index
    %113 = vector.load %arg14[%c0_49, %c0_50] : memref<128x128xf32, #tpu.memory_space<vmem>>, vector<128x128xf32>
    %cst_51 = arith.constant dense<0.000000e+00> : vector<64x128xf32>
    %114 = tpu.matmul %112, %113, %cst_51 {dimension_numbers = #tpu.dot_dimension_numbers<[1], [0], [0], [1], [0, 0, 1, 1], [], []>} : vector<64x128xf32>, vector<128x128xf32>, vector<64x128xf32> -> vector<64x128xf32>
    %115 = vector.extract_strided_slice %1 {offsets = [10, 0], sizes = [1, 128], strides = [1, 1]} : vector<11x160xf32> to vector<1x128xf32>
    %116 = vector.broadcast %115 : vector<1x128xf32> to vector<64x128xf32>
    %117 = arith.addf %114, %116 : vector<64x128xf32>
    %cst_52 = arith.constant dense<0xFF800000> : vector<64xf32>
    %118 = vector.multi_reduction <maximumf>, %117, %cst_52 [1] : vector<64x128xf32> to vector<64xf32>
    %119 = vector.shape_cast %118 : vector<64xf32> to vector<64x1xf32>
    %120 = vector.broadcast %119 : vector<64x1xf32> to vector<64x128xf32>
    %121 = arith.subf %117, %120 : vector<64x128xf32>
    %122 = math.exp %121 : vector<64x128xf32>
    %cst_53 = arith.constant dense<0.000000e+00> : vector<64xf32>
    %123 = vector.multi_reduction <add>, %122, %cst_53 [1] : vector<64x128xf32> to vector<64xf32>
    %124 = vector.shape_cast %123 : vector<64xf32> to vector<64x1xf32>
    %125 = math.log %124 : vector<64x1xf32>
    %126 = arith.addf %119, %125 : vector<64x1xf32>
    %127 = vector.broadcast %126 : vector<64x1xf32> to vector<64x128xf32>
    %128 = arith.subf %117, %127 : vector<64x128xf32>
    %c0_54 = arith.constant 0 : index
    %c0_55 = arith.constant 0 : index
    %129 = vector.load %arg16[%c0_54, %c0_55] : memref<64x128xf32, #tpu.memory_space<vmem>>, vector<64x128xf32>
    tpu.vector_store %arg16[%c0_54, %c0_55], %128 {strides = array<i32>} : memref<64x128xf32, #tpu.memory_space<vmem>>, vector<64x128xf32>,
    return
  }
  func.func @transform_0(%arg0: i32) -> (i32, i32) {
    %c0_i32 = arith.constant 0 : i32
    %c0_i32_0 = arith.constant 0 : i32
    return %arg0, %c0_i32 : i32, i32
  }
  func.func @transform_1(%arg0: i32) -> (i32, i32) {
    %c0_i32 = arith.constant 0 : i32
    %c0_i32_0 = arith.constant 0 : i32
    %c0_i32_1 = arith.constant 0 : i32
    return %c0_i32, %c0_i32_0 : i32, i32
  }
  func.func @transform_2(%arg0: i32) -> (i32, i32) {
    %c0_i32 = arith.constant 0 : i32
    %c0_i32_0 = arith.constant 0 : i32
    %c0_i32_1 = arith.constant 0 : i32
    return %c0_i32, %c0_i32_0 : i32, i32
  }
  func.func @transform_3(%arg0: i32) -> (i32, i32) {
    %c0_i32 = arith.constant 0 : i32
    %c0_i32_0 = arith.constant 0 : i32
    %c0_i32_1 = arith.constant 0 : i32
    return %c0_i32, %c0_i32_0 : i32, i32
  }
  func.func @transform_4(%arg0: i32) -> (i32, i32) {
    %c0_i32 = arith.constant 0 : i32
    %c0_i32_0 = arith.constant 0 : i32
    %c0_i32_1 = arith.constant 0 : i32
    return %c0_i32, %c0_i32_0 : i32, i32
  }
  func.func @transform_5(%arg0: i32) -> (i32, i32) {
    %c0_i32 = arith.constant 0 : i32
    %c0_i32_0 = arith.constant 0 : i32
    %c0_i32_1 = arith.constant 0 : i32
    return %c0_i32, %c0_i32_0 : i32, i32
  }
  func.func @transform_6(%arg0: i32) -> (i32, i32) {
    %c0_i32 = arith.constant 0 : i32
    %c0_i32_0 = arith.constant 0 : i32
    %c0_i32_1 = arith.constant 0 : i32
    return %c0_i32, %c0_i32_0 : i32, i32
  }
  func.func @transform_7(%arg0: i32) -> (i32, i32) {
    %c0_i32 = arith.constant 0 : i32
    %c0_i32_0 = arith.constant 0 : i32
    %c0_i32_1 = arith.constant 0 : i32
    return %c0_i32, %c0_i32_0 : i32, i32
  }
  func.func @transform_8(%arg0: i32) -> (i32, i32) {
    %c0_i32 = arith.constant 0 : i32
    %c0_i32_0 = arith.constant 0 : i32
    %c0_i32_1 = arith.constant 0 : i32
    return %c0_i32, %c0_i32_0 : i32, i32
  }
  func.func @transform_9(%arg0: i32) -> (i32, i32) {
    %c0_i32 = arith.constant 0 : i32
    %c0_i32_0 = arith.constant 0 : i32
    %c0_i32_1 = arith.constant 0 : i32
    return %c0_i32, %c0_i32_0 : i32, i32
  }
  func.func @transform_10(%arg0: i32) -> (i32, i32) {
    %c0_i32 = arith.constant 0 : i32
    %c0_i32_0 = arith.constant 0 : i32
    %c0_i32_1 = arith.constant 0 : i32
    return %c0_i32, %c0_i32_0 : i32, i32
  }
  func.func @transform_11(%arg0: i32) -> (i32, i32) {
    %c0_i32 = arith.constant 0 : i32
    %c0_i32_0 = arith.constant 0 : i32
    %c0_i32_1 = arith.constant 0 : i32
    return %c0_i32, %c0_i32_0 : i32, i32
  }
  func.func @transform_12(%arg0: i32) -> (i32, i32) {
    %c0_i32 = arith.constant 0 : i32
    %c0_i32_0 = arith.constant 0 : i32
    %c0_i32_1 = arith.constant 0 : i32
    return %c0_i32, %c0_i32_0 : i32, i32
  }
  func.func @transform_13(%arg0: i32) -> (i32, i32) {
    %c0_i32 = arith.constant 0 : i32
    %c0_i32_0 = arith.constant 0 : i32
    %c0_i32_1 = arith.constant 0 : i32
    return %c0_i32, %c0_i32_0 : i32, i32
  }
  func.func @transform_14(%arg0: i32) -> (i32, i32) {
    %c0_i32 = arith.constant 0 : i32
    %c0_i32_0 = arith.constant 0 : i32
    %c0_i32_1 = arith.constant 0 : i32
    return %c0_i32, %c0_i32_0 : i32, i32
  }
  func.func @transform_15(%arg0: i32) -> (i32, i32) {
    %c0_i32 = arith.constant 0 : i32
    %c0_i32_0 = arith.constant 0 : i32
    return %arg0, %c0_i32 : i32, i32
  }
}

</mosaic_0001>

<bundles_post_ra>
// kernel: tpu_custom_call.1
= control target key start
LH: loop header
LB: loop body
LE: loop exit
PB: predicated region body
PF: predicated region fallthrough
CT: control target
= control target key end

     0   :  { %20 = vsyncpa [#allocation3], 0  ;;  %s7793_s0 = inlined_call_operand.vmem [shape: f32[64,10], index: 0, kind: input, shape index: {}]   ;;  %s7794_s1 = inlined_call_operand.hbm [shape: f32[10,160], index: 1, kind: input, shape index: {}]   ;;  %s7795_s2 = inlined_call_operand.vmem [shape: f32[160,1], index: 2, kind: input, shape index: {}]   ;;  %s7796_s3 = inlined_call_operand.hbm [shape: f32[1,160], index: 3, kind: input, shape index: {}]   ;;  %s7797_s4 = inlined_call_operand.vmem [shape: f32[160,160], index: 4, kind: input, shape index: {}]   ;;  %s7798_s5 = inlined_call_operand.hbm [shape: f32[160,160], index: 5, kind: input, shape index: {}]   ;;  %s7799_s6 = inlined_call_operand.hbm [shape: f32[80,160], index: 6, kind: input, shape index: {}]   ;;  %s7800_s7 = inlined_call_operand.vmem [shape: f32[160,2], index: 7, kind: input, shape index: {}]   ;;  %s7801_s8 = inlined_call_operand.hbm [shape: f32[2,160], index: 8, kind: input, shape index: {}]   ;;  %s7802_s9 = inlined_call_operand.hbm [shape: f32[160,160], index: 9, kind: input, shape index: {}]   ;;  %s7803_s10 = inlined_call_operand.hbm [shape: f32[160,128], index: 10, kind: input, shape index: {}]   ;;  %s7804_s11 = inlined_call_operand.hbm [shape: f32[64,150], index: 11, kind: input, shape index: {}]   ;;  %s7805_s12 = inlined_call_operand.vmem [shape: f32[50,128], index: 12, kind: input, shape index: {}]   ;;  %s7806_s13 = inlined_call_operand.hbm [shape: f32[128,128], index: 13, kind: input, shape index: {}]   ;;  %s7807_s14 = inlined_call_operand.vmem [shape: f32[11,160], index: 14, kind: input, shape index: {}]   ;;  %s7808_s15 = inlined_call_operand.hbm [shape: f32[64,128], index: 15, kind: output, shape index: {}]  }
   0x1   :  { %21 = vsyncpa [#allocation6], 0 }
   0x2   :  { %22 = vsyncpa [#allocation9], 0 }
   0x3   :  { %23 = vsyncpa [#allocation12], 0 }
   0x4   :  { %24 = vsyncpa [#allocation15], 0  ;;  %s48_s20 = sshll.u32 %s7796_s3, 4  ;;  %s49_s20 = int_to_ptr.hbm [resolvable:$true] %s48_s20 }
   0x5   :  { %25 = vsyncpa [#allocation4], 0  ;;  %s4914_s21 = smov [#allocation5]   ;;  %s73_s25 = sshll.u32 %s7799_s6, 4  ;;  %s74_s25 = int_to_ptr.hbm [resolvable:$true] %s73_s25 }
   0x6   :  { %s50_s22 = sshll.u32 %s4914_s21, 4  ;;  %s4915_s26 = smov [#allocation8]   ;;  %s51_s22 = int_to_ptr.vmem [resolvable:$true] %s50_s22 }
   0x7   :  { %53 = dma.hbm_to_vmem [thread:$0]  %s49_s20, 32, %s51_s22, [#allocation6]  }
   0x8   :  { %s75_s27 = sshll.u32 %s4915_s26, 4  ;;  %s99_s30 = sshll.u32 %s7802_s9, 4  ;;  %s76_s27 = int_to_ptr.vmem [resolvable:$true] %s75_s27  ;;  %s100_s30 = int_to_ptr.hbm [resolvable:$true] %s99_s30 }
   0x9   :  { %s4916_s3 = smov 256   ;;  %s4917_s16 = smov 16  }
   0xa   :  { %81 = dma.hbm_to_vmem [thread:$0]  %s74_s25, 2560, %s76_s27, [#allocation9], %s4916_s3, %s4916_s3, %s4917_s16  }
   0xb   :  { %s125_s19 = sshll.u32 %s7804_s11, 4  ;;  %s4918_s20 = smov [#allocation11]   ;;  %s126_s19 = int_to_ptr.hbm [resolvable:$true] %s125_s19 }
   0xc   :  { %s101_s21 = sshll.u32 %s4918_s20, 4  ;;  %s4919_s6 = smov [#allocation14]   ;;  %s102_s21 = int_to_ptr.vmem [resolvable:$true] %s101_s21 }
   0xd   :  { %107 = dma.hbm_to_vmem [thread:$0]  %s100_s30, 5120, %s102_s21, [#allocation12], %s4916_s3, %s4916_s3, %s4917_s16  }
   0xe   :  { %s127_s22 = sshll.u32 %s4919_s6, 4  ;;  %s32_s9 = sshll.u32 %s7794_s1, 4  ;;  %s128_s22 = int_to_ptr.vmem [resolvable:$true] %s127_s22  ;;  %s33_s9 = int_to_ptr.hbm [resolvable:$true] %s32_s9 }
   0xf   :  { %133 = dma.hbm_to_vmem [thread:$0]  %s126_s19, 2048, %s128_s22, [#allocation15], %s4916_s3, %s4916_s3, %s4917_s16  }
  0x10   :  { %s60_s27 = sshll.u32 %s7798_s5, 4  ;;  %s4920_s28 = smov [#allocation2]   ;;  %s61_s27 = int_to_ptr.hbm [resolvable:$true] %s60_s27 }
  0x11   :  { %s34_s11 = sshll.u32 %s4920_s28, 4  ;;  %s4921_s29 = smov [#allocation7]   ;;  %s35_s11 = int_to_ptr.vmem [resolvable:$true] %s34_s11 }
  0x12   :  { %40 = dma.hbm_to_vmem [thread:$0]  %s33_s9, 512, %s35_s11, [#allocation3], %s4916_s3, %s4916_s3, %s4917_s16  }
  0x13   :  { %s62_s30 = sshll.u32 %s4921_s29, 4  ;;  %s89_s20 = sshll.u32 %s7801_s8, 4  ;;  %s63_s30 = int_to_ptr.vmem [resolvable:$true] %s62_s30  ;;  %s90_s20 = int_to_ptr.hbm [resolvable:$true] %s89_s20 }
  0x14   :  { %68 = dma.hbm_to_vmem [thread:$0]  %s61_s27, 5120, %s63_s30, [#allocation6], %s4916_s3, %s4916_s3, %s4917_s16  }
  0x15   :  { %s112_s21 = sshll.u32 %s7803_s10, 4  ;;  %s4922_s6 = smov [#allocation10]   ;;  %s113_s21 = int_to_ptr.hbm [resolvable:$true] %s112_s21 }
  0x16   :  { %s91_s5 = sshll.u32 %s4922_s6, 4  ;;  %s4923_s22 = smov [#allocation13]   ;;  %s92_s5 = int_to_ptr.vmem [resolvable:$true] %s91_s5 }
  0x17   :  { %94 = dma.hbm_to_vmem [thread:$0]  %s90_s20, 64, %s92_s5, [#allocation9]  }
  0x18   :  { %s114_s23 = sshll.u32 %s4923_s22, 4  ;;  %s4924_s24 = smov 128   ;;  %s115_s23 = int_to_ptr.vmem [resolvable:$true] %s114_s23 }
  0x19   :  { %s4925_s9 = smov 8   ;;  %s140_s16 = sshll.u32 %s7806_s13, 4  ;;  %s141_s16 = int_to_ptr.hbm [resolvable:$true] %s140_s16 }
  0x1a   :  { %120 = dma.hbm_to_vmem [thread:$0]  %s113_s21, 2560, %s115_s23, [#allocation12], %s4924_s24, %s4924_s24, %s4925_s9  }
  0x1b   :  { %s4926_s10 = smov [#allocation16]  }
  0x1c   :  { %s142_s26 = sshll.u32 %s4926_s10, 4  ;;  %s143_s26 = int_to_ptr.vmem [resolvable:$true] %s142_s26 }
  0x1d   :  { %148 = dma.hbm_to_vmem [thread:$0]  %s141_s16, 2048, %s143_s26, [#allocation15], %s4924_s24, %s4924_s24, %s4925_s9  }
  0x1e   :  { %4902 = dma.done.wait [#allocation3], 512  }
  0x1f   :  { %4903 = vsyncadd [#allocation3], 4294966784 }
  0x20   :  { %4904 = dma.done.wait [#allocation6], 5152  }
  0x21   :  { %4905 = vsyncadd [#allocation6], 4294962144 }
  0x22   :  { %4906 = dma.done.wait [#allocation9], 2624  }
  0x23   :  { %4907 = vsyncadd [#allocation9], 4294964672 }
  0x24   :  { %4908 = dma.done.wait [#allocation12], 7680  }
  0x25   :  { %4909 = vsyncadd [#allocation12], 4294959616 }
  0x26   :  { %4910 = dma.done.wait [#allocation15], 4096  }
  0x27   :  { %4911 = vsyncadd [#allocation15], 4294963200  ;;  %vm230_vm0 = vcmask 1041408   ;;  %v201_v0 = vld [vmem:[#allocation2 + $0x10] sm:$0x3]  ;;  %v199_v2 = vld [vmem:[#allocation2] sm:$0xff] }
  0x28   :  { %v202_v1 = vld [vmem:[#allocation2 + $0x18] sm:$0x3]  ;;  %3990 = vmatpush.msk.msra.mxu0 %vm230_vm0, %v201_v0  ;;  %v200_v3 = vld [vmem:[#allocation2 + $0x8] sm:$0xff]  ;;  %vm205_vm1 = vcmask 80896   ;;  %v188_v5 = vld [vmem:[%s7793_s0 + $0x8] sm:$0xff]  ;;  %vm356_vm2 = vcmask 261120  }
  0x29   :  { %3999 = vmatpush.msk.msra.mxu1 %vm230_vm0, %v202_v1  ;;  %v187_v4 = vld [vmem:[%s7793_s0] sm:$0xff]  ;;  %v189_v6 = vld [vmem:[%s7793_s0 + $0x10] sm:$0xff]  ;;  %v190_v7 = vld [vmem:[%s7793_s0 + $0x18] sm:$0xff]  ;;  %vm502_vm3 = vcmask 1040384   ;;  %vm477_vm4 = vcmask 7168   ;;  %s4928_s3 = smov 64  }
  0x2a   :  { %252 = vmatpush.msra.mxu0 %v199_v2  ;;  %v350_v8 = vld [vmem:[%s7795_s2 + $0x78] sm:$0xff]  ;;  %v349_v9 = vld [vmem:[%s7795_s2 + $0x70] sm:$0xff]  ;;  %v348_v10 = vld [vmem:[%s7795_s2 + $0x68] sm:$0xff]  ;;  %s4929_s26 = smov 78   ;;  %s4931_s27 = smov 28  }
  0x2b   :  { %293 = vmatpush.msra.mxu1 %v200_v3  ;;  %3991 = vmatmul.msk.f32.vlgmr.msra.gmra.mxu0 %vm205_vm1, %v187_v4  ;;  %v347_v11 = vld [vmem:[%s7795_s2 + $0x60] sm:$0xff]  ;;  %v354_v12 = vld [vmem:[%s7795_s2 + $0x98] sm:$0xff]  ;;  %v345_v15 = vld [vmem:[%s7795_s2 + $0x50] sm:$0xff] }
  0x2c   :  { %4000 = vmatmul.msk.f32.vlgmr.msra.gmra.mxu1 %vm205_vm1, %v187_v4  ;;  %381 = vmatpush.msrb.mxu0 %v350_v8  ;;  %v191_v13 = vld [vmem:[%s7793_s0 + $0x20] sm:$0xff]  ;;  %v346_v14 = vld [vmem:[%s7795_s2 + $0x58] sm:$0xff]  ;;  %v344_v16 = vld [vmem:[%s7795_s2 + $0x48] sm:$0xff] }
  0x2d   :  { %4237 = vmatpush.msra.mxu2 %v350_v8  ;;  %434 = vmatpush.msra.mxu3 %v354_v12  ;;  %v343_v17 = vld [vmem:[%s7795_s2 + $0x40] sm:$0xff]  ;;  %v192_v18 = vld [vmem:[%s7793_s0 + $0x28] sm:$0xff]  ;;  %v342_v19 = vld [vmem:[%s7795_s2 + $0x38] sm:$0xff] }
  0x2e   :  { %382 = vmatpush.msrb.mxu0 %v349_v9  ;;  %v341_v20 = vld [vmem:[%s7795_s2 + $0x30] sm:$0xff]  ;;  %v340_v21 = vld [vmem:[%s7795_s2 + $0x28] sm:$0xff]  ;;  %v339_v22 = vld [vmem:[%s7795_s2 + $0x20] sm:$0xff] }
  0x2f   :  { %4238 = vmatpush.msra.mxu2 %v349_v9  ;;  %v193_v23 = vld [vmem:[%s7793_s0 + $0x30] sm:$0xff]  ;;  %v338_v24 = vld [vmem:[%s7795_s2 + $0x18] sm:$0xff]  ;;  %v336_v28 = vld [vmem:[%s7795_s2 + $0x8] sm:$0xff] }
  0x30   :  { %383 = vmatpush.msrb.mxu0 %v348_v10  ;;  %v194_v25 = vld [vmem:[%s7793_s0 + $0x38] sm:$0xff]  ;;  %v337_v26 = vld [vmem:[%s7795_s2 + $0x10] sm:$0xff]  ;;  %v352_v29 = vld [vmem:[%s7795_s2 + $0x88] sm:$0xff] }
  0x31   :  { %4239 = vmatpush.msra.mxu2 %v348_v10  ;;  %v353_v27 = vld [vmem:[%s7795_s2 + $0x90] sm:$0xff]  ;;  %v335_v30 = vld [vmem:[%s7795_s2] sm:$0xff]  ;;  %v5156_v33 = vld [vmem:[%s7807_s14 + $0x8] sm:$0xff] }
  0x32   :  { %384 = vmatpush.msrb.mxu0 %v347_v11  ;;  %435 = vmatpush.msra.mxu3 %v353_v27  ;;  %v351_v31 = vld [vmem:[%s7795_s2 + $0x80] sm:$0xff]  ;;  %v5162_v35 = vperm.slane %v5156_v33, 0  ;;  %v471_v60 = vld [vmem:[#allocation5] sm:$0x3]  ;;  %v916_v27 = vld [vmem:[%s7797_s4 + $0xb8] sm:$0xff] }
  0x33   :  { %3992 = vmatmul.msk.f32.gmra.mxu0 %vm205_vm1, %v188_v5  ;;  %4240 = vmatpush.msra.mxu2 %v347_v11  ;;  %v5151_v32 = vld [vmem:[%s7807_s14] sm:$0xff]  ;;  %v475_v61 = vperm.slane %v471_v60, 0  ;;  %v476_v62 = vperm.slane %v471_v60, 1 }
  0x34   :  { %4001 = vmatmul.msk.f32.gmra.mxu1 %vm205_vm1, %v188_v5  ;;  %385 = vmatpush.msrb.mxu0 %v346_v14  ;;  %v5159_v34 = vperm.slane %v5151_v32, 0  ;;  %v921_v60 = vld [vmem:[%s7797_s4 + $0xe0] sm:$0xff] }
  0x35   :  { %4241 = vmatpush.msra.mxu2 %v346_v14  ;;  %436 = vmatpush.msra.mxu3 %v352_v29  ;;  %v912_v29 = vld [vmem:[%s7797_s4 + $0x98] sm:$0xff] }
  0x36   :  { %386 = vmatpush.msrb.mxu0 %v345_v15  ;;  %4025 = vmatpush.msk.msrb.mxu1 %vm502_vm3, %v476_v62 }
  0x37   :  { %4242 = vmatpush.msra.mxu2 %v345_v15  ;;  %437 = vmatpush.msra.mxu3 %v351_v31  ;;  %v908_v31 = vld [vmem:[%s7797_s4 + $0x78] sm:$0xff] }
  0x38   :  { %387 = vmatpush.msrb.mxu0 %v344_v16 }
  0x39   :  { %4243 = vmatpush.msra.mxu2 %v344_v16  ;;  %4253 = vmatpush.msk.msrb.mxu3 %vm502_vm3, %v475_v61 }
  0x3a   :  { %388 = vmatpush.msrb.mxu0 %v343_v17 }
  0x3b   :  { %3993 = vmatmul.msk.f32.gmra.mxu0 %vm205_vm1, %v189_v6  ;;  %4244 = vmatpush.msra.mxu2 %v343_v17 }
  0x3c   :  { %4002 = vmatmul.msk.f32.gmra.mxu1 %vm205_vm1, %v189_v6  ;;  %389 = vmatpush.msrb.mxu0 %v342_v19 }
  0x3d   :  { %4245 = vmatpush.msra.mxu2 %v342_v19 }
  0x3e   :  { %390 = vmatpush.msrb.mxu0 %v341_v20 }
  0x3f   :  { %4246 = vmatpush.msra.mxu2 %v341_v20 }
  0x40   :  { %391 = vmatpush.msrb.mxu0 %v340_v21 }
  0x41   :  { %4247 = vmatpush.msra.mxu2 %v340_v21 }
  0x42   :  { %392 = vmatpush.msrb.mxu0 %v339_v22 }
  0x43   :  { %3994 = vmatmul.msk.f32.gmra.mxu0 %vm205_vm1, %v190_v7  ;;  %4248 = vmatpush.msra.mxu2 %v339_v22 }
  0x44   :  { %4003 = vmatmul.msk.f32.gmra.mxu1 %vm205_vm1, %v190_v7  ;;  %393 = vmatpush.msrb.mxu0 %v338_v24 }
  0x45   :  { %4249 = vmatpush.msra.mxu2 %v338_v24  ;;  %v922_v24 = vld [vmem:[%s7797_s4 + $0xe8] sm:$0xff] }
  0x46   :  { %394 = vmatpush.msrb.mxu0 %v337_v26 }
  0x47   :  { %4250 = vmatpush.msra.mxu2 %v337_v26  ;;  %v918_v26 = vld [vmem:[%s7797_s4 + $0xc8] sm:$0xff] }
  0x48   :  { %395 = vmatpush.msrb.mxu0 %v336_v28 }
  0x49   :  { %4251 = vmatpush.msra.mxu2 %v336_v28  ;;  %v914_v28 = vld [vmem:[%s7797_s4 + $0xa8] sm:$0xff] }
  0x4a   :  { %396 = vmatpush.msrb.mxu0 %v335_v30 }
  0x4b   :  { %3995 = vmatmul.msk.f32.gmra.mxu0 %vm205_vm1, %v191_v13  ;;  %4252 = vmatpush.msra.mxu2 %v335_v30  ;;  %v910_v30 = vld [vmem:[%s7797_s4 + $0x88] sm:$0xff] }
  0x4c   :  { %4004 = vmatmul.msk.f32.gmra.mxu1 %vm205_vm1, %v191_v13  ;;  %4016 = vmatpush.msk.msra.mxu0 %vm502_vm3, %v475_v61  ;;  %v930_v61 = vld [vmem:[%s7797_s4 + $0x128] sm:$0xff] }
  0x4d   :  { %4254 = vmatpush.msk.msrb.mxu2 %vm502_vm3, %v476_v62 }
  0x53   :  { %3996 = vmatmul.msk.f32.gmra.mxu0 %vm205_vm1, %v192_v18 }
  0x54   :  { %4005 = vmatmul.msk.f32.gmra.mxu1 %vm205_vm1, %v192_v18 }
  0x5b   :  { %3997 = vmatmul.msk.f32.gmra.mxu0 %vm205_vm1, %v193_v23 }
  0x5c   :  { %4006 = vmatmul.msk.f32.gmra.mxu1 %vm205_vm1, %v193_v23  ;;  %v924_v23 = vld [vmem:[%s7797_s4 + $0xf8] sm:$0xff] }
  0x63   :  { %3998 = vmatmul.msk.f32.gmra.mxu0 %vm205_vm1, %v194_v25 }
  0x64   :  { %4007 = vmatmul.msk.f32.gmra.mxu1 %vm205_vm1, %v194_v25  ;;  %v920_v25 = vld [vmem:[%s7797_s4 + $0xd8] sm:$0xff] }
  0xa8   :  { %v254_v36 = vpop.f32.mrf.mxu0 }
  0xa9   :  { %v295_v37 = vpop.f32.mrf.mxu1  ;;  %v255_v38 = vadd.f32 %v254_v36, %v5159_v34  ;;  %v904_v36 = vld [vmem:[%s7797_s4 + $0x58] sm:$0xff] }
  0xaa   :  { %v296_v39 = vadd.f32 %v295_v37, %v5162_v35 }
  0xab   :  { %v5166_v40 = vmax.f32 %v255_v38, 0.0  ;;  %v902_v38 = vld [vmem:[%s7797_s4 + $0x48] sm:$0xff] }
  0xac   :  { %v5168_v41 = vmax.f32 %v296_v39, 0.0 }
  0xad   :  { %397 = vmatmul.f32.vlgmr.msrb.gmra.mxu0 %v5166_v40 }
  0xae   :  { %4008 = vmatmul.msk.f32.vlgmr.msra.gmra.mxu3 %vm356_vm2, %v5168_v41  ;;  %1017 = vmatpush.msrb.mxu0 %v924_v23  ;;  %v929_v23 = vld [vmem:[%s7797_s4 + $0x120] sm:$0xff] }
  0xb0   :  { %v257_v42 = vpop.f32.mrf.mxu0  ;;  %1018 = vmatpush.msrb.mxu0 %v922_v24 }
  0xb1   :  { %v298_v43 = vpop.f32.mrf.mxu1  ;;  %v258_v44 = vadd.f32 %v257_v42, %v5159_v34  ;;  %v900_v42 = vld [vmem:[%s7797_s4 + $0x38] sm:$0xff] }
  0xb2   :  { %v299_v45 = vadd.f32 %v298_v43, %v5162_v35  ;;  %1019 = vmatpush.msrb.mxu0 %v920_v25 }
  0xb3   :  { %v5175_v46 = vmax.f32 %v258_v44, 0.0 }
  0xb4   :  { %v5177_v47 = vmax.f32 %v299_v45, 0.0  ;;  %1020 = vmatpush.msrb.mxu0 %v918_v26  ;;  %v898_v45 = vld [vmem:[%s7797_s4 + $0x28] sm:$0xff] }
  0xb5   :  { %400 = vmatmul.f32.vlgmr.msra.gmra.mxu2 %v5175_v46 }
  0xb6   :  { %4009 = vmatmul.msk.f32.gmra.mxu3 %vm356_vm2, %v5177_v47  ;;  %1021 = vmatpush.msrb.mxu0 %v916_v27  ;;  %v905_v27 = vld [vmem:[%s7797_s4 + $0x60] sm:$0xff] }
  0xb8   :  { %v260_v48 = vpop.f32.mrf.mxu0  ;;  %1022 = vmatpush.msrb.mxu0 %v914_v28 }
  0xb9   :  { %v301_v49 = vpop.f32.mrf.mxu1  ;;  %v261_v50 = vadd.f32 %v260_v48, %v5159_v34 }
  0xba   :  { %v302_v51 = vadd.f32 %v301_v49, %v5162_v35  ;;  %1023 = vmatpush.msrb.mxu0 %v912_v29  ;;  %v896_v49 = vld [vmem:[%s7797_s4 + $0x18] sm:$0xff]  ;;  %v903_v29 = vld [vmem:[%s7797_s4 + $0x50] sm:$0xff] }
  0xbb   :  { %v5184_v52 = vmax.f32 %v261_v50, 0.0  ;;  %v894_v50 = vld [vmem:[%s7797_s4 + $0x8] sm:$0xff] }
  0xbc   :  { %v5186_v53 = vmax.f32 %v302_v51, 0.0  ;;  %1024 = vmatpush.msrb.mxu0 %v910_v30  ;;  %v923_v51 = vld [vmem:[%s7797_s4 + $0xf0] sm:$0xff] }
  0xbd   :  { %403 = vmatmul.f32.gmra.mxu2 %v5184_v52  ;;  %935 = vmatpush.msra.mxu3 %v923_v51 }
  0xbe   :  { %4010 = vmatmul.msk.f32.gmra.mxu3 %vm356_vm2, %v5186_v53  ;;  %1025 = vmatpush.msrb.mxu0 %v908_v31  ;;  %v901_v31 = vld [vmem:[%s7797_s4 + $0x40] sm:$0xff] }
  0xbf   :  { %936 = vmatpush.msra.mxu3 %v921_v60 }
  0xc0   :  { %v263_v54 = vpop.f32.mrf.mxu0 }
  0xc1   :  { %v304_v55 = vpop.f32.mrf.mxu1  ;;  %v264_v56 = vadd.f32 %v263_v54, %v5159_v34 }
  0xc2   :  { %v305_v57 = vadd.f32 %v304_v55, %v5162_v35 }
  0xc3   :  { %v5193_v58 = vmax.f32 %v264_v56, 0.0  ;;  %v932_v56 = vld [vmem:[%s7797_s4 + $0x138] sm:$0xff] }
  0xc4   :  { %v5195_v59 = vmax.f32 %v305_v57, 0.0  ;;  %1070 = vmatpush.msra.mxu1 %v932_v56 }
  0xc5   :  { %406 = vmatmul.f32.gmra.mxu2 %v5193_v58 }
  0xc6   :  { %4011 = vmatmul.msk.f32.gmra.mxu3 %vm356_vm2, %v5195_v59  ;;  %1071 = vmatpush.msra.mxu1 %v930_v61 }
  0xc8   :  { %v266_v63 = vpop.f32.mrf.mxu0 }
  0xc9   :  { %v307_v0 = vpop.f32.mrf.mxu1  ;;  %v267_v1 = vadd.f32 %v266_v63, %v5159_v34  ;;  %v919_v63 = vld [vmem:[%s7797_s4 + $0xd0] sm:$0xff] }
  0xca   :  { %v308_v2 = vadd.f32 %v307_v0, %v5162_v35  ;;  %v928_v0 = vld [vmem:[%s7797_s4 + $0x118] sm:$0xff]  ;;  %937 = vmatpush.msra.mxu3 %v919_v63 }
  0xcb   :  { %v5202_v3 = vmax.f32 %v267_v1, 0.0  ;;  %1072 = vmatpush.msra.mxu1 %v928_v0 }
  0xcc   :  { %v5204_v4 = vmax.f32 %v308_v2, 0.0  ;;  %v917_v2 = vld [vmem:[%s7797_s4 + $0xc0] sm:$0xff] }
  0xcd   :  { %7828 = vst [vmem:[#allocation24_spill] sm:$0xff] %v5202_v3  ;;  %409 = vmatmul.f32.gmra.mxu2 %v5202_v3  ;;  %938 = vmatpush.msra.mxu3 %v917_v2 }
  0xce   :  { %4012 = vmatmul.msk.f32.gmra.mxu3 %vm356_vm2, %v5204_v4 }
  0xd0   :  { %v269_v5 = vpop.f32.mrf.mxu0 }
  0xd1   :  { %v310_v6 = vpop.f32.mrf.mxu1  ;;  %v270_v7 = vadd.f32 %v269_v5, %v5159_v34  ;;  %v926_v5 = vld [vmem:[%s7797_s4 + $0x108] sm:$0xff] }
  0xd2   :  { %v311_v8 = vadd.f32 %v310_v6, %v5162_v35  ;;  %v915_v6 = vld [vmem:[%s7797_s4 + $0xb0] sm:$0xff]  ;;  %1073 = vmatpush.msra.mxu1 %v926_v5 }
  0xd3   :  { %v5211_v9 = vmax.f32 %v270_v7, 0.0  ;;  %939 = vmatpush.msra.mxu3 %v915_v6 }
  0xd4   :  { %v5213_v10 = vmax.f32 %v311_v8, 0.0 }
  0xd5   :  { %7829 = vst [vmem:[#allocation25_spill] sm:$0xff] %v5211_v9  ;;  %412 = vmatmul.f32.gmra.mxu2 %v5211_v9 }
  0xd6   :  { %4013 = vmatmul.msk.f32.gmra.mxu3 %vm356_vm2, %v5213_v10 }
  0xd8   :  { %v272_v11 = vpop.f32.mrf.mxu0 }
  0xd9   :  { %v313_v12 = vpop.f32.mrf.mxu1  ;;  %v273_v13 = vadd.f32 %v272_v11, %v5159_v34 }
  0xda   :  { %v314_v14 = vadd.f32 %v313_v12, %v5162_v35  ;;  %v913_v12 = vld [vmem:[%s7797_s4 + $0xa0] sm:$0xff] }
  0xdb   :  { %v5220_v15 = vmax.f32 %v273_v13, 0.0  ;;  %v931_v13 = vld [vmem:[%s7797_s4 + $0x130] sm:$0xff]  ;;  %940 = vmatpush.msra.mxu3 %v913_v12 }
  0xdc   :  { %v5222_v16 = vmax.f32 %v314_v14, 0.0  ;;  %988 = vmatpush.msra.mxu2 %v931_v13 }
  0xdd   :  { %7830 = vst [vmem:[#allocation26_spill] sm:$0xff] %v5220_v15  ;;  %415 = vmatmul.f32.gmra.mxu2 %v5220_v15 }
  0xde   :  { %4014 = vmatmul.msk.f32.gmra.mxu3 %vm356_vm2, %v5222_v16  ;;  %989 = vmatpush.msra.mxu2 %v929_v23 }
  0xe0   :  { %v275_v17 = vpop.f32.mrf.mxu0 }
  0xe1   :  { %v316_v18 = vpop.f32.mrf.mxu1  ;;  %v276_v19 = vadd.f32 %v275_v17, %v5159_v34  ;;  %v906_v34 = vld [vmem:[%s7797_s4 + $0x68] sm:$0xff]  ;;  %v911_v17 = vld [vmem:[%s7797_s4 + $0x90] sm:$0xff] }
  0xe2   :  { %v317_v20 = vadd.f32 %v316_v18, %v5162_v35  ;;  %1026 = vmatpush.msrb.mxu0 %v906_v34  ;;  %v5267_v35 = vperm.slane %v5151_v32, 1  ;;  %941 = vmatpush.msra.mxu3 %v911_v17  ;;  %v927_v34 = vld [vmem:[%s7797_s4 + $0x110] sm:$0xff] }
  0xe3   :  { %v5229_v21 = vmax.f32 %v276_v19, 0.0  ;;  %v909_v19 = vld [vmem:[%s7797_s4 + $0x80] sm:$0xff]  ;;  %990 = vmatpush.msra.mxu2 %v927_v34 }
  0xe4   :  { %v5231_v22 = vmax.f32 %v317_v20, 0.0  ;;  %1027 = vmatpush.msrb.mxu0 %v904_v36  ;;  %v907_v20 = vld [vmem:[%s7797_s4 + $0x70] sm:$0xff]  ;;  %942 = vmatpush.msra.mxu3 %v909_v19 }
  0xe5   :  { %7831 = vst [vmem:[#allocation27_spill] sm:$0xff] %v5229_v21  ;;  %418 = vmatmul.f32.gmra.mxu2 %v5229_v21  ;;  %v899_v36 = vld [vmem:[%s7797_s4 + $0x30] sm:$0xff] }
  0xe6   :  { %4015 = vmatmul.msk.f32.gmra.mxu3 %vm356_vm2, %v5231_v22  ;;  %1028 = vmatpush.msrb.mxu0 %v902_v38 }
  0xe7   :  { %943 = vmatpush.msra.mxu3 %v907_v20 }
  0xe8   :  { %1029 = vmatpush.msrb.mxu0 %v900_v42 }
  0xe9   :  { %944 = vmatpush.msra.mxu3 %v905_v27 }
  0xea   :  { %1030 = vmatpush.msrb.mxu0 %v898_v45  ;;  %v895_v45 = vld [vmem:[%s7797_s4 + $0x10] sm:$0xff] }
  0xeb   :  { %945 = vmatpush.msra.mxu3 %v903_v29 }
  0xec   :  { %1031 = vmatpush.msrb.mxu0 %v896_v49  ;;  %v893_v49 = vld [vmem:[%s7797_s4] sm:$0xff] }
  0xed   :  { %946 = vmatpush.msra.mxu3 %v901_v31 }
  0xee   :  { %1032 = vmatpush.msrb.mxu0 %v894_v50 }
  0xef   :  { %947 = vmatpush.msra.mxu3 %v899_v36 }
 0x12a   :  { %v398_v37 = vpop.f32.mrf.mxu0 }
 0x12b   :  { %v399_v39 = vadd.f32 %v398_v37, %v5267_v35 }
 0x131   :  { %v439_v43 = vpop.f32.mrf.mxu3 }
 0x132   :  { %v440_v44 = vadd.f32 %v439_v43, %v399_v39  ;;  %v925_v39 = vld [vmem:[%s7797_s4 + $0x100] sm:$0xff] }
 0x133   :  { %v897_v43 = vld [vmem:[%s7797_s4 + $0x20] sm:$0xff]  ;;  %991 = vmatpush.msra.mxu2 %v925_v39  ;;  %s4927_s4 = smov 48  }
 0x134   :  { %v463_v48 = vmax.f32 %v440_v44, 0.0  ;;  %948 = vmatpush.msra.mxu3 %v897_v43 }
 0x136   :  { %4017 = vmatmul.msk.f32.vlgmr.msra.gmra.mxu0 %vm477_vm4, %v463_v48  ;;  %4026 = vmatmul.msk.f32.vlgmr.msrb.gmra.mxu1 %vm477_vm4, %v463_v48 }
 0x137   :  { %949 = vmatpush.msra.mxu3 %v895_v45 }
 0x138   :  { %v401_v54 = vpop.f32.mrf.mxu2 }
 0x139   :  { %v442_v55 = vpop.f32.mrf.mxu3  ;;  %v402_v57 = vadd.f32 %v401_v54, %v5267_v35  ;;  %950 = vmatpush.msra.mxu3 %v893_v49 }
 0x13b   :  { %v443_v62 = vadd.f32 %v442_v55, %v402_v57 }
 0x13d   :  { %v464_v1 = vmax.f32 %v443_v62, 0.0 }
 0x13f   :  { %4018 = vmatmul.msk.f32.gmra.mxu0 %vm477_vm4, %v464_v1  ;;  %4027 = vmatmul.msk.f32.gmra.mxu1 %vm477_vm4, %v464_v1 }
 0x140   :  { %v404_v7 = vpop.f32.mrf.mxu2 }
 0x141   :  { %v445_v8 = vpop.f32.mrf.mxu3  ;;  %v405_v11 = vadd.f32 %v404_v7, %v5267_v35  ;;  %v5435_v7 = vperm.slane %v5156_v33, 2 }
 0x143   :  { %v446_v14 = vadd.f32 %v445_v8, %v405_v11 }
 0x145   :  { %v465_v18 = vmax.f32 %v446_v14, 0.0 }
 0x147   :  { %4019 = vmatmul.msk.f32.gmra.mxu0 %vm477_vm4, %v465_v18  ;;  %4028 = vmatmul.msk.f32.gmra.mxu1 %vm477_vm4, %v465_v18 }
 0x148   :  { %v407_v24 = vpop.f32.mrf.mxu2 }
 0x149   :  { %v448_v25 = vpop.f32.mrf.mxu3  ;;  %v408_v26 = vadd.f32 %v407_v24, %v5267_v35 }
 0x14b   :  { %v449_v28 = vadd.f32 %v448_v25, %v408_v26 }
 0x14d   :  { %v466_v30 = vmax.f32 %v449_v28, 0.0 }
 0x14f   :  { %4020 = vmatmul.msk.f32.gmra.mxu0 %vm477_vm4, %v466_v30  ;;  %4029 = vmatmul.msk.f32.gmra.mxu1 %vm477_vm4, %v466_v30 }
 0x150   :  { %v410_v37 = vpop.f32.mrf.mxu2 }
 0x151   :  { %v451_v38 = vpop.f32.mrf.mxu3  ;;  %v411_v42 = vadd.f32 %v410_v37, %v5267_v35 }
 0x153   :  { %v452_v44 = vadd.f32 %v451_v38, %v411_v42 }
 0x155   :  { %v467_v48 = vmax.f32 %v452_v44, 0.0 }
 0x157   :  { %4021 = vmatmul.msk.f32.vlgmr.msrb.gmra.mxu3 %vm477_vm4, %v467_v48  ;;  %4030 = vmatmul.msk.f32.gmra.mxu1 %vm477_vm4, %v467_v48 }
 0x158   :  { %1033 = vmatmul.f32.vlgmr.msrb.gmra.mxu0 %v5166_v40  ;;  %v413_v50 = vpop.f32.mrf.mxu2 }
 0x159   :  { %v454_v51 = vpop.f32.mrf.mxu3  ;;  %v414_v54 = vadd.f32 %v413_v50, %v5267_v35 }
 0x15b   :  { %v455_v55 = vadd.f32 %v454_v51, %v414_v54 }
 0x15d   :  { %v468_v56 = vmax.f32 %v455_v55, 0.0 }
 0x15f   :  { %4022 = vmatmul.msk.f32.gmra.mxu3 %vm477_vm4, %v468_v56  ;;  %4031 = vmatmul.msk.f32.vlgmr.msrb.gmra.mxu2 %vm477_vm4, %v468_v56 }
 0x160   :  { %1036 = vmatmul.f32.gmra.mxu0 %v5175_v46  ;;  %4058 = vmatmul.msk.f32.vlgmr.msra.gmra.mxu1 %vm356_vm2, %v5168_v41  ;;  %v416_v57 = vpop.f32.mrf.mxu2 }
 0x161   :  { %v457_v60 = vpop.f32.mrf.mxu3  ;;  %v417_v61 = vadd.f32 %v416_v57, %v5267_v35 }
 0x163   :  { %v458_v62 = vadd.f32 %v457_v60, %v417_v61 }
 0x165   :  { %v469_v63 = vmax.f32 %v458_v62, 0.0 }
 0x167   :  { %4023 = vmatmul.msk.f32.gmra.mxu3 %vm477_vm4, %v469_v63  ;;  %4032 = vmatmul.msk.f32.gmra.mxu2 %vm477_vm4, %v469_v63 }
 0x168   :  { %1039 = vmatmul.f32.gmra.mxu0 %v5184_v52  ;;  %4059 = vmatmul.msk.f32.gmra.mxu1 %vm356_vm2, %v5177_v47  ;;  %v419_v0 = vpop.f32.mrf.mxu2 }
 0x169   :  { %v460_v1 = vpop.f32.mrf.mxu3  ;;  %v420_v2 = vadd.f32 %v419_v0, %v5267_v35  ;;  %v5432_v35 = vperm.slane %v5151_v32, 2 }
 0x16b   :  { %v461_v5 = vadd.f32 %v460_v1, %v420_v2 }
 0x16d   :  { %v470_v6 = vmax.f32 %v461_v5, 0.0 }
 0x16f   :  { %4024 = vmatmul.msk.f32.gmra.mxu3 %vm477_vm4, %v470_v6  ;;  %4033 = vmatmul.msk.f32.gmra.mxu2 %vm477_vm4, %v470_v6 }
 0x170   :  { %1042 = vmatmul.f32.gmra.mxu0 %v5193_v58  ;;  %4060 = vmatmul.msk.f32.gmra.mxu1 %vm356_vm2, %v5186_v53 }
 0x177   :  { %951 = vmatmul.f32.vlgmr.msra.gmra.mxu3 %v5166_v40  ;;  %4050 = vmatmul.msk.f32.vlgmr.msra.gmra.mxu2 %vm356_vm2, %v5168_v41 }
 0x178   :  { %1045 = vmatmul.f32.gmra.mxu0 %v5202_v3  ;;  %4061 = vmatmul.msk.f32.gmra.mxu1 %vm356_vm2, %v5195_v59 }
 0x17f   :  { %954 = vmatmul.f32.gmra.mxu3 %v5175_v46  ;;  %4051 = vmatmul.msk.f32.gmra.mxu2 %vm356_vm2, %v5177_v47 }
 0x180   :  { %1048 = vmatmul.f32.gmra.mxu0 %v5211_v9  ;;  %4062 = vmatmul.msk.f32.gmra.mxu1 %vm356_vm2, %v5204_v4 }
 0x187   :  { %957 = vmatmul.f32.gmra.mxu3 %v5184_v52  ;;  %4052 = vmatmul.msk.f32.gmra.mxu2 %vm356_vm2, %v5186_v53 }
 0x188   :  { %1051 = vmatmul.f32.gmra.mxu0 %v5220_v15  ;;  %4063 = vmatmul.msk.f32.gmra.mxu1 %vm356_vm2, %v5213_v10 }
 0x18f   :  { %960 = vmatmul.f32.gmra.mxu3 %v5193_v58  ;;  %4053 = vmatmul.msk.f32.gmra.mxu2 %vm356_vm2, %v5195_v59 }
 0x190   :  { %1054 = vmatmul.f32.gmra.mxu0 %v5229_v21  ;;  %4064 = vmatmul.msk.f32.gmra.mxu1 %vm356_vm2, %v5222_v16 }
 0x197   :  { %963 = vmatmul.f32.gmra.mxu3 %v5202_v3  ;;  %4054 = vmatmul.msk.f32.gmra.mxu2 %vm356_vm2, %v5204_v4 }
 0x198   :  { %4065 = vmatmul.msk.f32.gmra.mxu1 %vm356_vm2, %v5231_v22 }
 0x19f   :  { %966 = vmatmul.f32.gmra.mxu3 %v5211_v9  ;;  %4055 = vmatmul.msk.f32.gmra.mxu2 %vm356_vm2, %v5213_v10  ;;  %v1437_v9 = vld [vmem:[#allocation7 + $0x10] sm:$0xff] }
 0x1a7   :  { %969 = vmatmul.f32.gmra.mxu3 %v5220_v15  ;;  %4056 = vmatmul.msk.f32.gmra.mxu2 %vm356_vm2, %v5222_v16 }
 0x1af   :  { %972 = vmatmul.f32.gmra.mxu3 %v5229_v21  ;;  %4057 = vmatmul.msk.f32.gmra.mxu2 %vm356_vm2, %v5231_v22 }
 0x1b3   :  { %v524_v8 = vpop.f32.mrf.mxu0  ;;  %v565_v11 = vpop.f32.mrf.mxu1 }
 0x1b4   :  { %v525_v12 = vadd.f32 %v524_v8, %v5432_v35  ;;  %v566_v13 = vadd.f32 %v565_v11, %v5435_v7 }
 0x1b6   :  { %v4034_v14 = vmul.f32 -1.442695, %v525_v12  ;;  %v4035_v17 = vmul.f32 -1.442695, %v566_v13 }
 0x1b8   :  { %4274 = vpow2.f32 %v4034_v14 }
 0x1b9   :  { %4276 = vpow2.f32 %v4035_v17 }
 0x1bc   :  { %v527_v18 = vpop.f32.mrf.mxu0  ;;  %v568_v19 = vpop.f32.mrf.mxu1 }
 0x1bd   :  { %v528_v23 = vadd.f32 %v527_v18, %v5432_v35  ;;  %v569_v24 = vadd.f32 %v568_v19, %v5435_v7 }
 0x1be   :  { %v4275_v20 = vpop.eup %4274 }
 0x1bf   :  { %v4277_v25 = vpop.eup %4276  ;;  %v5441_v26 = vadd.f32 1.0, %v4275_v20  ;;  %v4036_v27 = vmul.f32 -1.442695, %v528_v23  ;;  %v4037_v28 = vmul.f32 -1.442695, %v569_v24  ;;  %v5485_v23 = vperm.slane %v5156_v33, 3 }
 0x1c0   :  { %v5444_v29 = vadd.f32 1.0, %v4277_v25 }
 0x1c1   :  { %4278 = vrcp.f32 %v5441_v26  ;;  %v662_v5 = vand.u32 2147483647, %v5441_v26  ;;  %v664_v6 = vand.u32 2147483648, %v5441_v26  ;;  %vm658_vm6 = vweird.f32 %v5441_v26 }
 0x1c2   :  { %4280 = vpow2.f32 %v4036_v27  ;;  %v679_v8 = vand.u32 2147483648, %v5444_v29  ;;  %v677_v14 = vand.u32 2147483647, %v5444_v29  ;;  %vm673_vm5 = vweird.f32 %v5444_v29 }
 0x1c3   :  { %4282 = vpow2.f32 %v4037_v28  ;;  %vm5488_vm7 = vcmp.eq.f32.partialorder %v662_v5, 8.507059e+37  ;;  %v665_v27 = vor.u32 1.1754944e-38, %v664_v6  ;;  %v1461_v6 = vld [vmem:[#allocation7 + $0xd0] sm:$0xff] }
 0x1c4   :  { %v530_v30 = vpop.f32.mrf.mxu0  ;;  %v571_v31 = vpop.f32.mrf.mxu1  ;;  %4284 = vrcp.f32 %v5444_v29  ;;  %vm5499_vm10 = vcmp.eq.f32.partialorder %v677_v14, 8.507059e+37 }
 0x1c5   :  { %v572_v34 = vadd.f32 %v571_v31, %v5435_v7  ;;  %v531_v44 = vadd.f32 %v530_v30, %v5432_v35  ;;  %v5492_v30 = vor.u32 1.1754944e-38, %v679_v8  ;;  %v1471_v8 = vld [vmem:[#allocation7 + $0x120] sm:$0xff] }
 0x1c7   :  { %v5448_v36 = vpop.eup %4278  ;;  %v4039_v37 = vmul.f32 -1.442695, %v572_v34  ;;  %v4038_v55 = vmul.f32 -1.442695, %v531_v44 }
 0x1c8   :  { %v4281_v38 = vpop.eup %4280  ;;  %v654_v48 = vmul.f32 %v5448_v36, %v5441_v26  ;;  %vm659_vm8 = vweird.f32 %v5448_v36 }
 0x1c9   :  { %v4283_v39 = vpop.eup %4282  ;;  %v5450_v42 = vadd.f32 1.0, %v4281_v38  ;;  %4286 = vpow2.f32 %v4039_v37  ;;  %v1465_v38 = vld [vmem:[#allocation7 + $0xf0] sm:$0xff]  ;;  %vm5522_vm13 = vmor %vm658_vm6, %vm659_vm8 }
 0x1ca   :  { %v5452_v43 = vadd.f32 1.0, %v4283_v39  ;;  %v5455_v45 = vpop.eup %4284  ;;  %v655_v60 = vsub.f32 1.0, %v654_v48  ;;  %v1473_v39 = vld [vmem:[#allocation7 + $0x130] sm:$0xff]  ;;  %1499 = vmatpush.msrb.mxu3 %v1465_v38  ;;  %v1470_v38 = vld [vmem:[#allocation7 + $0x118] sm:$0xff] }
 0x1cb   :  { %4288 = vrcp.f32 %v5450_v42  ;;  %v669_v54 = vmul.f32 %v5455_v45, %v5444_v29  ;;  %vm674_vm9 = vweird.f32 %v5455_v45  ;;  %1552 = vmatpush.msrb.mxu2 %v1473_v39  ;;  %vm688_vm11 = vweird.f32 %v5450_v42  ;;  %v1469_v29 = vld [vmem:[#allocation7 + $0x110] sm:$0xff] }
 0x1cc   :  { %4290 = vrcp.f32 %v5452_v43  ;;  %v533_v49 = vpop.f32.mrf.mxu0  ;;  %v574_v50 = vpop.f32.mrf.mxu1  ;;  %v656_v12 = vmul.f32 %v5448_v36, %v655_v60  ;;  %vm703_vm12 = vweird.f32 %v5452_v43  ;;  %v694_v14 = vand.u32 2147483648, %v5450_v42  ;;  %vm5536_vm14 = vmor %vm673_vm5, %vm674_vm9 }
 0x1cd   :  { %v575_v51 = vadd.f32 %v574_v50, %v5435_v7  ;;  %v534_v56 = vadd.f32 %v533_v49, %v5432_v35  ;;  %v670_v1 = vsub.f32 1.0, %v669_v54  ;;  %4292 = vpow2.f32 %v4038_v55  ;;  %v1474_v54 = vld [vmem:[#allocation7 + $0x138] sm:$0xff]  ;;  %1553 = vmatpush.msrb.mxu2 %v1471_v8 }
 0x1ce   :  { %v657_v31 = vadd.f32 %v5448_v36, %v656_v12  ;;  %v709_v55 = vand.u32 2147483648, %v5452_v43  ;;  %1634 = vmatpush.msrb.mxu1 %v1474_v54 }
 0x1cf   :  { %v4287_v57 = vpop.eup %4286  ;;  %v4041_v61 = vmul.f32 -1.442695, %v575_v51  ;;  %v4040_v2 = vmul.f32 -1.442695, %v534_v56  ;;  %v671_v20 = vmul.f32 %v5455_v45, %v670_v1  ;;  %v692_v56 = vand.u32 2147483647, %v5450_v42  ;;  %1554 = vmatpush.msrb.mxu2 %v1469_v29 }
 0x1d0   :  { %v5467_v63 = vadd.f32 1.0, %v4287_v57  ;;  %v707_v1 = vand.u32 2147483647, %v5452_v43  ;;  %v661_v12 = vsel %vm5522_vm13, %v5448_v36, %v657_v31  ;;  %v5549_v39 = vor.u32 1.1754944e-38, %v709_v55  ;;  %v1467_v55 = vld [vmem:[#allocation7 + $0x100] sm:$0xff] }
 0x1d1   :  { %v5465_v62 = vpop.eup %4288  ;;  %v5504_v49 = vadd.f32 %v5455_v45, %v671_v20  ;;  %vm5551_vm15 = vcmp.eq.f32.partialorder %v692_v56, 8.507059e+37  ;;  %v1468_v56 = vld [vmem:[#allocation7 + $0x108] sm:$0xff]  ;;  %1555 = vmatpush.msrb.mxu2 %v1467_v55  ;;  %v1462_v55 = vld [vmem:[#allocation7 + $0xd8] sm:$0xff] }
 0x1d2   :  { %v5469_v0 = vpop.eup %4290  ;;  %4294 = vrcp.f32 %v5467_v63  ;;  %v684_v13 = vmul.f32 %v5465_v62, %v5450_v42  ;;  %vm689_vm1 = vweird.f32 %v5465_v62  ;;  %vm5565_vm3 = vcmp.eq.f32.partialorder %v707_v1, 8.507059e+37 }
 0x1d3   :  { %4296 = vpow2.f32 %v4041_v61  ;;  %v699_v17 = vmul.f32 %v5469_v0, %v5452_v43  ;;  %v4293_v28 = vpop.eup %4292  ;;  %v1463_v61 = vld [vmem:[#allocation7 + $0xe0] sm:$0xff]  ;;  %vm704_vm4 = vweird.f32 %v5469_v0  ;;  %vm733_vm5 = vweird.f32 %v5467_v63  ;;  %vm5590_vm6 = vmor %vm688_vm11, %vm689_vm1 }
 0x1d4   :  { %v577_v11 = vpop.f32.mrf.mxu1  ;;  %4298 = vpow2.f32 %v4040_v2  ;;  %v685_v34 = vsub.f32 1.0, %v684_v13  ;;  %1500 = vmatpush.msrb.mxu3 %v1463_v61 }
 0x1d5   :  { %v578_v18 = vadd.f32 %v577_v11, %v5435_v7  ;;  %v1034_v19 = vpop.f32.mrf.mxu0  ;;  %v700_v33 = vsub.f32 1.0, %v699_v17  ;;  %v1472_v11 = vld [vmem:[#allocation7 + $0x128] sm:$0xff] }
 0x1d6   :  { %v1035_v5 = vadd.f32 %v1034_v19, %v5485_v23  ;;  %v686_v13 = vmul.f32 %v5465_v62, %v685_v34  ;;  %1635 = vmatpush.msrb.mxu1 %v1472_v11  ;;  %1501 = vmatpush.msrb.mxu3 %v1461_v6  ;;  %v1466_v6 = vld [vmem:[#allocation7 + $0xf8] sm:$0xff] }
 0x1d7   :  { %v4043_v24 = vmul.f32 -1.442695, %v578_v18  ;;  %v5540_v18 = vadd.f32 1.0, %v4293_v28  ;;  %v676_v28 = vsel %vm5536_vm14, %v5455_v45, %v5504_v49  ;;  %1581 = vmatpush.msra.mxu0 %v1466_v6  ;;  %v1460_v6 = vld [vmem:[#allocation7 + $0xc8] sm:$0xff] }
 0x1d8   :  { %v5496_v37 = vpop.eup %4294  ;;  %1636 = vmatpush.msrb.mxu1 %v1470_v38  ;;  %v687_v61 = vadd.f32 %v5465_v62, %v686_v13  ;;  %v5577_v1 = vsel %vm5499_vm10, %v5492_v30, %v676_v28 }
 0x1d9   :  { %4300 = vpow2.f32 %v4043_v24  ;;  %v4297_v48 = vpop.eup %4296  ;;  %v5508_v50 = vmul.f32 %v5496_v37, %v5467_v63  ;;  %v701_v24 = vmul.f32 %v5469_v0, %v700_v33  ;;  %v737_v33 = vand.u32 2147483647, %v5467_v63 }
 0x1da   :  { %v536_v51 = vpop.f32.mrf.mxu3  ;;  %v5513_v57 = vadd.f32 1.0, %v4297_v48  ;;  %v4299_v17 = vpop.eup %4298  ;;  %1637 = vmatpush.msrb.mxu1 %v1468_v56  ;;  %vm734_vm9 = vweird.f32 %v5496_v37 }
 0x1db   :  { %v537_v60 = vadd.f32 %v536_v51, %v5432_v35  ;;  %v730_v31 = vsub.f32 1.0, %v5508_v50  ;;  %v5558_v50 = vsel %vm5488_vm7, %v665_v27, %v661_v12  ;;  %v5561_v54 = vadd.f32 1.0, %v4299_v17  ;;  %vm5602_vm7 = vmor %vm703_vm12, %vm704_vm4 }
 0x1dc   :  { %4302 = vrcp.f32 %v5513_v57  ;;  %v702_v25 = vadd.f32 %v5469_v0, %v701_v24  ;;  %v695_v27 = vor.u32 1.1754944e-38, %v694_v14  ;;  %v1459_v14 = vld [vmem:[#allocation7 + $0xc0] sm:$0xff]  ;;  %v739_v17 = vand.u32 2147483648, %v5467_v63  ;;  %vm5645_vm10 = vmor %vm733_vm5, %vm734_vm9 }
 0x1dd   :  { %v4042_v19 = vmul.f32 -1.442695, %v537_v60  ;;  %v1037_v20 = vpop.f32.mrf.mxu0  ;;  %v1075_v36 = vpop.f32.mrf.mxu1  ;;  %v731_v8 = vmul.f32 %v5496_v37, %v730_v31  ;;  %1502 = vmatpush.msrb.mxu3 %v1459_v14  ;;  %vm5606_vm8 = vcmp.eq.f32.partialorder %v737_v33, 8.507059e+37  ;;  %v691_v24 = vsel %vm5590_vm6, %v5465_v62, %v687_v61  ;;  %v1458_v60 = vld [vmem:[#allocation7 + $0xb8] sm:$0xff] }
 0x1de   :  { %v1076_v34 = vadd.f32 %v1075_v36, %v1035_v5  ;;  %v1038_v26 = vadd.f32 %v1037_v20, %v5485_v23  ;;  %v706_v43 = vsel %vm5602_vm7, %v5469_v0, %v702_v25  ;;  %v5623_v61 = vperm.slane %v5151_v32, 3 }
 0x1df   :  { %v4301_v51 = vpop.eup %4300  ;;  %4304 = vpow2.f32 %v4042_v19  ;;  %v1464_v19 = vld [vmem:[#allocation7 + $0xe8] sm:$0xff]  ;;  %v732_v62 = vadd.f32 %v5496_v37, %v731_v8  ;;  %v5627_v0 = vsel %vm5551_vm15, %v695_v27, %v691_v24  ;;  %v767_v8 = vand.u32 2147483647, %v5513_v57  ;;  %v1455_v24 = vld [vmem:[#allocation7 + $0xa0] sm:$0xff] }
 0x1e0   :  { %v5563_v45 = vadd.f32 1.0, %v4301_v51  ;;  %v4067_v49 = vmul.f32 -1.442695, %v1076_v34  ;;  %4306 = vrcp.f32 %v5540_v18  ;;  %1582 = vmatpush.msra.mxu0 %v1464_v19  ;;  %v5639_v48 = vsel %vm5565_vm3, %v5549_v39, %v706_v43 }
 0x1e1   :  { %vm763_vm11 = vweird.f32 %v5513_v57  ;;  %v736_v39 = vsel %vm5645_vm10, %v5496_v37, %v732_v62  ;;  %vm5663_vm12 = vcmp.eq.f32.partialorder %v767_v8, 8.507059e+37 }
 0x1e2   :  { %4308 = vrcp.f32 %v5563_v45  ;;  %v539_v2 = vpop.f32.mrf.mxu3  ;;  %v580_v5 = vpop.f32.mrf.mxu2  ;;  %1583 = vmatpush.msra.mxu0 %v1462_v55  ;;  %v797_v43 = vand.u32 2147483647, %v5563_v45  ;;  %vm793_vm13 = vweird.f32 %v5563_v45 }
 0x1e3   :  { %v5581_v11 = vpop.eup %4302  ;;  %4310 = vpow2.f32 %v4067_v49  ;;  %v540_v12 = vadd.f32 %v539_v2, %v5432_v35  ;;  %v581_v13 = vadd.f32 %v580_v5, %v5435_v7  ;;  %v1457_v49 = vld [vmem:[#allocation7 + $0xb0] sm:$0xff]  ;;  %v740_v2 = vor.u32 1.1754944e-38, %v739_v17 }
 0x1e4   :  { %4312 = vrcp.f32 %v5561_v54  ;;  %v759_v44 = vmul.f32 %v5581_v11, %v5513_v57  ;;  %1503 = vmatpush.msrb.mxu3 %v1457_v49  ;;  %1584 = vmatpush.msra.mxu0 %v1460_v6  ;;  %vm764_vm14 = vweird.f32 %v5581_v11  ;;  %vm5704_vm3 = vcmp.eq.f32.partialorder %v797_v43, 8.507059e+37 }
 0x1e5   :  { %v4305_v31 = vpop.eup %4304  ;;  %v4044_v20 = vmul.f32 -1.442695, %v540_v12  ;;  %v4045_v34 = vmul.f32 -1.442695, %v581_v13  ;;  %v1040_v29 = vpop.f32.mrf.mxu0  ;;  %v769_v12 = vand.u32 2147483648, %v5513_v57  ;;  %vm5700_vm1 = vmor %vm763_vm11, %vm764_vm14 }
 0x1e6   :  { %v1078_v38 = vpop.f32.mrf.mxu1  ;;  %v760_v28 = vsub.f32 1.0, %v759_v44  ;;  %v5617_v51 = vadd.f32 1.0, %v4305_v31  ;;  %v5620_v56 = vpop.eup %4306  ;;  %1585 = vmatpush.msra.mxu0 %v1458_v60  ;;  %v799_v31 = vand.u32 2147483648, %v5563_v45  ;;  %1504 = vmatpush.msrb.mxu3 %v1455_v24 }
 0x1e7   :  { %v1079_v33 = vadd.f32 %v1078_v38, %v1038_v26  ;;  %4314 = vpow2.f32 %v4044_v20  ;;  %v1041_v20 = vadd.f32 %v1040_v29, %v5485_v23  ;;  %v5667_v37 = vor.u32 1.1754944e-38, %v769_v12 }
 0x1e8   :  { %v5629_v25 = vpop.eup %4308  ;;  %4316 = vrcp.f32 %v5617_v51  ;;  %v761_v63 = vmul.f32 %v5581_v11, %v760_v28  ;;  %v5672_v29 = vsel %vm5606_vm8, %v740_v2, %v736_v39  ;;  %v5677_v6 = vmul.f32 %v5620_v56, %v5540_v18 }
 0x1e9   :  { %v4069_v5 = vmul.f32 -1.442695, %v1079_v33  ;;  %v4311_v13 = vpop.eup %4310  ;;  %v789_v32 = vmul.f32 %v5629_v25, %v5563_v45  ;;  %4318 = vpow2.f32 %v4045_v34  ;;  %v1456_v34 = vld [vmem:[#allocation7 + $0xa8] sm:$0xff]  ;;  %vm794_vm15 = vweird.f32 %v5629_v25 }
 0x1ea   :  { %v5650_v14 = vpop.eup %4312  ;;  %v5652_v17 = vadd.f32 1.0, %v4311_v13  ;;  %v542_v30 = vpop.f32.mrf.mxu3  ;;  %1586 = vmatpush.msra.mxu0 %v1456_v34  ;;  %v762_v27 = vadd.f32 %v5581_v11, %v761_v63  ;;  %v1451_v63 = vld [vmem:[#allocation7 + $0x80] sm:$0xff]  ;;  %v715_v34 = vsub.f32 1.0, %v5677_v6  ;;  %vm5747_vm6 = vmor %vm793_vm13, %vm794_vm15 }
 0x1eb   :  { %4320 = vpow2.f32 %v4069_v5  ;;  %v583_v44 = vpop.f32.mrf.mxu2  ;;  %v790_v26 = vsub.f32 1.0, %v789_v32  ;;  %v543_v19 = vadd.f32 %v542_v30, %v5432_v35  ;;  %v1453_v5 = vld [vmem:[#allocation7 + $0x90] sm:$0xff]  ;;  %v1454_v32 = vld [vmem:[#allocation7 + $0x98] sm:$0xff]  ;;  %v5687_v30 = vor.u32 1.1754944e-38, %v799_v31 }
 0x1ec   :  { %v584_v36 = vadd.f32 %v583_v44, %v5435_v7  ;;  %4322 = vrcp.f32 %v5652_v17  ;;  %1505 = vmatpush.msrb.mxu3 %v1453_v5  ;;  %1587 = vmatpush.msra.mxu0 %v1454_v32  ;;  %v1189_v60 = vand.u32 2147483648, %v5652_v17  ;;  %vm1183_vm4 = vweird.f32 %v5652_v17 }
 0x1ed   :  { %v4315_v28 = vpop.eup %4314  ;;  %v4046_v33 = vmul.f32 -1.442695, %v543_v19  ;;  %v1043_v55 = vpop.f32.mrf.mxu0  ;;  %v791_v2 = vmul.f32 %v5629_v25, %v790_v26  ;;  %v1452_v26 = vld [vmem:[#allocation7 + $0x88] sm:$0xff]  ;;  %v766_v43 = vsel %vm5700_vm1, %v5581_v11, %v762_v27 }
 0x1ee   :  { %v4047_v49 = vmul.f32 -1.442695, %v584_v36  ;;  %v1081_v62 = vpop.f32.mrf.mxu1  ;;  %v5679_v8 = vpop.eup %4316  ;;  %v5681_v12 = vadd.f32 1.0, %v4315_v28  ;;  %v1187_v36 = vand.u32 2147483647, %v5652_v17  ;;  %1506 = vmatpush.msrb.mxu3 %v1451_v63  ;;  %1588 = vmatpush.msra.mxu0 %v1452_v26  ;;  %v1447_v26 = vld [vmem:[#allocation7 + $0x60] sm:$0xff] }
 0x1ef   :  { %v1082_v13 = vadd.f32 %v1081_v62, %v1041_v20  ;;  %v4319_v42 = vpop.eup %4318  ;;  %4324 = vpow2.f32 %v4046_v33  ;;  %v5713_v33 = vmul.f32 %v5679_v8, %v5617_v51  ;;  %v1449_v62 = vld [vmem:[#allocation7 + $0x70] sm:$0xff]  ;;  %v792_v32 = vadd.f32 %v5629_v25, %v791_v2 }
 0x1f0   :  { %7854 = vst [vmem:[#allocation28_spill] sm:$0xff] %v5681_v12  ;;  %4326 = vrcp.f32 %v5681_v12  ;;  %v5691_v39 = vadd.f32 1.0, %v4319_v42  ;;  %1507 = vmatpush.msrb.mxu3 %v1449_v62  ;;  %v5725_v42 = vor.u32 1.1754944e-38, %v1189_v60  ;;  %vm5729_vm5 = vcmp.eq.f32.partialorder %v1187_v36, 8.507059e+37  ;;  %v1441_v20 = vld [vmem:[#allocation7 + $0x30] sm:$0xff] }
 0x1f1   :  { %v4321_v44 = vpop.eup %4320  ;;  %v4071_v19 = vmul.f32 -1.442695, %v1082_v13  ;;  %4328 = vpow2.f32 %v4047_v49  ;;  %v1450_v13 = vld [vmem:[#allocation7 + $0x78] sm:$0xff]  ;;  %v5736_v2 = vsel %vm5663_vm12, %v5667_v37, %v766_v43 }
 0x1f2   :  { %v5694_v24 = vadd.f32 1.0, %v4321_v44  ;;  %v5709_v28 = vpop.eup %4322  ;;  %4330 = vrcp.f32 %v5691_v39  ;;  %v545_v57 = vpop.f32.mrf.mxu3  ;;  %v1044_v44 = vadd.f32 %v1043_v55, %v5485_v23  ;;  %1589 = vmatpush.msra.mxu0 %v1450_v13  ;;  %1508 = vmatpush.msrb.mxu3 %v1447_v26 }
 0x1f3   :  { %v586_v49 = vpop.f32.mrf.mxu2  ;;  %v1179_v5 = vmul.f32 %v5709_v28, %v5652_v17  ;;  %v546_v6 = vadd.f32 %v545_v57, %v5432_v35  ;;  %vm1184_vm7 = vweird.f32 %v5709_v28 }
 0x1f4   :  { %4332 = vrcp.f32 %v5694_v24  ;;  %v587_v63 = vadd.f32 %v586_v49, %v5435_v7  ;;  %v1445_v49 = vld [vmem:[#allocation7 + $0x50] sm:$0xff]  ;;  %vm1213_vm8 = vweird.f32 %v5694_v24  ;;  %vm5782_vm9 = vmor %vm1183_vm4, %vm1184_vm7 }
 0x1f5   :  { %4334 = vpow2.f32 %v4071_v19  ;;  %v4325_v11 = vpop.eup %4324  ;;  %v1180_v27 = vsub.f32 1.0, %v1179_v5  ;;  %v4048_v31 = vmul.f32 -1.442695, %v546_v6  ;;  %v1046_v21 = vpop.f32.mrf.mxu0  ;;  %1509 = vmatpush.msrb.mxu3 %v1445_v49  ;;  %v1217_v5 = vand.u32 2147483647, %v5694_v24 }
 0x1f6   :  { %v1084_v15 = vpop.f32.mrf.mxu1  ;;  %v5738_v55 = vpop.eup %4326  ;;  %v5741_v60 = vadd.f32 1.0, %v4325_v11  ;;  %v4049_v19 = vmul.f32 -1.442695, %v587_v63  ;;  %v5767_v63 = vmul.f32 %v5620_v56, %v715_v34 }
 0x1f7   :  { %v1085_v57 = vadd.f32 %v1084_v15, %v1044_v44  ;;  %v4329_v38 = vpop.eup %4328  ;;  %v1181_v37 = vmul.f32 %v5709_v28, %v1180_v27  ;;  %4336 = vpow2.f32 %v4048_v31  ;;  %v796_v15 = vsel %vm5747_vm6, %v5629_v25, %v792_v32  ;;  %v1443_v44 = vld [vmem:[#allocation7 + $0x40] sm:$0xff]  ;;  %v1448_v31 = vld [vmem:[#allocation7 + $0x68] sm:$0xff] }
 0x1f8   :  { %7861 = vst [vmem:[#allocation29_spill] sm:$0xff] %v5741_v60  ;;  %v5756_v62 = vpop.eup %4330  ;;  %4338 = vrcp.f32 %v5741_v60  ;;  %v5759_v45 = vadd.f32 1.0, %v4329_v38  ;;  %v1219_v27 = vand.u32 2147483648, %v5694_v24  ;;  %1510 = vmatpush.msrb.mxu3 %v1443_v44  ;;  %1590 = vmatpush.msra.mxu0 %v1448_v31  ;;  %v1047_v38 = vadd.f32 %v1046_v21, %v5485_v23 }
 0x1f9   :  { %v4073_v43 = vmul.f32 -1.442695, %v1085_v57  ;;  %v1182_v13 = vadd.f32 %v5709_v28, %v1181_v37  ;;  %4340 = vpow2.f32 %v4049_v19  ;;  %v5776_v19 = vsel %vm5704_vm3, %v5687_v30, %v796_v15  ;;  %v1446_v15 = vld [vmem:[#allocation7 + $0x58] sm:$0xff] }
 0x1fa   :  { %v5762_v6 = vpop.eup %4332  ;;  %4342 = vrcp.f32 %v5759_v45  ;;  %v952_v26 = vpop.f32.mrf.mxu3  ;;  %v5788_v57 = vmul.f32 %v5738_v55, %v5681_v12  ;;  %vm5797_vm10 = vcmp.eq.f32.partialorder %v1217_v5, 8.507059e+37  ;;  %1511 = vmatpush.msrb.mxu3 %v1441_v20  ;;  %1591 = vmatpush.msra.mxu0 %v1446_v15  ;;  %v1220_v34 = vor.u32 1.1754944e-38, %v1219_v27  ;;  %v1444_v20 = vld [vmem:[#allocation7 + $0x48] sm:$0xff]  ;;  %v1442_v27 = vld [vmem:[#allocation7 + $0x38] sm:$0xff] }
 0x1fb   :  { %v4335_v25 = vpop.eup %4334  ;;  %v1209_v32 = vmul.f32 %v5762_v6, %v5694_v24  ;;  %v993_v11 = vpop.f32.mrf.mxu2  ;;  %4344 = vpow2.f32 %v4073_v43  ;;  %v953_v36 = vadd.f32 %v952_v26, %v5623_v61  ;;  %v1186_v17 = vsel %vm5782_vm9, %v5709_v28, %v1182_v13 }
 0x1fc   :  { %v5790_v49 = vadd.f32 1.0, %v4335_v25  ;;  %v5803_v43 = vmul.f32 %v5756_v62, %v5691_v39  ;;  %v1191_v28 = vsel %vm5729_vm5, %v5725_v42, %v1186_v17  ;;  %vm1214_vm11 = vweird.f32 %v5762_v6  ;;  %1592 = vmatpush.msra.mxu0 %v1444_v20 }
 0x1fd   :  { %v1210_v30 = vsub.f32 1.0, %v1209_v32  ;;  %v4337_v44 = vpop.eup %4336  ;;  %v994_v25 = vadd.f32 %v993_v11, %v953_v36  ;;  %v1049_v32 = vpop.f32.mrf.mxu0  ;;  %v1404_v31 = vadd.f32 %v1191_v28, %v5577_v1  ;;  %vm1215_vm12 = vmor %vm1213_vm8, %vm1214_vm11  ;;  %vm824_vm11 = vweird.f32 %v5756_v62 }
 0x1fe   :  { %4346 = vrcp.f32 %v5790_v49  ;;  %v1087_v21 = vpop.f32.mrf.mxu1  ;;  %v5809_v5 = vpop.eup %4338  ;;  %v5811_v13 = vadd.f32 1.0, %v4337_v44  ;;  %1593 = vmatpush.msra.mxu0 %v1442_v27  ;;  %v1247_v28 = vand.u32 2147483647, %v5790_v49  ;;  %v1050_v27 = vadd.f32 %v1049_v32, %v5485_v23 }
 0x1ff   :  { %7868 = vst [vmem:[#allocation30_spill] sm:$0xff] %v5809_v5  ;;  %v1088_v26 = vadd.f32 %v1087_v21, %v1047_v38  ;;  %v4341_v7 = vpop.eup %4340  ;;  %v4066_v11 = vmul.f32 -1.442695, %v994_v25  ;;  %v1211_v36 = vmul.f32 %v5762_v6, %v1210_v30  ;;  %v1420_v1 = vmul.f32 %v1404_v31, %v5168_v41  ;;  %v1440_v31 = vld [vmem:[#allocation7 + $0x28] sm:$0xff]  ;;  %v1438_v30 = vld [vmem:[#allocation7 + $0x18] sm:$0xff] }
 0x200   :  { %7869 = vst [vmem:[#allocation31_spill] sm:$0xff] %v5811_v13  ;;  %v5817_v42 = vpop.eup %4342  ;;  %4348 = vrcp.f32 %v5811_v13  ;;  %v5820_v35 = vadd.f32 1.0, %v4341_v7  ;;  %v5828_v25 = vmul.f32 %v5809_v5, %v5741_v60  ;;  %1594 = vmatpush.msra.mxu0 %v1440_v31  ;;  %vm1243_vm13 = vweird.f32 %v5790_v49  ;;  %v1436_v31 = vld [vmem:[#allocation7 + $0x8] sm:$0xff] }
 0x201   :  { %v4075_v38 = vmul.f32 -1.442695, %v1088_v26  ;;  %v4345_v17 = vpop.eup %4344  ;;  %4350 = vpow2.f32 %v4066_v11  ;;  %v1212_v44 = vadd.f32 %v5762_v6, %v1211_v36  ;;  %4082 = vmatmul.msk.f32.vlgmr.msrb.gmra.mxu2 %vm356_vm2, %v1420_v1  ;;  %4090 = vmatmul.msk.f32.vlgmr.msrb.gmra.mxu1 %vm356_vm2, %v1420_v1  ;;  %v1439_v26 = vld [vmem:[#allocation7 + $0x20] sm:$0xff]  ;;  %v5844_v11 = vmul.f32 %v5817_v42, %v5759_v45 }
 0x202   :  { %7870 = vst [vmem:[#allocation32_spill] sm:$0xff] %v5828_v25  ;;  %4352 = vrcp.f32 %v5820_v35  ;;  %v5831_v7 = vadd.f32 1.0, %v4345_v17  ;;  %v955_v41 = vpop.f32.mrf.mxu3  ;;  %1512 = vmatpush.msrb.mxu3 %v1439_v26  ;;  %1595 = vmatpush.msra.mxu0 %v1438_v30  ;;  %vm5860_vm14 = vcmp.eq.f32.partialorder %v1247_v28, 8.507059e+37 }
 0x203   :  { %v996_v21 = vpop.f32.mrf.mxu2  ;;  %4354 = vpow2.f32 %v4075_v38  ;;  %v956_v36 = vadd.f32 %v955_v41, %v5623_v61  ;;  %v1216_v1 = vsel %vm1215_vm12, %v5762_v6, %v1212_v44  ;;  %v1249_v6 = vand.u32 2147483648, %v5790_v49 }
 0x204   :  { %v5840_v20 = vpop.eup %4346  ;;  %4356 = vrcp.f32 %v5831_v7  ;;  %v1221_v17 = vsel %vm5797_vm10, %v1220_v34, %v1216_v1  ;;  %1513 = vmatpush.msrb.mxu3 %v1437_v9  ;;  %1596 = vmatpush.msra.mxu0 %v1436_v31  ;;  %vm1273_vm1 = vweird.f32 %v5831_v7 }
 0x205   :  { %v1239_v24 = vmul.f32 %v5840_v20, %v5790_v49  ;;  %v997_v15 = vadd.f32 %v996_v21, %v956_v36  ;;  %v1052_v38 = vpop.f32.mrf.mxu0  ;;  %v1406_v41 = vadd.f32 %v1221_v17, %v5639_v48  ;;  %v1435_v21 = vld [vmem:[#allocation7] sm:$0xff]  ;;  %vm1244_vm15 = vweird.f32 %v5840_v20 }
 0x206   :  { %v1090_v60 = vpop.f32.mrf.mxu1  ;;  %v5857_v44 = vpop.eup %4348  ;;  %1514 = vmatpush.msrb.mxu3 %v1435_v21  ;;  %vm1245_vm3 = vmor %vm1243_vm13, %vm1244_vm15 }
 0x207   :  { %7871 = vst [vmem:[#allocation33_spill] sm:$0xff] %v5857_v44  ;;  %v1240_v26 = vsub.f32 1.0, %v1239_v24  ;;  %v1091_v37 = vadd.f32 %v1090_v60, %v1050_v27  ;;  %v4351_v36 = vpop.eup %4350  ;;  %v4068_v1 = vmul.f32 -1.442695, %v997_v15  ;;  %v1422_v17 = vmul.f32 %v1406_v41, %v5177_v47 }
 0x208   :  { %v5867_v9 = vpop.eup %4352  ;;  %v5869_v30 = vadd.f32 1.0, %v4351_v36  ;;  %v1277_v24 = vand.u32 2147483647, %v5831_v7  ;;  %v5875_v32 = vmul.f32 %v5857_v44, %v5811_v13  ;;  %v1053_v47 = vadd.f32 %v1052_v38, %v5485_v23 }
 0x209   :  { %v4077_v60 = vmul.f32 -1.442695, %v1091_v37  ;;  %v1241_v28 = vmul.f32 %v5840_v20, %v1240_v26  ;;  %v4355_v27 = vpop.eup %4354  ;;  %4358 = vpow2.f32 %v4068_v1  ;;  %v1250_v15 = vor.u32 1.1754944e-38, %v1249_v6  ;;  %4083 = vmatmul.msk.f32.gmra.mxu2 %vm356_vm2, %v1422_v17  ;;  %4091 = vmatmul.msk.f32.gmra.mxu1 %vm356_vm2, %v1422_v17 }
 0x20a   :  { %v5878_v41 = vpop.eup %4356  ;;  %4360 = vrcp.f32 %v5869_v30  ;;  %v5881_v21 = vadd.f32 1.0, %v4355_v27  ;;  %v958_v26 = vpop.f32.mrf.mxu3  ;;  %v1279_v36 = vand.u32 2147483648, %v5831_v7  ;;  %v5890_v38 = vmul.f32 %v5867_v9, %v5820_v35 }
 0x20b   :  { %v999_v37 = vpop.f32.mrf.mxu2  ;;  %v1242_v31 = vadd.f32 %v5840_v20, %v1241_v28  ;;  %v1269_v6 = vmul.f32 %v5878_v41, %v5831_v7  ;;  %4362 = vpow2.f32 %v4077_v60  ;;  %v959_v1 = vadd.f32 %v958_v26, %v5623_v61 }
 0x20c   :  { %4364 = vrcp.f32 %v5881_v21  ;;  %vm5901_vm4 = vcmp.eq.f32.partialorder %v1277_v24, 8.507059e+37  ;;  %v1172_v27 = vand.u32 2147483647, %v5869_v30  ;;  %v1174_v49 = vand.u32 2147483648, %v5869_v30 }
 0x20d   :  { %v1246_v17 = vsel %vm1245_vm3, %v5840_v20, %v1242_v31  ;;  %v1270_v48 = vsub.f32 1.0, %v1269_v6  ;;  %v1000_v13 = vadd.f32 %v999_v37, %v959_v1  ;;  %v1055_v60 = vpop.f32.mrf.mxu0  ;;  %v865_v3 = vsub.f32 1.0, %v5875_v32 }
 0x20e   :  { %v1093_v44 = vpop.f32.mrf.mxu1  ;;  %v1251_v26 = vsel %vm5860_vm14, %v1250_v15, %v1246_v17  ;;  %v1280_v24 = vor.u32 1.1754944e-38, %v1279_v36  ;;  %v880_v25 = vsub.f32 1.0, %v5890_v38  ;;  %vm1274_vm5 = vweird.f32 %v5878_v41 }
 0x20f   :  { %v1094_v5 = vadd.f32 %v1093_v44, %v1053_v47  ;;  %v1408_v20 = vadd.f32 %v1251_v26, %v5672_v29  ;;  %v4359_v31 = vpop.eup %4358  ;;  %v4070_v12 = vmul.f32 -1.442695, %v1000_v13  ;;  %v1271_v6 = vmul.f32 %v5878_v41, %v1270_v48  ;;  %vm1275_vm8 = vmor %vm1273_vm1, %vm1274_vm5 }
 0x210   :  { %vm1168_vm6 = vweird.f32 %v5869_v30  ;;  %v5915_v34 = vpop.eup %4360  ;;  %v5917_v15 = vadd.f32 1.0, %v4359_v31  ;;  %v1056_v37 = vadd.f32 %v1055_v60, %v5485_v23  ;;  %vm5924_vm7 = vcmp.eq.f32.partialorder %v1172_v27, 8.507059e+37 }
 0x211   :  { %v4079_v44 = vmul.f32 -1.442695, %v1094_v5  ;;  %v1424_v29 = vmul.f32 %v1408_v20, %v5186_v53  ;;  %v4363_v47 = vpop.eup %4362  ;;  %v1164_v36 = vmul.f32 %v5915_v34, %v5869_v30  ;;  %4366 = vpow2.f32 %v4070_v12 }
 0x212   :  { %v1272_v13 = vadd.f32 %v5878_v41, %v1271_v6  ;;  %v1175_v1 = vor.u32 1.1754944e-38, %v1174_v49  ;;  %v5928_v17 = vpop.eup %4364  ;;  %4368 = vrcp.f32 %v5917_v15  ;;  %v5931_v23 = vadd.f32 1.0, %v4363_v47  ;;  %v961_v53 = vpop.f32.mrf.mxu3 }
 0x213   :  { %4084 = vmatmul.msk.f32.gmra.mxu2 %vm356_vm2, %v1424_v29  ;;  %4092 = vmatmul.msk.f32.gmra.mxu1 %vm356_vm2, %v1424_v29  ;;  %v1002_v5 = vpop.f32.mrf.mxu2  ;;  %v1307_v12 = vand.u32 2147483647, %v5881_v21  ;;  %v1309_v27 = vand.u32 2147483648, %v5881_v21  ;;  %v1165_v60 = vsub.f32 1.0, %v1164_v36  ;;  %v1299_v26 = vmul.f32 %v5928_v17, %v5881_v21 }
 0x214   :  { %4370 = vpow2.f32 %v4079_v44  ;;  %v962_v49 = vadd.f32 %v961_v53, %v5623_v61  ;;  %v1276_v20 = vsel %vm1275_vm8, %v5878_v41, %v1272_v13  ;;  %vm1169_vm9 = vweird.f32 %v5915_v34 }
 0x215   :  { %4372 = vrcp.f32 %v5931_v23  ;;  %vm1303_vm10 = vweird.f32 %v5881_v21  ;;  %v1300_v31 = vsub.f32 1.0, %v1299_v26  ;;  %v1281_v44 = vsel %vm5901_vm4, %v1280_v24, %v1276_v20  ;;  %vm5968_vm15 = vmor %vm1168_vm6, %vm1169_vm9 }
 0x216   :  { %v1003_v6 = vadd.f32 %v1002_v5, %v962_v49  ;;  %v1096_v29 = vpop.f32.mrf.mxu1  ;;  %v1166_v47 = vmul.f32 %v5915_v34, %v1165_v60  ;;  %v1410_v36 = vadd.f32 %v1281_v44, %v5736_v2  ;;  %vm1304_vm12 = vweird.f32 %v5928_v17 }
 0x217   :  { %v1097_v7 = vadd.f32 %v1096_v29, %v1056_v37  ;;  %vm5954_vm13 = vcmp.eq.f32.partialorder %v1307_v12, 8.507059e+37  ;;  %v4367_v13 = vpop.eup %4366  ;;  %v1301_v28 = vmul.f32 %v5928_v17, %v1300_v31  ;;  %v1310_v24 = vor.u32 1.1754944e-38, %v1309_v27  ;;  %vm1305_vm3 = vmor %vm1303_vm10, %vm1304_vm12 }
 0x218   :  { %v4072_v53 = vmul.f32 -1.442695, %v1003_v6  ;;  %v1167_v5 = vadd.f32 %v5915_v34, %v1166_v47  ;;  %vm823_vm14 = vweird.f32 %v5691_v39  ;;  %v5961_v60 = vpop.eup %4368  ;;  %v1426_v2 = vmul.f32 %v1410_v36, %v5195_v59 }
 0x219   :  { %v4081_v37 = vmul.f32 -1.442695, %v1097_v7  ;;  %vm1198_vm1 = vweird.f32 %v5917_v15  ;;  %v1202_v26 = vand.u32 2147483647, %v5917_v15  ;;  %v1302_v20 = vadd.f32 %v5928_v17, %v1301_v28  ;;  %vm6024_vm6 = vmor %vm823_vm14, %vm824_vm11 }
 0x21a   :  { %v4371_v27 = vpop.eup %4370  ;;  %v1171_v49 = vsel %vm5968_vm15, %v5915_v34, %v1167_v5  ;;  %v1194_v59 = vmul.f32 %v5961_v60, %v5917_v15  ;;  %v1204_v30 = vand.u32 2147483648, %v5917_v15  ;;  %v5983_v6 = vadd.f32 1.0, %v4367_v13  ;;  %v964_v44 = vpop.f32.mrf.mxu3 }
 0x21b   :  { %v5981_v31 = vpop.eup %4372  ;;  %v5985_v29 = vadd.f32 1.0, %v4371_v27  ;;  %4374 = vpow2.f32 %v4072_v53  ;;  %4085 = vmatmul.msk.f32.gmra.mxu2 %vm356_vm2, %v1426_v2  ;;  %4093 = vmatmul.msk.f32.gmra.mxu1 %vm356_vm2, %v1426_v2  ;;  %v1005_v34 = vpop.f32.mrf.mxu2  ;;  %v1176_v47 = vsel %vm5924_vm7, %v1175_v1, %v1171_v49  ;;  %v965_v36 = vadd.f32 %v964_v44, %v5623_v61 }
 0x21c   :  { %v1329_v7 = vmul.f32 %v5981_v31, %v5931_v23  ;;  %4376 = vpow2.f32 %v4081_v37  ;;  %v1403_v13 = vadd.f32 %v1176_v47, %v5558_v50  ;;  %v1306_v53 = vsel %vm1305_vm3, %v5928_v17, %v1302_v20 }
 0x21d   :  { %4378 = vrcp.f32 %v5985_v29  ;;  %v1195_v5 = vsub.f32 1.0, %v1194_v59  ;;  %vm6001_vm4 = vcmp.eq.f32.partialorder %v1202_v26, 8.507059e+37  ;;  %v1006_v28 = vadd.f32 %v1005_v34, %v965_v36 }
 0x21e   :  { %v1330_v1 = vsub.f32 1.0, %v1329_v7  ;;  %v1419_v37 = vmul.f32 %v1403_v13, %v5166_v40  ;;  %v1311_v50 = vsel %vm5954_vm13, %v1310_v24, %v1306_v53  ;;  %vm1199_vm5 = vweird.f32 %v5961_v60 }
 0x21f   :  { %v1412_v2 = vadd.f32 %v1311_v50, %v5776_v19  ;;  %v1196_v21 = vmul.f32 %v5961_v60, %v1195_v5  ;;  %v7884_v17 = vsub.f32 1.0, %v5803_v43  ;;  %4380 = vrcp.f32 %v5983_v6  ;;  %vm6032_vm7 = vmor %vm1198_vm1, %vm1199_vm5 }
 0x220   :  { %v4074_v26 = vmul.f32 -1.442695, %v1006_v28  ;;  %1515 = vmatmul.f32.vlgmr.msrb.gmra.mxu3 %v1419_v37  ;;  %1597 = vmatmul.f32.vlgmr.msra.gmra.mxu0 %v1419_v37  ;;  %v829_v40 = vand.u32 2147483648, %v5691_v39  ;;  %v1331_v41 = vmul.f32 %v5981_v31, %v1330_v1  ;;  %v1205_v49 = vor.u32 1.1754944e-38, %v1204_v30 }
 0x221   :  { %v821_v12 = vmul.f32 %v5756_v62, %v7884_v17  ;;  %v4375_v24 = vpop.eup %4374  ;;  %v1428_v19 = vmul.f32 %v1412_v2, %v5204_v4  ;;  %v1197_v27 = vadd.f32 %v5961_v60, %v1196_v21  ;;  %v7889_v30 = vand.u32 2147483647, %v5691_v39 }
 0x222   :  { %v4377_v59 = vpop.eup %4376  ;;  %4382 = vpow2.f32 %v4074_v26  ;;  %v1332_v34 = vadd.f32 %v5981_v31, %v1331_v41  ;;  %vm1333_vm9 = vweird.f32 %v5931_v23  ;;  %v967_v15 = vpop.f32.mrf.mxu3  ;;  %vm1334_vm10 = vweird.f32 %v5981_v31 }
 0x223   :  { %v822_v20 = vadd.f32 %v5756_v62, %v821_v12  ;;  %vm6038_vm8 = vcmp.eq.f32.partialorder %v7889_v30, 8.507059e+37  ;;  %v6044_v47 = vpop.eup %4378  ;;  %v6046_v7 = vadd.f32 1.0, %v4377_v59  ;;  %4086 = vmatmul.msk.f32.gmra.mxu2 %vm356_vm2, %v1428_v19  ;;  %4094 = vmatmul.msk.f32.gmra.mxu1 %vm356_vm2, %v1428_v19  ;;  %v1008_v36 = vpop.f32.mrf.mxu2  ;;  %v1201_v39 = vsel %vm6032_vm7, %v5961_v60, %v1197_v27  ;;  %vm6073_vm11 = vmor %vm1333_vm9, %vm1334_vm10 }
 0x224   :  { %v6057_v53 = vadd.f32 1.0, %v4375_v24  ;;  %v968_v5 = vadd.f32 %v967_v15, %v5623_v61  ;;  %v1206_v1 = vsel %vm6001_vm4, %v1205_v49, %v1201_v39  ;;  %v830_v28 = vor.u32 1.1754944e-38, %v829_v40 }
 0x225   :  { %v826_v13 = vsel %vm6024_vm6, %v5756_v62, %v822_v20  ;;  %v1359_v37 = vmul.f32 %v6044_v47, %v5985_v29  ;;  %4384 = vrcp.f32 %v6046_v7  ;;  %v1405_v60 = vadd.f32 %v1206_v1, %v5627_v0  ;;  %v6067_v62 = vpop.eup %4380 }
 0x226   :  { %v1337_v50 = vand.u32 2147483647, %v5931_v23  ;;  %v1009_v2 = vadd.f32 %v1008_v36, %v968_v5  ;;  %v831_v21 = vsel %vm6038_vm8, %v830_v28, %v826_v13  ;;  %v1339_v17 = vand.u32 2147483648, %v5931_v23 }
 0x227   :  { %v717_v12 = vadd.f32 %v5620_v56, %v5767_v63  ;;  %v1421_v0 = vmul.f32 %v1405_v60, %v5175_v46  ;;  %v1336_v26 = vsel %vm6073_vm11, %v5981_v31, %v1332_v34  ;;  %vm718_vm12 = vweird.f32 %v5540_v18 }
 0x228   :  { %vm719_vm13 = vweird.f32 %v5620_v56  ;;  %v4383_v40 = vpop.eup %4382  ;;  %v4076_v41 = vmul.f32 -1.442695, %v1009_v2  ;;  %v1340_v24 = vor.u32 1.1754944e-38, %v1339_v17  ;;  %v722_v19 = vand.u32 2147483647, %v5540_v18 }
 0x229   :  { %v724_v23 = vand.u32 2147483648, %v5540_v18  ;;  %v1360_v27 = vsub.f32 1.0, %v1359_v37  ;;  %v6088_v49 = vadd.f32 1.0, %v4383_v40  ;;  %1518 = vmatmul.f32.gmra.mxu3 %v1421_v0  ;;  %vm1338_vm14 = vcmp.eq.f32.partialorder %v1337_v50, 8.507059e+37  ;;  %1600 = vmatmul.f32.gmra.mxu0 %v1421_v0  ;;  %vm6090_vm15 = vmor %vm718_vm12, %vm719_vm13  ;;  %v7932_v18 = vld [vmem:[#allocation30_spill] sm:$0xff] }
 0x22a   :  { %v1224_v63 = vmul.f32 %v6067_v62, %v5983_v6  ;;  %4386 = vpow2.f32 %v4076_v41  ;;  %v1341_v31 = vsel %vm1338_vm14, %v1340_v24, %v1336_v26  ;;  %v721_v20 = vsel %vm6090_vm15, %v5620_v56, %v717_v12  ;;  %v970_v4 = vpop.f32.mrf.mxu3 }
 0x22b   :  { %vm6099_vm1 = vcmp.eq.f32.partialorder %v722_v19, 8.507059e+37  ;;  %v6103_v43 = vpop.eup %4384  ;;  %4388 = vrcp.f32 %v6088_v49  ;;  %v1414_v59 = vadd.f32 %v1341_v31, %v831_v21  ;;  %v725_v30 = vor.u32 1.1754944e-38, %v724_v23  ;;  %v1011_v36 = vpop.f32.mrf.mxu2 }
 0x22c   :  { %v1225_v44 = vsub.f32 1.0, %v1224_v63  ;;  %v6108_v34 = vmul.f32 %v6103_v43, %v6046_v7  ;;  %v971_v15 = vadd.f32 %v970_v4, %v5623_v61  ;;  %vm1229_vm3 = vweird.f32 %v6067_v62 }
 0x22d   :  { %v1232_v56 = vand.u32 2147483647, %v5983_v6  ;;  %v1430_v39 = vmul.f32 %v1414_v59, %v5213_v10  ;;  %v1234_v5 = vand.u32 2147483648, %v5983_v6  ;;  %v7898_v1 = vsub.f32 1.0, %v5844_v11 }
 0x22e   :  { %v1226_v13 = vmul.f32 %v6067_v62, %v1225_v44  ;;  %4390 = vrcp.f32 %v6057_v53  ;;  %v1012_v37 = vadd.f32 %v1011_v36, %v971_v15  ;;  %v726_v60 = vsel %vm6099_vm1, %v725_v30, %v721_v20 }
 0x22f   :  { %v851_v28 = vmul.f32 %v5817_v42, %v7898_v1  ;;  %vm1228_vm4 = vweird.f32 %v5983_v6  ;;  %v1390_v50 = vsub.f32 1.0, %v6108_v34  ;;  %4087 = vmatmul.msk.f32.gmra.mxu2 %vm356_vm2, %v1430_v39  ;;  %4095 = vmatmul.msk.f32.gmra.mxu1 %vm356_vm2, %v1430_v39  ;;  %vm854_vm5 = vweird.f32 %v5817_v42 }
 0x230   :  { %v1227_v10 = vadd.f32 %v6067_v62, %v1226_v13  ;;  %v4387_v2 = vpop.eup %4386  ;;  %v4078_v21 = vmul.f32 -1.442695, %v1012_v37  ;;  %vm1230_vm6 = vmor %vm1228_vm4, %vm1229_vm3  ;;  %vm1233_vm7 = vcmp.eq.f32.partialorder %v1232_v56, 8.507059e+37  ;;  %v1235_v48 = vor.u32 1.1754944e-38, %v1234_v5 }
 0x231   :  { %v852_v11 = vadd.f32 %v5817_v42, %v851_v28  ;;  %v1361_v6 = vmul.f32 %v6044_v47, %v1360_v27  ;;  %v6132_v17 = vpop.eup %4388  ;;  %v6134_v12 = vadd.f32 1.0, %v4387_v2  ;;  %vm853_vm8 = vweird.f32 %v5759_v45 }
 0x232   :  { %v1231_v0 = vsel %vm1230_vm6, %v6067_v62, %v1227_v10  ;;  %v857_v26 = vand.u32 2147483647, %v5759_v45  ;;  %v6141_v40 = vmul.f32 %v6132_v17, %v6088_v49  ;;  %4392 = vpow2.f32 %v4078_v21  ;;  %vm6145_vm9 = vmor %vm853_vm8, %vm854_vm5  ;;  %v973_v46 = vpop.f32.mrf.mxu3 }
 0x233   :  { %v1236_v41 = vsel %vm1233_vm7, %v1235_v48, %v1231_v0  ;;  %v859_v19 = vand.u32 2147483648, %v5759_v45  ;;  %4394 = vrcp.f32 %v6134_v12  ;;  %v856_v23 = vsel %vm6145_vm9, %v5817_v42, %v852_v11  ;;  %v1014_v15 = vpop.f32.mrf.mxu2 }
 0x234   :  { %v1407_v62 = vadd.f32 %v1236_v41, %v726_v60  ;;  %v1362_v27 = vadd.f32 %v6044_v47, %v1361_v6  ;;  %v6155_v63 = vpop.eup %4390  ;;  %vm1363_vm10 = vweird.f32 %v5985_v29  ;;  %vm1364_vm11 = vweird.f32 %v6044_v47 }
 0x235   :  { %v1367_v31 = vand.u32 2147483647, %v5985_v29  ;;  %v1369_v45 = vand.u32 2147483648, %v5985_v29  ;;  %vm6162_vm12 = vcmp.eq.f32.partialorder %v857_v26, 8.507059e+37  ;;  %vm6166_vm13 = vmor %vm1363_vm10, %vm1364_vm11  ;;  %v974_v59 = vadd.f32 %v973_v46, %v5623_v61 }
 0x236   :  { %v1423_v20 = vmul.f32 %v1407_v62, %v5184_v52  ;;  %v744_v4 = vmul.f32 %v5650_v14, %v5561_v54  ;;  %v1285_v30 = vsub.f32 1.0, %v6141_v40  ;;  %v860_v44 = vor.u32 1.1754944e-38, %v859_v19 }
 0x237   :  { %v1366_v52 = vsel %vm6166_vm13, %v6044_v47, %v1362_v27  ;;  %v1370_v29 = vor.u32 1.1754944e-38, %v1369_v45  ;;  %vm1368_vm14 = vcmp.eq.f32.partialorder %v1367_v31, 8.507059e+37  ;;  %v1015_v36 = vadd.f32 %v1014_v15, %v974_v59 }
 0x238   :  { %1521 = vmatmul.f32.gmra.mxu3 %v1423_v20  ;;  %1603 = vmatmul.f32.gmra.mxu0 %v1423_v20  ;;  %v745_v56 = vsub.f32 1.0, %v744_v4  ;;  %v752_v39 = vand.u32 2147483647, %v5561_v54  ;;  %v4393_v61 = vpop.eup %4392  ;;  %v861_v13 = vsel %vm6162_vm12, %v860_v44, %v856_v23  ;;  %v754_v1 = vand.u32 2147483648, %v5561_v54 }
 0x239   :  { %v1371_v5 = vsel %vm1368_vm14, %v1370_v29, %v1366_v52  ;;  %v1254_v28 = vmul.f32 %v6155_v63, %v6057_v53  ;;  %v6183_v47 = vpop.eup %4394  ;;  %v6185_v37 = vadd.f32 1.0, %v4393_v61  ;;  %v4080_v10 = vmul.f32 -1.442695, %v1015_v36 }
 0x23a   :  { %v1416_v60 = vadd.f32 %v1371_v5, %v861_v13  ;;  %v746_v11 = vmul.f32 %v5650_v14, %v745_v56  ;;  %vm748_vm15 = vweird.f32 %v5561_v54  ;;  %vm749_vm1 = vweird.f32 %v5650_v14 }
 0x23b   :  { %v1255_v2 = vsub.f32 1.0, %v1254_v28  ;;  %vm1258_vm3 = vweird.f32 %v6057_v53  ;;  %v6193_v21 = vmul.f32 %v6183_v47, %v6134_v12  ;;  %vm6197_vm4 = vcmp.eq.f32.partialorder %v752_v39, 8.507059e+37  ;;  %vm6209_vm6 = vmor %vm748_vm15, %vm749_vm1 }
 0x23c   :  { %v1432_v48 = vmul.f32 %v1416_v60, %v5222_v16  ;;  %v747_v6 = vadd.f32 %v5650_v14, %v746_v11  ;;  %4396 = vpow2.f32 %v4080_v10  ;;  %vm1259_vm5 = vweird.f32 %v6155_v63 }
 0x23d   :  { %v1256_v26 = vmul.f32 %v6155_v63, %v1255_v2  ;;  %v1262_v41 = vand.u32 2147483647, %v6057_v53  ;;  %4398 = vrcp.f32 %v6185_v37  ;;  %v755_v24 = vor.u32 1.1754944e-38, %v754_v1  ;;  %vm1260_vm9 = vmor %vm1258_vm3, %vm1259_vm5 }
 0x23e   :  { %4088 = vmatmul.msk.f32.gmra.mxu2 %vm356_vm2, %v1432_v48  ;;  %4096 = vmatmul.msk.f32.gmra.mxu1 %vm356_vm2, %v1432_v48  ;;  %v1264_v19 = vand.u32 2147483648, %v6057_v53  ;;  %v881_v62 = vmul.f32 %v5867_v9, %v880_v25  ;;  %v751_v23 = vsel %vm6209_vm6, %v5650_v14, %v747_v6  ;;  %vm883_vm7 = vweird.f32 %v5820_v35 }
 0x23f   :  { %v1257_v27 = vadd.f32 %v6155_v63, %v1256_v26  ;;  %vm884_vm8 = vweird.f32 %v5867_v9  ;;  %vm1263_vm10 = vcmp.eq.f32.partialorder %v1262_v41, 8.507059e+37  ;;  %v887_v38 = vand.u32 2147483647, %v5820_v35  ;;  %v7923_v41 = vld [vmem:[#allocation28_spill] sm:$0xff] }
 0x240   :  { %v1265_v54 = vor.u32 1.1754944e-38, %v1264_v19  ;;  %v882_v46 = vadd.f32 %v5867_v9, %v881_v62  ;;  %v889_v31 = vand.u32 2147483648, %v5820_v35  ;;  %v1391_v14 = vmul.f32 %v6103_v43, %v1390_v50  ;;  %vm6236_vm12 = vmor %vm883_vm7, %vm884_vm8 }
 0x241   :  { %v1261_v25 = vsel %vm1260_vm9, %v6155_v63, %v1257_v27  ;;  %vm1394_vm11 = vweird.f32 %v6103_v43  ;;  %v1315_v45 = vsub.f32 1.0, %v6193_v21  ;;  %v756_v53 = vsel %vm6197_vm4, %v755_v24, %v751_v23 }
 0x242   :  { %v1266_v20 = vsel %vm1263_vm10, %v1265_v54, %v1261_v25  ;;  %vm1393_vm13 = vweird.f32 %v6046_v7  ;;  %v4397_v63 = vpop.eup %4396  ;;  %v886_v34 = vsel %vm6236_vm12, %v5867_v9, %v882_v46  ;;  %v1392_v50 = vadd.f32 %v6103_v43, %v1391_v14 }
 0x243   :  { %v1409_v35 = vadd.f32 %v1266_v20, %v756_v53  ;;  %v1397_v42 = vand.u32 2147483647, %v6046_v7  ;;  %v6246_v59 = vpop.eup %4398  ;;  %v6248_v4 = vadd.f32 1.0, %v4397_v63  ;;  %vm6250_vm14 = vcmp.eq.f32.partialorder %v887_v38, 8.507059e+37  ;;  %vm6254_vm15 = vmor %vm1393_vm13, %vm1394_vm11  ;;  %v7930_v53 = vld [vmem:[#allocation32_spill] sm:$0xff] }
 0x244   :  { %v1399_v29 = vand.u32 2147483648, %v6046_v7  ;;  %v7915_v9 = vsub.f32 1.0, %v5713_v33  ;;  %v890_v56 = vor.u32 1.1754944e-38, %v889_v31  ;;  %v1396_v39 = vsel %vm6254_vm15, %v6103_v43, %v1392_v50 }
 0x245   :  { %v1425_v36 = vmul.f32 %v1409_v35, %v5193_v58  ;;  %vm1398_vm1 = vcmp.eq.f32.partialorder %v1397_v42, 8.507059e+37  ;;  %4400 = vrcp.f32 %v6248_v4  ;;  %vm778_vm3 = vweird.f32 %v5617_v51  ;;  %v7933_v35 = vld [vmem:[#allocation24_spill] sm:$0xff] }
 0x246   :  { %v776_v15 = vmul.f32 %v5679_v8, %v7915_v9  ;;  %v1400_v61 = vor.u32 1.1754944e-38, %v1399_v29  ;;  %vm779_vm4 = vweird.f32 %v5679_v8  ;;  %v782_v33 = vand.u32 2147483647, %v5617_v51  ;;  %v7934_v29 = vld [vmem:[#allocation29_spill] sm:$0xff] }
 0x247   :  { %1524 = vmatmul.f32.gmra.mxu3 %v1425_v36  ;;  %1606 = vmatmul.f32.gmra.mxu0 %v1425_v36  ;;  %v784_v58 = vand.u32 2147483648, %v5617_v51  ;;  %v1286_v7 = vmul.f32 %v6132_v17, %v1285_v30  ;;  %v891_v43 = vsel %vm6250_vm14, %v890_v56, %v886_v34  ;;  %vm6277_vm5 = vmor %vm778_vm3, %vm779_vm4  ;;  %vm1289_vm6 = vweird.f32 %v6132_v17 }
 0x248   :  { %v777_v13 = vadd.f32 %v5679_v8, %v776_v15  ;;  %v1401_v5 = vsel %vm1398_vm1, %v1400_v61, %v1396_v39  ;;  %v1292_v28 = vand.u32 2147483647, %v6088_v49  ;;  %v1344_v60 = vmul.f32 %v6246_v59, %v6185_v37 }
 0x249   :  { %v1418_v51 = vadd.f32 %v1401_v5, %v891_v43  ;;  %vm1288_vm7 = vweird.f32 %v6088_v49  ;;  %vm6289_vm8 = vcmp.eq.f32.partialorder %v782_v33, 8.507059e+37  ;;  %v1287_v10 = vadd.f32 %v6132_v17, %v1286_v7  ;;  %v7937_v7 = vld [vmem:[#allocation33_spill] sm:$0xff] }
 0x24a   :  { %v781_v40 = vsel %vm6277_vm5, %v5679_v8, %v777_v13  ;;  %v1294_v11 = vand.u32 2147483648, %v6088_v49  ;;  %v7920_v2 = vsub.f32 1.0, %v5788_v57  ;;  %v785_v6 = vor.u32 1.1754944e-38, %v784_v58  ;;  %vm6299_vm9 = vmor %vm1288_vm7, %vm1289_vm6  ;;  %v7938_v5 = vld [vmem:[#allocation25_spill] sm:$0xff] }
 0x24b   :  { %v1434_v48 = vmul.f32 %v1418_v51, %v5231_v22  ;;  %vm1293_vm10 = vcmp.eq.f32.partialorder %v1292_v28, 8.507059e+37  ;;  %vm809_vm11 = vweird.f32 %v5738_v55  ;;  %v6304_v8 = vpop.eup %4400  ;;  %v1291_v49 = vsel %vm6299_vm9, %v6132_v17, %v1287_v10 }
 0x24c   :  { %v806_v21 = vmul.f32 %v5738_v55, %v7920_v2  ;;  %v1295_v26 = vor.u32 1.1754944e-38, %v1294_v11  ;;  %v812_v16 = vand.u32 2147483647, %v7923_v41  ;;  %v1374_v22 = vmul.f32 %v6304_v8, %v6248_v4  ;;  %v7939_v11 = vld [vmem:[#allocation31_spill] sm:$0xff] }
 0x24d   :  { %4089 = vmatmul.msk.f32.gmra.mxu2 %vm356_vm2, %v1434_v48  ;;  %4097 = vmatmul.msk.f32.gmra.mxu1 %vm356_vm2, %v1434_v48  ;;  %vm808_vm12 = vweird.f32 %v7923_v41  ;;  %v814_v24 = vand.u32 2147483648, %v7923_v41  ;;  %v1316_v19 = vmul.f32 %v6183_v47, %v1315_v45  ;;  %v1345_v62 = vsub.f32 1.0, %v1344_v60 }
 0x24e   :  { %v807_v57 = vadd.f32 %v5738_v55, %v806_v21  ;;  %v786_v17 = vsel %vm6289_vm8, %v785_v6, %v781_v40  ;;  %v1296_v23 = vsel %vm1293_vm10, %v1295_v26, %v1291_v49  ;;  %vm6322_vm13 = vmor %vm808_vm12, %vm809_vm11  ;;  %vm1319_vm14 = vweird.f32 %v6183_v47 }
 0x24f   :  { %v1411_v54 = vadd.f32 %v1296_v23, %v786_v17  ;;  %v1317_v38 = vadd.f32 %v6183_v47, %v1316_v19  ;;  %vm1318_vm15 = vweird.f32 %v6134_v12  ;;  %vm6332_vm1 = vcmp.eq.f32.partialorder %v812_v16, 8.507059e+37  ;;  %v7941_v19 = vld [vmem:[#allocation27_spill] sm:$0xff] }
 0x250   :  { %v811_v46 = vsel %vm6322_vm13, %v5738_v55, %v807_v57  ;;  %vm6336_vm3 = vmor %vm1318_vm15, %vm1319_vm14  ;;  %v1322_v14 = vand.u32 2147483647, %v6134_v12  ;;  %v1324_v45 = vand.u32 2147483648, %v6134_v12  ;;  %v7931_v20 = vsub.f32 1.0, %v7930_v53  ;;  %v7940_v57 = vld [vmem:[#allocation26_spill] sm:$0xff] }
 0x251   :  { %v1375_v63 = vsub.f32 1.0, %v1374_v22  ;;  %v1427_v34 = vmul.f32 %v1411_v54, %v7933_v35  ;;  %v815_v50 = vor.u32 1.1754944e-38, %v814_v24  ;;  %v1321_v42 = vsel %vm6336_vm3, %v6183_v47, %v1317_v38 }
 0x252   :  { %v836_v55 = vmul.f32 %v7932_v18, %v7931_v20  ;;  %v1325_v44 = vor.u32 1.1754944e-38, %v1324_v45  ;;  %vm839_vm4 = vweird.f32 %v7932_v18  ;;  %v842_v9 = vand.u32 2147483647, %v7934_v29 }
 0x253   :  { %1527 = vmatmul.f32.gmra.mxu3 %v1427_v34  ;;  %1609 = vmatmul.f32.gmra.mxu0 %v1427_v34  ;;  %vm1323_vm5 = vcmp.eq.f32.partialorder %v1322_v14, 8.507059e+37  ;;  %v844_v12 = vand.u32 2147483648, %v7934_v29  ;;  %v1346_v15 = vmul.f32 %v6246_v59, %v1345_v62  ;;  %vm1349_vm6 = vweird.f32 %v6246_v59 }
 0x254   :  { %v837_v52 = vadd.f32 %v7932_v18, %v836_v55  ;;  %v816_v36 = vsel %vm6332_vm1, %v815_v50, %v811_v46  ;;  %v1326_v47 = vsel %vm1323_vm5, %v1325_v44, %v1321_v42  ;;  %vm838_vm7 = vweird.f32 %v7934_v29 }
 0x255   :  { %v1352_v56 = vand.u32 2147483647, %v6185_v37  ;;  %v1413_v39 = vadd.f32 %v1326_v47, %v816_v36  ;;  %vm6359_vm8 = vmor %vm838_vm7, %vm839_vm4  ;;  %v1347_v13 = vadd.f32 %v6246_v59, %v1346_v15  ;;  %vm1348_vm9 = vweird.f32 %v6185_v37  ;;  %v1754_v36 = vld [vmem:[#allocation8 + $0x90] sm:$0xff]  ;;  %v1755_v47 = vld [vmem:[#allocation8 + $0x98] sm:$0xff] }
 0x256   :  { %v1354_v33 = vand.u32 2147483648, %v6185_v37  ;;  %v841_v58 = vsel %vm6359_vm8, %v7932_v18, %v837_v52  ;;  %vm843_vm10 = vcmp.eq.f32.partialorder %v842_v9, 8.507059e+37  ;;  %vm1350_vm11 = vmor %vm1348_vm9, %vm1349_vm6  ;;  %v866_v43 = vmul.f32 %v7937_v7, %v865_v3  ;;  %1789 = vmatpush.msra.mxu3 %v1754_v36  ;;  %1830 = vmatpush.msra.mxu2 %v1755_v47  ;;  %v1894_v36 = vld [vmem:[%s7800_s7 + $0x68] sm:$0xff]  ;;  %v1899_v47 = vld [vmem:[%s7800_s7 + $0x90] sm:$0xff] }
 0x257   :  { %v1429_v1 = vmul.f32 %v1413_v39, %v7938_v5  ;;  %v845_v28 = vor.u32 1.1754944e-38, %v844_v12  ;;  %v1351_v60 = vsel %vm1350_vm11, %v6246_v59, %v1347_v13  ;;  %vm1353_vm12 = vcmp.eq.f32.partialorder %v1352_v56, 8.507059e+37  ;;  %v1752_v56 = vld [vmem:[#allocation8 + $0x80] sm:$0xff]  ;;  %v1753_v39 = vld [vmem:[#allocation8 + $0x88] sm:$0xff]  ;;  %v1750_v13 = vld [vmem:[#allocation8 + $0x70] sm:$0xff] }
 0x258   :  { %v1355_v51 = vor.u32 1.1754944e-38, %v1354_v33  ;;  %v867_v40 = vadd.f32 %v7937_v7, %v866_v43  ;;  %vm869_vm13 = vweird.f32 %v7937_v7  ;;  %v1376_v37 = vmul.f32 %v6304_v8, %v1375_v63  ;;  %v1751_v33 = vld [vmem:[#allocation8 + $0x78] sm:$0xff]  ;;  %1790 = vmatpush.msra.mxu3 %v1752_v56  ;;  %1831 = vmatpush.msra.mxu2 %v1753_v39 }
 0x259   :  { %v846_v30 = vsel %vm843_vm10, %v845_v28, %v841_v58  ;;  %v874_v2 = vand.u32 2147483648, %v7939_v11  ;;  %vm1379_vm14 = vweird.f32 %v6304_v8  ;;  %vm868_vm15 = vweird.f32 %v7939_v11  ;;  %v1748_v58 = vld [vmem:[#allocation8 + $0x60] sm:$0xff]  ;;  %v1747_v28 = vld [vmem:[#allocation8 + $0x58] sm:$0xff] }
 0x25a   :  { %v1356_v10 = vsel %vm1353_vm12, %v1355_v51, %v1351_v60  ;;  %v872_v32 = vand.u32 2147483647, %v7939_v11  ;;  %v1382_v59 = vand.u32 2147483647, %v6248_v4  ;;  %vm870_vm1 = vmor %vm868_vm15, %vm869_vm13  ;;  %v1377_v21 = vadd.f32 %v6304_v8, %v1376_v37  ;;  %1791 = vmatpush.msra.mxu3 %v1750_v13  ;;  %1832 = vmatpush.msra.mxu2 %v1751_v33  ;;  %v1745_v37 = vld [vmem:[#allocation8 + $0x48] sm:$0xff]  ;;  %v1743_v11 = vld [vmem:[#allocation8 + $0x38] sm:$0xff] }
 0x25b   :  { %v1415_v3 = vadd.f32 %v1356_v10, %v846_v30  ;;  %1530 = vmatmul.f32.gmra.mxu3 %v1429_v1  ;;  %1612 = vmatmul.f32.gmra.mxu0 %v1429_v1  ;;  %vm1378_vm3 = vweird.f32 %v6248_v4  ;;  %v1384_v48 = vand.u32 2147483648, %v6248_v4  ;;  %v871_v6 = vsel %vm870_vm1, %v7937_v7, %v867_v40  ;;  %v1749_v7 = vld [vmem:[#allocation8 + $0x68] sm:$0xff]  ;;  %v1746_v1 = vld [vmem:[#allocation8 + $0x50] sm:$0xff]  ;;  %v1744_v40 = vld [vmem:[#allocation8 + $0x40] sm:$0xff] }
 0x25c   :  { %vm1380_vm4 = vmor %vm1378_vm3, %vm1379_vm14  ;;  %v875_v0 = vor.u32 1.1754944e-38, %v874_v2  ;;  %vm873_vm5 = vcmp.eq.f32.partialorder %v872_v32, 8.507059e+37  ;;  %vm1383_vm6 = vcmp.eq.f32.partialorder %v1382_v59, 8.507059e+37  ;;  %1792 = vmatpush.msra.mxu3 %v1748_v58  ;;  %1833 = vmatpush.msra.mxu2 %v1749_v7  ;;  %v1742_v10 = vld [vmem:[#allocation8 + $0x30] sm:$0xff]  ;;  %vm1711_vm7 = vcmask 392192   ;;  %v1898_v56 = vld [vmem:[%s7800_s7 + $0x88] sm:$0xff] }
 0x25d   :  { %v1381_v49 = vsel %vm1380_vm4, %v6304_v8, %v1377_v21  ;;  %v1385_v26 = vor.u32 1.1754944e-38, %v1384_v48  ;;  %v1431_v41 = vmul.f32 %v1415_v3, %v7940_v57  ;;  %vm1758_vm8 = vcmask 654336   ;;  %v1893_v39 = vld [vmem:[%s7800_s7 + $0x60] sm:$0xff]  ;;  %v1892_v13 = vld [vmem:[%s7800_s7 + $0x58] sm:$0xff]  ;;  %v1891_v33 = vld [vmem:[%s7800_s7 + $0x50] sm:$0xff] }
 0x25e   :  { %v876_v16 = vsel %vm873_vm5, %v875_v0, %v871_v6  ;;  %1793 = vmatpush.msra.mxu3 %v1746_v1  ;;  %1834 = vmatpush.msra.mxu2 %v1747_v28  ;;  %v1890_v58 = vld [vmem:[%s7800_s7 + $0x48] sm:$0xff]  ;;  %vm2023_vm9 = vcmask 15360  }
 0x25f   :  { %v1386_v22 = vsel %vm1383_vm6, %v1385_v26, %v1381_v49 }
 0x260   :  { %v1417_v24 = vadd.f32 %v1386_v22, %v876_v16  ;;  %1794 = vmatpush.msra.mxu3 %v1744_v40  ;;  %1835 = vmatpush.msra.mxu2 %v1745_v37  ;;  %v1886_v40 = vld [vmem:[%s7800_s7 + $0x28] sm:$0xff] }
 0x262   :  { %v1433_v62 = vmul.f32 %v1417_v24, %v7941_v19  ;;  %1795 = vmatpush.msra.mxu3 %v1742_v10  ;;  %1836 = vmatpush.msra.mxu2 %v1743_v11  ;;  %v1740_v19 = vld [vmem:[#allocation8 + $0x20] sm:$0xff]  ;;  %v1885_v10 = vld [vmem:[%s7800_s7 + $0x20] sm:$0xff] }
 0x263   :  { %1533 = vmatmul.f32.gmra.mxu3 %v1431_v41  ;;  %1615 = vmatmul.f32.gmra.mxu0 %v1431_v41 }
 0x264   :  { %1796 = vmatpush.msra.mxu3 %v1740_v19 }
 0x26b   :  { %1536 = vmatmul.f32.gmra.mxu3 %v1433_v62  ;;  %1618 = vmatmul.f32.gmra.mxu0 %v1433_v62  ;;  %v1741_v62 = vld [vmem:[#allocation8 + $0x28] sm:$0xff] }
 0x26c   :  { %1837 = vmatpush.msra.mxu2 %v1741_v62 }
 0x27e   :  { %v1639_v27 = vpop.f32.mrf.mxu1 }
 0x284   :  { %v1557_v4 = vpop.f32.mrf.mxu2 }
 0x286   :  { %v1642_v31 = vpop.f32.mrf.mxu1 }
 0x28c   :  { %v1560_v54 = vpop.f32.mrf.mxu2 }
 0x290   :  { %v1645_v53 = vpop.f32.mrf.mxu1 }
 0x296   :  { %v1563_v18 = vpop.f32.mrf.mxu2 }
 0x298   :  { %v1648_v35 = vpop.f32.mrf.mxu1 }
 0x29d   :  { %v1598_v8 = vpop.f32.mrf.mxu0 }
 0x29e   :  { %v1640_v46 = vadd.f32 %v1639_v27, %v1598_v8  ;;  %v1566_v44 = vpop.f32.mrf.mxu2  ;;  %v1736_v27 = vld [vmem:[#allocation8] sm:$0xff]  ;;  %v1737_v8 = vld [vmem:[#allocation8 + $0x8] sm:$0xff] }
 0x2a0   :  { %v1651_v9 = vpop.f32.mrf.mxu1 }
 0x2a3   :  { %v1516_v17 = vpop.f32.mrf.mxu3 }
 0x2a4   :  { %v6389_v23 = vadd.f32 %v1557_v4, %v1516_v17  ;;  %v1738_v4 = vld [vmem:[#allocation8 + $0x10] sm:$0xff]  ;;  %v1739_v17 = vld [vmem:[#allocation8 + $0x18] sm:$0xff] }
 0x2a5   :  { %1797 = vmatpush.msra.mxu3 %v1738_v4  ;;  %1838 = vmatpush.msra.mxu2 %v1739_v17 }
 0x2a6   :  { %1679 = vrot.lane.b32.xlu0 %v6389_v23, %s4927_s4  ;;  %v1601_v14 = vpop.f32.mrf.mxu0  ;;  %v1569_v12 = vpop.f32.mrf.mxu2 }
 0x2a7   :  { %v1643_v45 = vadd.f32 %v1642_v31, %v1601_v14  ;;  %1798 = vmatpush.msra.mxu3 %v1736_v27  ;;  %1839 = vmatpush.msra.mxu2 %v1737_v8 }
 0x2ac   :  { %v1519_v38 = vpop.f32.mrf.mxu3  ;;  %v1654_v51 = vpop.f32.mrf.mxu1 }
 0x2ad   :  { %v6393_v25 = vadd.f32 %v1560_v54, %v1519_v38 }
 0x2ae   :  { %1681 = vrot.lane.b32.xlu0 %v1640_v46, %s4927_s4 }
 0x2af   :  { %1683 = vrot.lane.b32.xlu1 %v6393_v25, %s4927_s4 }
 0x2b2   :  { %v1572_v30 = vpop.f32.mrf.mxu2 }
 0x2b5   :  { %v1604_v20 = vpop.f32.mrf.mxu0 }
 0x2b6   :  { %v1646_v34 = vadd.f32 %v1645_v53, %v1604_v20 }
 0x2b7   :  { %1685 = vrot.lane.b32.xlu1 %v1643_v45, %s4927_s4 }
 0x2bb   :  { %v1522_v55 = vpop.f32.mrf.mxu3  ;;  %v1657_v21 = vpop.f32.mrf.mxu1 }
 0x2bc   :  { %v6399_v63 = vadd.f32 %v1563_v18, %v1522_v55 }
 0x2be   :  { %1687 = vrot.lane.b32.xlu2 %v6399_v63, %s4927_s4 }
 0x2c1   :  { %v1575_v48 = vpop.f32.mrf.mxu2 }
 0x2c4   :  { %v1607_v50 = vpop.f32.mrf.mxu0 }
 0x2c5   :  { %v1649_v42 = vadd.f32 %v1648_v35, %v1607_v50 }
 0x2c6   :  { %1689 = vrot.lane.b32.xlu2 %v1646_v34, %s4927_s4 }
 0x2c7   :  { %1693 = vrot.lane.b32.xlu1 %v1649_v42, %s4927_s4 }
 0x2ca   :  { %v1525_v52 = vpop.f32.mrf.mxu3  ;;  %v1660_v57 = vpop.f32.mrf.mxu1 }
 0x2cb   :  { %v6405_v29 = vadd.f32 %v1566_v44, %v1525_v52 }
 0x2cd   :  { %1691 = vrot.lane.b32.xlu0 %v6405_v29, %s4927_s4 }
 0x2d0   :  { %v1610_v15 = vpop.f32.mrf.mxu0  ;;  %v1578_v41 = vpop.f32.mrf.mxu2 }
 0x2d1   :  { %v1652_v61 = vadd.f32 %v1651_v9, %v1610_v15  ;;  %v1900_v9 = vld [vmem:[%s7800_s7 + $0x98] sm:$0xff] }
 0x2d2   :  { %1979 = vmatpush.msra.mxu1 %v1900_v9 }
 0x2d4   :  { %1980 = vmatpush.msra.mxu1 %v1899_v47  ;;  %v2452_v47 = vld [vmem:[#allocation11 + $0x70] sm:$0xff] }
 0x2d5   :  { %1697 = vrot.lane.b32.xlu0 %v1652_v61, %s4927_s4  ;;  %v1897_v61 = vld [vmem:[%s7800_s7 + $0x80] sm:$0xff] }
 0x2d6   :  { %v1528_v43 = vpop.f32.mrf.mxu3  ;;  %1981 = vmatpush.msra.mxu1 %v1898_v56  ;;  %v2450_v56 = vld [vmem:[#allocation11 + $0x60] sm:$0xff] }
 0x2d7   :  { %v6410_v5 = vadd.f32 %v1569_v12, %v1528_v43  ;;  %v1895_v12 = vld [vmem:[%s7800_s7 + $0x70] sm:$0xff] }
 0x2d8   :  { %v1613_v60 = vpop.f32.mrf.mxu0  ;;  %1982 = vmatpush.msra.mxu1 %v1897_v61 }
 0x2d9   :  { %1695 = vrot.lane.b32.xlu2 %v6410_v5, %s4927_s4  ;;  %v1655_v3 = vadd.f32 %v1654_v51, %v1613_v60  ;;  %v1888_v60 = vld [vmem:[%s7800_s7 + $0x38] sm:$0xff]  ;;  %v1887_v51 = vld [vmem:[%s7800_s7 + $0x30] sm:$0xff] }
 0x2de   :  { %v1531_v2 = vpop.f32.mrf.mxu3 }
 0x2df   :  { %v6414_v32 = vadd.f32 %v1572_v30, %v1531_v2 }
 0x2e0   :  { %v1616_v59 = vpop.f32.mrf.mxu0 }
 0x2e1   :  { %1701 = vrot.lane.b32.xlu2 %v1655_v3, %s4927_s4  ;;  %1699 = vrot.lane.b32.xlu1 %v6414_v32, %s4927_s4  ;;  %v1658_v0 = vadd.f32 %v1657_v21, %v1616_v59  ;;  %v1884_v3 = vld [vmem:[%s7800_s7 + $0x18] sm:$0xff]  ;;  %v1882_v59 = vld [vmem:[%s7800_s7 + $0x8] sm:$0xff] }
 0x2e6   :  { %v1534_v6 = vpop.f32.mrf.mxu3 }
 0x2e7   :  { %v6419_v49 = vadd.f32 %v1575_v48, %v1534_v6 }
 0x2e8   :  { %v1619_v26 = vpop.f32.mrf.mxu0 }
 0x2e9   :  { %1705 = vrot.lane.b32.xlu1 %v1658_v0, %s4927_s4  ;;  %1703 = vrot.lane.b32.xlu0 %v6419_v49, %s4927_s4  ;;  %v1661_v22 = vadd.f32 %v1660_v57, %v1619_v26  ;;  %v6524_v26 = vld [vmem:[%s7807_s14] sm:$0xff] }
 0x2ea   :  { %v6527_v57 = vperm.slane %v6524_v26, 4 }
 0x2ee   :  { %v1537_v16 = vpop.f32.mrf.mxu3 }
 0x2ef   :  { %v6424_v24 = vadd.f32 %v1578_v41, %v1537_v16  ;;  %v6532_v41 = vld [vmem:[%s7807_s14 + $0x8] sm:$0xff] }
 0x2f0   :  { %v6535_v16 = vperm.slane %v6532_v41, 4 }
 0x2f1   :  { %1709 = vrot.lane.b32.xlu0 %v1661_v22, %s4927_s4  ;;  %1707 = vrot.lane.b32.xlu2 %v6424_v24, %s4927_s4  ;;  %s4930_s4 = smov 100  }
 0x318   :  { %v1680_v54 = vpop.permute.xlu0 %1679  ;;  %v1688_v45 = vpop.permute.xlu2 %1687 }
 0x320   :  { %v1682_v46 = vpop.permute.xlu0 %1681  ;;  %v1690_v55 = vpop.permute.xlu2 %1689 }
 0x321   :  { %v1712_v38 = vsel %vm1711_vm7, %v1680_v54, %v1682_v46  ;;  %v1684_v31 = vpop.permute.xlu1 %1683  ;;  %v1714_v35 = vsel %vm1711_vm7, %v1688_v45, %v1690_v55 }
 0x322   :  { %v1728_v14 = vmax.f32 %v6389_v23, %v1712_v38  ;;  %v1730_v34 = vmax.f32 %v6399_v63, %v1714_v35  ;;  %v1896_v63 = vld [vmem:[%s7800_s7 + $0x78] sm:$0xff] }
 0x323   :  { %1926 = vmatpush.msrb.mxu0 %v1896_v63  ;;  %v2468_v38 = vld [vmem:[#allocation11 + $0xf0] sm:$0xff] }
 0x324   :  { %4098 = vmatmul.msk.f32.vlgmr.msra.gmra.mxu3 %vm1758_vm8, %v1728_v14  ;;  %4106 = vmatmul.msk.f32.vlgmr.msra.gmra.mxu2 %vm1758_vm8, %v1728_v14  ;;  %v2456_v63 = vld [vmem:[#allocation11 + $0x90] sm:$0xff] }
 0x325   :  { %1927 = vmatpush.msrb.mxu0 %v1895_v12 }
 0x327   :  { %1928 = vmatpush.msrb.mxu0 %v1894_v36  ;;  %v2454_v36 = vld [vmem:[#allocation11 + $0x80] sm:$0xff] }
 0x329   :  { %v1686_v53 = vpop.permute.xlu1 %1685  ;;  %1929 = vmatpush.msrb.mxu0 %v1893_v39 }
 0x32a   :  { %v1713_v20 = vsel %vm1711_vm7, %v1684_v31, %v1686_v53 }
 0x32b   :  { %v1729_v18 = vmax.f32 %v6393_v25, %v1713_v20  ;;  %1930 = vmatpush.msrb.mxu0 %v1892_v13 }
 0x32d   :  { %4099 = vmatmul.msk.f32.gmra.mxu3 %vm1758_vm8, %v1729_v18  ;;  %4107 = vmatmul.msk.f32.gmra.mxu2 %vm1758_vm8, %v1729_v18 }
 0x32e   :  { %1931 = vmatpush.msrb.mxu0 %v1891_v33 }
 0x330   :  { %1932 = vmatpush.msrb.mxu0 %v1890_v58  ;;  %v2448_v58 = vld [vmem:[#allocation11 + $0x50] sm:$0xff] }
 0x333   :  { %v1696_v25 = vpop.permute.xlu2 %1695 }
 0x335   :  { %4100 = vmatmul.msk.f32.gmra.mxu3 %vm1758_vm8, %v1730_v34  ;;  %4108 = vmatmul.msk.f32.gmra.mxu2 %vm1758_vm8, %v1730_v34  ;;  %v2466_v34 = vld [vmem:[#allocation11 + $0xe0] sm:$0xff] }
 0x339   :  { %v1694_v23 = vpop.permute.xlu1 %1693 }
 0x33b   :  { %v1702_v7 = vpop.permute.xlu2 %1701 }
 0x33f   :  { %v1692_v50 = vpop.permute.xlu0 %1691 }
 0x340   :  { %v1715_v42 = vsel %vm1711_vm7, %v1692_v50, %v1694_v23  ;;  %v2464_v23 = vld [vmem:[#allocation11 + $0xd0] sm:$0xff]  ;;  %v2462_v50 = vld [vmem:[#allocation11 + $0xc0] sm:$0xff] }
 0x341   :  { %v1731_v44 = vmax.f32 %v6405_v29, %v1715_v42  ;;  %v2460_v42 = vld [vmem:[#allocation11 + $0xb0] sm:$0xff] }
 0x343   :  { %4101 = vmatmul.msk.f32.gmra.mxu3 %vm1758_vm8, %v1731_v44  ;;  %4109 = vmatmul.msk.f32.gmra.mxu2 %vm1758_vm8, %v1731_v44  ;;  %v2458_v44 = vld [vmem:[#allocation11 + $0xa0] sm:$0xff] }
 0x347   :  { %v1698_v52 = vpop.permute.xlu0 %1697 }
 0x348   :  { %v1716_v29 = vsel %vm1711_vm7, %v1696_v25, %v1698_v52 }
 0x349   :  { %v1732_v15 = vmax.f32 %v6410_v5, %v1716_v29  ;;  %v1889_v5 = vld [vmem:[%s7800_s7 + $0x40] sm:$0xff] }
 0x34a   :  { %1933 = vmatpush.msrb.mxu0 %v1889_v5 }
 0x34b   :  { %4102 = vmatmul.msk.f32.gmra.mxu3 %vm1758_vm8, %v1732_v15  ;;  %4110 = vmatmul.msk.f32.gmra.mxu2 %vm1758_vm8, %v1732_v15  ;;  %v1708_v21 = vpop.permute.xlu2 %1707 }
 0x34c   :  { %1934 = vmatpush.msrb.mxu0 %v1888_v60  ;;  %v2472_v60 = vld [vmem:[#allocation11 + $0x110] sm:$0xff] }
 0x34e   :  { %1935 = vmatpush.msrb.mxu0 %v1887_v51  ;;  %v2444_v51 = vld [vmem:[#allocation11 + $0x30] sm:$0xff] }
 0x350   :  { %1936 = vmatpush.msrb.mxu0 %v1886_v40  ;;  %v2470_v40 = vld [vmem:[#allocation11 + $0x100] sm:$0xff] }
 0x352   :  { %1937 = vmatpush.msrb.mxu0 %v1885_v10  ;;  %v2016_v10 = vld [vmem:[#allocation10] sm:$0xf] }
 0x353   :  { %v1700_v43 = vpop.permute.xlu1 %1699  ;;  %2020 = vst [vmem:[#allocation1] ss:$4 sm:$0xff] %v2016_v10 }
 0x354   :  { %v1717_v1 = vsel %vm1711_vm7, %v1700_v43, %v1702_v7  ;;  %1938 = vmatpush.msrb.mxu0 %v1884_v3  ;;  %v2476_v7 = vld [vmem:[#allocation11 + $0x130] sm:$0xff]  ;;  %v2474_v43 = vld [vmem:[#allocation11 + $0x120] sm:$0xff] }
 0x355   :  { %v1733_v28 = vmax.f32 %v6414_v32, %v1717_v1  ;;  %v1883_v32 = vld [vmem:[%s7800_s7 + $0x10] sm:$0xff]  ;;  %2533 = vmatpush.msrb.mxu1 %v2476_v7 }
 0x356   :  { %1939 = vmatpush.msrb.mxu0 %v1883_v32 }
 0x357   :  { %4103 = vmatmul.msk.f32.gmra.mxu3 %vm1758_vm8, %v1733_v28  ;;  %4111 = vmatmul.msk.f32.gmra.mxu2 %vm1758_vm8, %v1733_v28  ;;  %v2446_v28 = vld [vmem:[#allocation11 + $0x40] sm:$0xff] }
 0x358   :  { %1940 = vmatpush.msrb.mxu0 %v1882_v59  ;;  %2534 = vmatpush.msrb.mxu1 %v2474_v43 }
 0x35a   :  { %2535 = vmatpush.msrb.mxu1 %v2472_v60 }
 0x35b   :  { %v1706_v37 = vpop.permute.xlu1 %1705  ;;  %v1704_v30 = vpop.permute.xlu0 %1703 }
 0x35c   :  { %v1718_v11 = vsel %vm1711_vm7, %v1704_v30, %v1706_v37  ;;  %v2442_v37 = vld [vmem:[#allocation11 + $0x20] sm:$0xff]  ;;  %2536 = vmatpush.msrb.mxu1 %v2470_v40  ;;  %v2440_v30 = vld [vmem:[#allocation11 + $0x10] sm:$0xff]  ;;  %v2473_v40 = vld [vmem:[#allocation11 + $0x118] sm:$0xff] }
 0x35d   :  { %v1734_v2 = vmax.f32 %v6419_v49, %v1718_v11  ;;  %v1881_v49 = vld [vmem:[%s7800_s7] sm:$0xff]  ;;  %v2438_v11 = vld [vmem:[#allocation11] sm:$0xff] }
 0x35e   :  { %1941 = vmatpush.msrb.mxu0 %v1881_v49 }
 0x35f   :  { %4104 = vmatmul.msk.f32.gmra.mxu3 %vm1758_vm8, %v1734_v2  ;;  %4112 = vmatmul.msk.f32.gmra.mxu2 %vm1758_vm8, %v1734_v2 }
 0x360   :  { %2480 = vmatpush.msra.mxu0 %v2468_v38 }
 0x362   :  { %2481 = vmatpush.msra.mxu0 %v2466_v34  ;;  %v2463_v34 = vld [vmem:[#allocation11 + $0xc8] sm:$0xff] }
 0x363   :  { %v1710_v48 = vpop.permute.xlu0 %1709 }
 0x364   :  { %v1719_v6 = vsel %vm1711_vm7, %v1708_v21, %v1710_v48  ;;  %2482 = vmatpush.msra.mxu0 %v2464_v23  ;;  %v2461_v23 = vld [vmem:[#allocation11 + $0xb8] sm:$0xff] }
 0x365   :  { %v1735_v0 = vmax.f32 %v6424_v24, %v1719_v6  ;;  %v2021_v6 = vld.sshfl [vmem:[#allocation1] sm:$0xff pattern:$0x73625140] }
 0x366   :  { %2483 = vmatpush.msra.mxu0 %v2462_v50  ;;  %4122 = vmatpush.msk.msrb.mxu3 %vm230_vm0, %v2021_v6  ;;  %v6633_v50 = vperm.slane %v6524_v26, 5 }
 0x367   :  { %4105 = vmatmul.msk.f32.gmra.mxu3 %vm1758_vm8, %v1735_v0  ;;  %4113 = vmatmul.msk.f32.gmra.mxu2 %vm1758_vm8, %v1735_v0  ;;  %v2022_v0 = vld.sshfl [vmem:[#allocation1 + $0x8] sm:$0xff pattern:$0x73625140] }
 0x368   :  { %2484 = vmatpush.msra.mxu0 %v2460_v42  ;;  %4131 = vmatpush.msk.msrb.mxu2 %vm230_vm0, %v2022_v0 }
 0x36a   :  { %2485 = vmatpush.msra.mxu0 %v2458_v44 }
 0x36c   :  { %2486 = vmatpush.msra.mxu0 %v2456_v63  ;;  %v2475_v63 = vld [vmem:[#allocation11 + $0x128] sm:$0xff] }
 0x36e   :  { %2487 = vmatpush.msra.mxu0 %v2454_v36  ;;  %v2457_v36 = vld [vmem:[#allocation11 + $0x98] sm:$0xff] }
 0x370   :  { %2488 = vmatpush.msra.mxu0 %v2452_v47 }
 0x372   :  { %2489 = vmatpush.msra.mxu0 %v2450_v56 }
 0x374   :  { %2490 = vmatpush.msra.mxu0 %v2448_v58 }
 0x376   :  { %2491 = vmatpush.msra.mxu0 %v2446_v28 }
 0x378   :  { %2492 = vmatpush.msra.mxu0 %v2444_v51 }
 0x37a   :  { %2493 = vmatpush.msra.mxu0 %v2442_v37  ;;  %v2451_v37 = vld [vmem:[#allocation11 + $0x68] sm:$0xff] }
 0x37c   :  { %2494 = vmatpush.msra.mxu0 %v2440_v30  ;;  %v2449_v30 = vld [vmem:[#allocation11 + $0x58] sm:$0xff] }
 0x37e   :  { %2495 = vmatpush.msra.mxu0 %v2438_v11 }
 0x3a7   :  { %v1800_v22 = vpop.f32.mrf.mxu3  ;;  %v1841_v24 = vpop.f32.mrf.mxu2 }
 0x3a8   :  { %v1801_v19 = vadd.f32 %v1800_v22, %v6527_v57  ;;  %v1842_v62 = vadd.f32 %v1841_v24, %v6535_v16 }
 0x3aa   :  { %v6539_v4 = vmax.f32 %v1801_v19, 0.0  ;;  %v6541_v17 = vmax.f32 %v1842_v62, 0.0 }
 0x3ac   :  { %1942 = vmatmul.f32.vlgmr.msrb.gmra.mxu0 %v6539_v4  ;;  %4114 = vmatmul.msk.f32.vlgmr.msra.gmra.mxu1 %vm356_vm2, %v6541_v17 }
 0x3b0   :  { %v1803_v27 = vpop.f32.mrf.mxu3  ;;  %v1844_v8 = vpop.f32.mrf.mxu2 }
 0x3b1   :  { %v1804_v54 = vadd.f32 %v1803_v27, %v6527_v57  ;;  %v1845_v46 = vadd.f32 %v1844_v8, %v6535_v16 }
 0x3b3   :  { %v6548_v31 = vmax.f32 %v1804_v54, 0.0  ;;  %v6550_v14 = vmax.f32 %v1845_v46, 0.0 }
 0x3b5   :  { %1945 = vmatmul.f32.gmra.mxu0 %v6548_v31  ;;  %4115 = vmatmul.msk.f32.gmra.mxu1 %vm356_vm2, %v6550_v14 }
 0x3b8   :  { %v1806_v45 = vpop.f32.mrf.mxu3  ;;  %v1847_v53 = vpop.f32.mrf.mxu2 }
 0x3b9   :  { %v1807_v20 = vadd.f32 %v1806_v45, %v6527_v57  ;;  %v1848_v18 = vadd.f32 %v1847_v53, %v6535_v16 }
 0x3bb   :  { %v6557_v55 = vmax.f32 %v1807_v20, 0.0  ;;  %v6559_v35 = vmax.f32 %v1848_v18, 0.0  ;;  %v2467_v20 = vld [vmem:[#allocation11 + $0xe8] sm:$0xff]  ;;  %v2465_v18 = vld [vmem:[#allocation11 + $0xd8] sm:$0xff] }
 0x3bd   :  { %1948 = vmatmul.f32.gmra.mxu0 %v6557_v55  ;;  %4116 = vmatmul.msk.f32.gmra.mxu1 %vm356_vm2, %v6559_v35 }
 0x3c6   :  { %v1809_v25 = vpop.f32.mrf.mxu3  ;;  %v1850_v52 = vpop.f32.mrf.mxu2 }
 0x3c7   :  { %v1810_v9 = vadd.f32 %v1809_v25, %v6527_v57  ;;  %v1851_v12 = vadd.f32 %v1850_v52, %v6535_v16 }
 0x3c9   :  { %v6566_v29 = vmax.f32 %v1810_v9, 0.0  ;;  %v6568_v15 = vmax.f32 %v1851_v12, 0.0  ;;  %v2459_v9 = vld [vmem:[#allocation11 + $0xa8] sm:$0xff] }
 0x3cb   :  { %1951 = vmatmul.f32.gmra.mxu0 %v6566_v29  ;;  %4117 = vmatmul.msk.f32.gmra.mxu1 %vm356_vm2, %v6568_v15 }
 0x3ce   :  { %v1812_v39 = vpop.f32.mrf.mxu3  ;;  %v1853_v61 = vpop.f32.mrf.mxu2 }
 0x3cf   :  { %v1813_v13 = vadd.f32 %v1812_v39, %v6527_v57  ;;  %v1854_v33 = vadd.f32 %v1853_v61, %v6535_v16  ;;  %v2455_v61 = vld [vmem:[#allocation11 + $0x88] sm:$0xff] }
 0x3d1   :  { %v6575_v5 = vmax.f32 %v1813_v13, 0.0  ;;  %v6577_v1 = vmax.f32 %v1854_v33, 0.0  ;;  %v2453_v33 = vld [vmem:[#allocation11 + $0x78] sm:$0xff] }
 0x3d3   :  { %7942 = vst [vmem:[#allocation28_spill] sm:$0xff] %v6577_v1  ;;  %1954 = vmatmul.f32.gmra.mxu0 %v6575_v5  ;;  %4118 = vmatmul.msk.f32.gmra.mxu1 %vm356_vm2, %v6577_v1 }
 0x3da   :  { %v1815_v2 = vpop.f32.mrf.mxu3  ;;  %v1856_v3 = vpop.f32.mrf.mxu2 }
 0x3db   :  { %v1816_v32 = vadd.f32 %v1815_v2, %v6527_v57  ;;  %v1857_v59 = vadd.f32 %v1856_v3, %v6535_v16  ;;  %v2447_v3 = vld [vmem:[#allocation11 + $0x48] sm:$0xff] }
 0x3dd   :  { %v6584_v21 = vmax.f32 %v1816_v32, 0.0  ;;  %v6586_v48 = vmax.f32 %v1857_v59, 0.0  ;;  %v2445_v59 = vld [vmem:[#allocation11 + $0x38] sm:$0xff] }
 0x3df   :  { %7943 = vst [vmem:[#allocation32_spill] sm:$0xff] %v6586_v48  ;;  %1957 = vmatmul.f32.gmra.mxu0 %v6584_v21  ;;  %4119 = vmatmul.msk.f32.gmra.mxu1 %vm356_vm2, %v6586_v48 }
 0x3e2   :  { %v1818_v49 = vpop.f32.mrf.mxu3  ;;  %v1859_v22 = vpop.f32.mrf.mxu2 }
 0x3e3   :  { %v1819_v24 = vadd.f32 %v1818_v49, %v6527_v57  ;;  %v1860_v19 = vadd.f32 %v1859_v22, %v6535_v16  ;;  %v2471_v22 = vld [vmem:[#allocation11 + $0x108] sm:$0xff] }
 0x3e5   :  { %v6595_v62 = vmax.f32 %v1819_v24, 0.0  ;;  %v6597_v27 = vmax.f32 %v1860_v19, 0.0  ;;  %v2443_v24 = vld [vmem:[#allocation11 + $0x28] sm:$0xff] }
 0x3e7   :  { %7944 = vst [vmem:[#allocation30_spill] sm:$0xff] %v6597_v27  ;;  %1960 = vmatmul.f32.gmra.mxu0 %v6595_v62  ;;  %4120 = vmatmul.msk.f32.gmra.mxu1 %vm356_vm2, %v6597_v27 }
 0x3ea   :  { %v1821_v8 = vpop.f32.mrf.mxu3  ;;  %v1862_v54 = vpop.f32.mrf.mxu2 }
 0x3eb   :  { %v1822_v46 = vadd.f32 %v1821_v8, %v6527_v57  ;;  %v1863_v38 = vadd.f32 %v1862_v54, %v6535_v16  ;;  %v2469_v57 = vld [vmem:[#allocation11 + $0xf8] sm:$0xff] }
 0x3ec   :  { %2562 = vmatpush.msra.mxu3 %v2469_v57  ;;  %v2477_v16 = vld [vmem:[#allocation11 + $0x138] sm:$0xff] }
 0x3ed   :  { %v6604_v45 = vmax.f32 %v1822_v46, 0.0  ;;  %v6606_v53 = vmax.f32 %v1863_v38, 0.0  ;;  %2615 = vmatpush.msra.mxu2 %v2477_v16  ;;  %v2441_v54 = vld [vmem:[#allocation11 + $0x18] sm:$0xff] }
 0x3ee   :  { %2563 = vmatpush.msra.mxu3 %v2467_v20 }
 0x3ef   :  { %7945 = vst [vmem:[#allocation24_spill] sm:$0xff] %v6606_v53  ;;  %1963 = vmatmul.f32.gmra.mxu0 %v6604_v45  ;;  %4121 = vmatmul.msk.f32.gmra.mxu1 %vm356_vm2, %v6606_v53 }
 0x3f0   :  { %2564 = vmatpush.msra.mxu3 %v2465_v18  ;;  %2616 = vmatpush.msra.mxu2 %v2475_v63 }
 0x3f2   :  { %2565 = vmatpush.msra.mxu3 %v2463_v34  ;;  %2617 = vmatpush.msra.mxu2 %v2473_v40 }
 0x3f4   :  { %2566 = vmatpush.msra.mxu3 %v2461_v23  ;;  %2618 = vmatpush.msra.mxu2 %v2471_v22 }
 0x3f6   :  { %2567 = vmatpush.msra.mxu3 %v2459_v9 }
 0x3f7   :  { %2496 = vmatmul.f32.vlgmr.msra.gmra.mxu0 %v6539_v4  ;;  %4156 = vmatmul.msk.f32.vlgmr.msrb.gmra.mxu1 %vm356_vm2, %v6541_v17 }
 0x3f8   :  { %2568 = vmatpush.msra.mxu3 %v2457_v36 }
 0x3fa   :  { %2569 = vmatpush.msra.mxu3 %v2455_v61 }
 0x3fc   :  { %2570 = vmatpush.msra.mxu3 %v2453_v33 }
 0x3fe   :  { %2571 = vmatpush.msra.mxu3 %v2451_v37 }
 0x3ff   :  { %2499 = vmatmul.f32.gmra.mxu0 %v6548_v31  ;;  %4157 = vmatmul.msk.f32.gmra.mxu1 %vm356_vm2, %v6550_v14 }
 0x400   :  { %2572 = vmatpush.msra.mxu3 %v2449_v30 }
 0x402   :  { %2573 = vmatpush.msra.mxu3 %v2447_v3 }
 0x404   :  { %2574 = vmatpush.msra.mxu3 %v2445_v59  ;;  %v6685_v59 = vperm.slane %v6524_v26, 6 }
 0x406   :  { %2575 = vmatpush.msra.mxu3 %v2443_v24  ;;  %v2995_v24 = vld [vmem:[#allocation13 + $0x78] sm:$0xff] }
 0x407   :  { %2502 = vmatmul.f32.gmra.mxu0 %v6557_v55  ;;  %4158 = vmatmul.msk.f32.gmra.mxu1 %vm356_vm2, %v6559_v35 }
 0x408   :  { %2576 = vmatpush.msra.mxu3 %v2441_v54  ;;  %3024 = vmatpush.msrb.mxu0 %v2995_v24 }
 0x40f   :  { %2505 = vmatmul.f32.gmra.mxu0 %v6566_v29  ;;  %4159 = vmatmul.msk.f32.gmra.mxu1 %vm356_vm2, %v6568_v15 }
 0x417   :  { %2508 = vmatmul.f32.gmra.mxu0 %v6575_v5  ;;  %4160 = vmatmul.msk.f32.gmra.mxu1 %vm356_vm2, %v6577_v1 }
 0x41f   :  { %2511 = vmatmul.f32.gmra.mxu0 %v6584_v21  ;;  %4161 = vmatmul.msk.f32.gmra.mxu1 %vm356_vm2, %v6586_v48 }
 0x427   :  { %2514 = vmatmul.f32.gmra.mxu0 %v6595_v62  ;;  %4162 = vmatmul.msk.f32.gmra.mxu1 %vm356_vm2, %v6597_v27 }
 0x429   :  { %v1943_v42 = vpop.f32.mrf.mxu0  ;;  %v1984_v44 = vpop.f32.mrf.mxu1 }
 0x42a   :  { %v1944_v25 = vadd.f32 %v1943_v42, %v6633_v50 }
 0x42c   :  { %v1985_v52 = vadd.f32 %v1984_v44, %v1944_v25 }
 0x42e   :  { %v2008_v12 = vmax.f32 %v1985_v52, 0.0 }
 0x42f   :  { %2517 = vmatmul.f32.gmra.mxu0 %v6604_v45  ;;  %4163 = vmatmul.msk.f32.gmra.mxu1 %vm356_vm2, %v6606_v53 }
 0x430   :  { %4123 = vmatmul.msk.f32.vlgmr.msrb.gmra.mxu3 %vm2023_vm9, %v2008_v12  ;;  %4132 = vmatmul.msk.f32.vlgmr.msrb.gmra.mxu2 %vm2023_vm9, %v2008_v12 }
 0x432   :  { %v1946_v47 = vpop.f32.mrf.mxu0  ;;  %v1987_v56 = vpop.f32.mrf.mxu1 }
 0x433   :  { %v1947_v39 = vadd.f32 %v1946_v47, %v6633_v50  ;;  %v2439_v47 = vld [vmem:[#allocation11 + $0x8] sm:$0xff] }
 0x434   :  { %2577 = vmatpush.msra.mxu3 %v2439_v47 }
 0x435   :  { %v1988_v13 = vadd.f32 %v1987_v56, %v1947_v39 }
 0x437   :  { %v2009_v58 = vmax.f32 %v1988_v13, 0.0 }
 0x439   :  { %4124 = vmatmul.msk.f32.gmra.mxu3 %vm2023_vm9, %v2009_v58  ;;  %4133 = vmatmul.msk.f32.gmra.mxu2 %vm2023_vm9, %v2009_v58 }
 0x43a   :  { %v1949_v7 = vpop.f32.mrf.mxu0  ;;  %v1990_v28 = vpop.f32.mrf.mxu1 }
 0x43b   :  { %v1950_v43 = vadd.f32 %v1949_v7, %v6633_v50 }
 0x43d   :  { %v1991_v60 = vadd.f32 %v1990_v28, %v1950_v43 }
 0x43f   :  { %v2010_v51 = vmax.f32 %v1991_v60, 0.0  ;;  %v2478_v60 = vperm.slane %v6524_v26, 7 }
 0x441   :  { %4125 = vmatmul.msk.f32.gmra.mxu3 %vm2023_vm9, %v2010_v51  ;;  %4134 = vmatmul.msk.f32.gmra.mxu2 %vm2023_vm9, %v2010_v51 }
 0x448   :  { %v1952_v10 = vpop.f32.mrf.mxu0  ;;  %v1993_v11 = vpop.f32.mrf.mxu1 }
 0x449   :  { %v1953_v2 = vadd.f32 %v1952_v10, %v6633_v50 }
 0x44b   :  { %v1994_v32 = vadd.f32 %v1993_v11, %v1953_v2 }
 0x44d   :  { %v2011_v6 = vmax.f32 %v1994_v32, 0.0 }
 0x44f   :  { %4126 = vmatmul.msk.f32.gmra.mxu3 %vm2023_vm9, %v2011_v6  ;;  %4135 = vmatmul.msk.f32.gmra.mxu2 %vm2023_vm9, %v2011_v6 }
 0x450   :  { %v1955_v0 = vpop.f32.mrf.mxu0  ;;  %v1996_v19 = vpop.f32.mrf.mxu1 }
 0x451   :  { %v1956_v49 = vadd.f32 %v1955_v0, %v6633_v50 }
 0x453   :  { %v1997_v8 = vadd.f32 %v1996_v19, %v1956_v49  ;;  %v2994_v19 = vld [vmem:[#allocation13 + $0x70] sm:$0xff] }
 0x454   :  { %3025 = vmatpush.msrb.mxu0 %v2994_v19 }
 0x455   :  { %v2012_v46 = vmax.f32 %v1997_v8, 0.0 }
 0x457   :  { %4127 = vmatmul.msk.f32.gmra.mxu3 %vm2023_vm9, %v2012_v46  ;;  %4136 = vmatmul.msk.f32.gmra.mxu2 %vm2023_vm9, %v2012_v46 }
 0x45c   :  { %v1958_v38 = vpop.f32.mrf.mxu0  ;;  %v1999_v57 = vpop.f32.mrf.mxu1 }
 0x45d   :  { %v1959_v16 = vadd.f32 %v1958_v38, %v6633_v50 }
 0x45f   :  { %v2000_v20 = vadd.f32 %v1999_v57, %v1959_v16 }
 0x461   :  { %v2013_v18 = vmax.f32 %v2000_v20, 0.0 }
 0x463   :  { %4128 = vmatmul.msk.f32.gmra.mxu3 %vm2023_vm9, %v2013_v18  ;;  %4137 = vmatmul.msk.f32.gmra.mxu2 %vm2023_vm9, %v2013_v18 }
 0x464   :  { %v1961_v34 = vpop.f32.mrf.mxu0  ;;  %v2002_v23 = vpop.f32.mrf.mxu1 }
 0x465   :  { %v1962_v42 = vadd.f32 %v1961_v34, %v6633_v50 }
 0x467   :  { %v2003_v44 = vadd.f32 %v2002_v23, %v1962_v42 }
 0x469   :  { %v2014_v25 = vmax.f32 %v2003_v44, 0.0 }
 0x46b   :  { %4129 = vmatmul.msk.f32.gmra.mxu3 %vm2023_vm9, %v2014_v25  ;;  %4138 = vmatmul.msk.f32.gmra.mxu2 %vm2023_vm9, %v2014_v25 }
 0x46c   :  { %v1964_v52 = vpop.f32.mrf.mxu0  ;;  %v2005_v63 = vpop.f32.mrf.mxu1 }
 0x46d   :  { %v1965_v9 = vadd.f32 %v1964_v52, %v6633_v50 }
 0x46f   :  { %v2006_v12 = vadd.f32 %v2005_v63, %v1965_v9  ;;  %v2993_v9 = vld [vmem:[#allocation13 + $0x68] sm:$0xff] }
 0x470   :  { %3026 = vmatpush.msrb.mxu0 %v2993_v9 }
 0x471   :  { %v2015_v36 = vmax.f32 %v2006_v12, 0.0  ;;  %v2992_v12 = vld [vmem:[#allocation13 + $0x60] sm:$0xff] }
 0x472   :  { %3027 = vmatpush.msrb.mxu0 %v2992_v12 }
 0x473   :  { %4130 = vmatmul.msk.f32.gmra.mxu3 %vm2023_vm9, %v2015_v36  ;;  %4139 = vmatmul.msk.f32.gmra.mxu2 %vm2023_vm9, %v2015_v36 }
 0x474   :  { %v2497_v56 = vpop.f32.mrf.mxu0  ;;  %v2538_v39 = vpop.f32.mrf.mxu1 }
 0x475   :  { %v2498_v40 = vadd.f32 %v2497_v56, %v2478_v60  ;;  %v6694_v56 = vperm.slane %v6532_v41, 6 }
 0x477   :  { %v2539_v37 = vadd.f32 %v2538_v39, %v2498_v40  ;;  %v2989_v40 = vld [vmem:[#allocation13 + $0x48] sm:$0xff] }
 0x479   :  { %v4172_v11 = vmul.f32 -1.442695, %v2539_v37 }
 0x47b   :  { %2578 = vmatmul.f32.vlgmr.msra.gmra.mxu3 %v6539_v4  ;;  %4164 = vmatmul.msk.f32.vlgmr.msra.gmra.mxu2 %vm356_vm2, %v6541_v17  ;;  %4402 = vpow2.f32 %v4172_v11 }
 0x47c   :  { %v2500_v61 = vpop.f32.mrf.mxu0  ;;  %v2541_v13 = vpop.f32.mrf.mxu1 }
 0x47d   :  { %v2501_v2 = vadd.f32 %v2500_v61, %v2478_v60 }
 0x47f   :  { %v2542_v6 = vadd.f32 %v2541_v13, %v2501_v2  ;;  %v2991_v13 = vld [vmem:[#allocation13 + $0x58] sm:$0xff]  ;;  %v2988_v2 = vld [vmem:[#allocation13 + $0x40] sm:$0xff] }
 0x480   :  { %3028 = vmatpush.msrb.mxu0 %v2991_v13  ;;  %v2984_v13 = vld [vmem:[#allocation13 + $0x20] sm:$0xff] }
 0x481   :  { %v4403_v8 = vpop.eup %4402  ;;  %v4174_v20 = vmul.f32 -1.442695, %v2542_v6 }
 0x482   :  { %v6691_v34 = vadd.f32 1.0, %v4403_v8  ;;  %v2986_v8 = vld [vmem:[#allocation13 + $0x30] sm:$0xff] }
 0x483   :  { %2581 = vmatmul.f32.gmra.mxu3 %v6548_v31  ;;  %4165 = vmatmul.msk.f32.gmra.mxu2 %vm356_vm2, %v6550_v14 }
 0x484   :  { %v2503_v50 = vpop.f32.mrf.mxu0  ;;  %v2544_v33 = vpop.f32.mrf.mxu1  ;;  %vm2713_vm11 = vweird.f32 %v6691_v34 }
 0x485   :  { %v2504_v32 = vadd.f32 %v2503_v50, %v2478_v60 }
 0x487   :  { %v2545_v57 = vadd.f32 %v2544_v33, %v2504_v32 }
 0x489   :  { %v4176_v52 = vmul.f32 -1.442695, %v2545_v57 }
 0x48b   :  { %2584 = vmatmul.f32.gmra.mxu3 %v6557_v55  ;;  %4166 = vmatmul.msk.f32.gmra.mxu2 %vm356_vm2, %v6559_v35 }
 0x48c   :  { %v2506_v58 = vpop.f32.mrf.mxu0  ;;  %v2547_v7 = vpop.f32.mrf.mxu1 }
 0x48d   :  { %v2507_v0 = vadd.f32 %v2506_v58, %v2478_v60 }
 0x48f   :  { %v2548_v18 = vadd.f32 %v2547_v7, %v2507_v0  ;;  %v2990_v7 = vld [vmem:[#allocation13 + $0x50] sm:$0xff]  ;;  %v2987_v0 = vld [vmem:[#allocation13 + $0x38] sm:$0xff] }
 0x490   :  { %3029 = vmatpush.msrb.mxu0 %v2990_v7  ;;  %v2983_v7 = vld [vmem:[#allocation13 + $0x18] sm:$0xff] }
 0x491   :  { %v4178_v36 = vmul.f32 -1.442695, %v2548_v18 }
 0x492   :  { %3030 = vmatpush.msrb.mxu0 %v2989_v40 }
 0x493   :  { %2587 = vmatmul.f32.gmra.mxu3 %v6566_v29  ;;  %4167 = vmatmul.msk.f32.gmra.mxu2 %vm356_vm2, %v6568_v15 }
 0x494   :  { %v2509_v43 = vpop.f32.mrf.mxu0  ;;  %v2550_v28 = vpop.f32.mrf.mxu1  ;;  %3031 = vmatpush.msrb.mxu0 %v2988_v2 }
 0x495   :  { %v2510_v49 = vadd.f32 %v2509_v43, %v2478_v60 }
 0x496   :  { %3032 = vmatpush.msrb.mxu0 %v2987_v0 }
 0x497   :  { %v2551_v23 = vadd.f32 %v2550_v28, %v2510_v49 }
 0x498   :  { %3033 = vmatpush.msrb.mxu0 %v2986_v8 }
 0x499   :  { %v4180_v39 = vmul.f32 -1.442695, %v2551_v23 }
 0x49b   :  { %2590 = vmatmul.f32.gmra.mxu3 %v6575_v5  ;;  %4168 = vmatmul.msk.f32.gmra.mxu2 %vm356_vm2, %v6577_v1 }
 0x49c   :  { %v2512_v51 = vpop.f32.mrf.mxu0  ;;  %v2553_v30 = vpop.f32.mrf.mxu1 }
 0x49d   :  { %v2513_v54 = vadd.f32 %v2512_v51, %v2478_v60 }
 0x49f   :  { %v2554_v25 = vadd.f32 %v2553_v30, %v2513_v54 }
 0x4a1   :  { %v4182_v50 = vmul.f32 -1.442695, %v2554_v25 }
 0x4a3   :  { %2593 = vmatmul.f32.gmra.mxu3 %v6584_v21  ;;  %4169 = vmatmul.msk.f32.gmra.mxu2 %vm356_vm2, %v6586_v48 }
 0x4a4   :  { %v2515_v10 = vpop.f32.mrf.mxu0  ;;  %v2556_v3 = vpop.f32.mrf.mxu1 }
 0x4a5   :  { %v2516_v16 = vadd.f32 %v2515_v10, %v2478_v60 }
 0x4a7   :  { %v2557_v63 = vadd.f32 %v2556_v3, %v2516_v16 }
 0x4a9   :  { %v4184_v33 = vmul.f32 -1.442695, %v2557_v63 }
 0x4ab   :  { %2596 = vmatmul.f32.gmra.mxu3 %v6595_v62  ;;  %4170 = vmatmul.msk.f32.gmra.mxu2 %vm356_vm2, %v6597_v27 }
 0x4ac   :  { %v2518_v22 = vpop.f32.mrf.mxu0  ;;  %v2559_v47 = vpop.f32.mrf.mxu1 }
 0x4ad   :  { %v2519_v42 = vadd.f32 %v2518_v22, %v2478_v60 }
 0x4af   :  { %v2560_v61 = vadd.f32 %v2559_v47, %v2519_v42 }
 0x4b1   :  { %v4186_v51 = vmul.f32 -1.442695, %v2560_v61  ;;  %v2985_v61 = vld [vmem:[#allocation13 + $0x28] sm:$0xff] }
 0x4b2   :  { %3034 = vmatpush.msrb.mxu0 %v2985_v61 }
 0x4b3   :  { %2599 = vmatmul.f32.gmra.mxu3 %v6604_v45  ;;  %4171 = vmatmul.msk.f32.gmra.mxu2 %vm356_vm2, %v6606_v53  ;;  %v2069_v46 = vpop.f32.mrf.mxu3  ;;  %v2110_v38 = vpop.f32.mrf.mxu2 }
 0x4b4   :  { %v2070_v26 = vadd.f32 %v2069_v46, %v6685_v59  ;;  %v2111_v43 = vadd.f32 %v2110_v38, %v6694_v56  ;;  %3035 = vmatpush.msrb.mxu0 %v2984_v13  ;;  %v2981_v13 = vld [vmem:[#allocation13 + $0x8] sm:$0xff] }
 0x4b6   :  { %v4140_v44 = vmul.f32 -1.442695, %v2070_v26  ;;  %v4141_v3 = vmul.f32 -1.442695, %v2111_v43  ;;  %v2717_v43 = vand.u32 2147483647, %v6691_v34  ;;  %3036 = vmatpush.msrb.mxu0 %v2983_v7 }
 0x4b8   :  { %4404 = vpow2.f32 %v4140_v44  ;;  %vm6776_vm14 = vcmp.eq.f32.partialorder %v2717_v43, 8.507059e+37  ;;  %v2999_v43 = vld [vmem:[#allocation13 + $0x98] sm:$0xff] }
 0x4b9   :  { %4406 = vpow2.f32 %v4174_v20  ;;  %3077 = vmatpush.msra.mxu1 %v2999_v43 }
 0x4ba   :  { %4408 = vrcp.f32 %v6691_v34 }
 0x4bb   :  { %4410 = vpow2.f32 %v4176_v52 }
 0x4bc   :  { %v2072_v58 = vpop.f32.mrf.mxu3  ;;  %4412 = vpow2.f32 %v4178_v36  ;;  %v6699_v60 = vpop.f32.mrf.mxu2 }
 0x4bd   :  { %v2073_v28 = vadd.f32 %v2072_v58, %v6685_v59  ;;  %4414 = vpow2.f32 %v4180_v39 }
 0x4be   :  { %v4405_v41 = vpop.eup %4404  ;;  %4416 = vpow2.f32 %v4182_v50 }
 0x4bf   :  { %v4407_v37 = vpop.eup %4406  ;;  %v6701_v30 = vadd.f32 1.0, %v4405_v41  ;;  %v4142_v10 = vmul.f32 -1.442695, %v2073_v28  ;;  %4418 = vpow2.f32 %v4184_v33  ;;  %v2719_v28 = vand.u32 2147483648, %v6691_v34 }
 0x4c0   :  { %v6703_v11 = vpop.eup %4408  ;;  %v6706_v6 = vadd.f32 1.0, %v4407_v37 }
 0x4c1   :  { %4420 = vrcp.f32 %v6701_v30  ;;  %v4411_v32 = vpop.eup %4410  ;;  %v2709_v22 = vmul.f32 %v6703_v11, %v6691_v34  ;;  %vm2714_vm10 = vweird.f32 %v6703_v11  ;;  %vm2203_vm15 = vweird.f32 %v6701_v30 }
 0x4c2   :  { %4422 = vpow2.f32 %v4186_v51  ;;  %v4413_v49 = vpop.eup %4412  ;;  %v6712_v57 = vadd.f32 1.0, %v4411_v32  ;;  %v2114_v32 = vadd.f32 %v6699_v60, %v6694_v56  ;;  %vm6772_vm13 = vmor %vm2713_vm11, %vm2714_vm10  ;;  %vm2743_vm4 = vweird.f32 %v6706_v6 }
 0x4c3   :  { %4424 = vpow2.f32 %v4142_v10  ;;  %v4415_v24 = vpop.eup %4414  ;;  %v2710_v26 = vsub.f32 1.0, %v2709_v22  ;;  %v6716_v20 = vadd.f32 1.0, %v4413_v49  ;;  %v2982_v10 = vld [vmem:[#allocation13 + $0x10] sm:$0xff]  ;;  %v2207_v22 = vand.u32 2147483647, %v6701_v30 }
 0x4c4   :  { %v2075_v19 = vpop.f32.mrf.mxu3  ;;  %v4417_v54 = vpop.eup %4416  ;;  %4426 = vpow2.f32 %v4141_v3  ;;  %v6720_v44 = vadd.f32 1.0, %v4415_v24  ;;  %v2209_v3 = vand.u32 2147483648, %v6701_v30  ;;  %3037 = vmatpush.msrb.mxu0 %v2982_v10  ;;  %vm2773_vm7 = vweird.f32 %v6712_v57 }
 0x4c5   :  { %v2076_v46 = vadd.f32 %v2075_v19, %v6685_v59  ;;  %v4419_v38 = vpop.eup %4418  ;;  %4428 = vrcp.f32 %v6706_v6  ;;  %v6718_v23 = vpop.f32.mrf.mxu2  ;;  %v6724_v63 = vadd.f32 1.0, %v4417_v54  ;;  %v2711_v47 = vmul.f32 %v6703_v11, %v2710_v26 }
 0x4c6   :  { %v6727_v9 = vadd.f32 1.0, %v4419_v38  ;;  %v2720_v26 = vor.u32 1.1754944e-38, %v2719_v28  ;;  %vm2208_vm3 = vcmp.eq.f32.partialorder %v2207_v22, 8.507059e+37  ;;  %3038 = vmatpush.msrb.mxu0 %v2981_v13  ;;  %v2747_v54 = vand.u32 2147483647, %v6706_v6 }
 0x4c7   :  { %v6714_v16 = vpop.eup %4420  ;;  %v4144_v18 = vmul.f32 -1.442695, %v2076_v46  ;;  %v2712_v40 = vadd.f32 %v6703_v11, %v2711_v47 }
 0x4c8   :  { %v4423_v42 = vpop.eup %4422  ;;  %v2199_v25 = vmul.f32 %v6714_v16, %v6701_v30  ;;  %vm2204_vm12 = vweird.f32 %v6714_v16  ;;  %v2210_v30 = vor.u32 1.1754944e-38, %v2209_v3  ;;  %vm6857_vm5 = vcmp.eq.f32.partialorder %v2747_v54, 8.507059e+37 }
 0x4c9   :  { %v4425_v52 = vpop.eup %4424  ;;  %4430 = vpow2.f32 %v4144_v18  ;;  %v6736_v33 = vadd.f32 1.0, %v4423_v42  ;;  %v2716_v42 = vsel %vm6772_vm13, %v6703_v11, %v2712_v40  ;;  %vm6801_vm1 = vmor %vm2203_vm15, %vm2204_vm12  ;;  %v4143_v11 = vmul.f32 -1.442695, %v2114_v32 }
 0x4ca   :  { %4432 = vrcp.f32 %v6712_v57  ;;  %v2200_v12 = vsub.f32 1.0, %v2199_v25  ;;  %v4427_v36 = vpop.eup %4426  ;;  %v6731_v39 = vadd.f32 1.0, %v4425_v52 }
 0x4cb   :  { %4434 = vrcp.f32 %v6716_v20  ;;  %v6733_v50 = vpop.eup %4428  ;;  %v6743_v41 = vadd.f32 1.0, %v4427_v36 }
 0x4cc   :  { %4436 = vrcp.f32 %v6720_v44  ;;  %v2201_v58 = vmul.f32 %v6714_v16, %v2200_v12  ;;  %v6749_v37 = vmul.f32 %v6733_v50, %v6706_v6  ;;  %vm2744_vm6 = vweird.f32 %v6733_v50 }
 0x4cd   :  { %4438 = vrcp.f32 %v6724_v63  ;;  %v2224_v43 = vand.u32 2147483648, %v6743_v41  ;;  %vm6877_vm9 = vmor %vm2743_vm4, %vm2744_vm6  ;;  %vm2218_vm10 = vweird.f32 %v6743_v41  ;;  %vm2233_vm11 = vweird.f32 %v6731_v39 }
 0x4ce   :  { %4440 = vrcp.f32 %v6727_v9  ;;  %v2202_v49 = vadd.f32 %v6714_v16, %v2201_v58  ;;  %v2740_v18 = vsub.f32 1.0, %v6749_v37  ;;  %v2980_v58 = vld [vmem:[#allocation13] sm:$0xff]  ;;  %v2721_v37 = vsel %vm6776_vm14, %v2720_v26, %v2716_v42 }
 0x4cf   :  { %v4431_v51 = vpop.eup %4430  ;;  %4442 = vrcp.f32 %v6731_v39  ;;  %3039 = vmatpush.msrb.mxu0 %v2980_v58  ;;  %v6868_v54 = vor.u32 1.1754944e-38, %v2224_v43  ;;  %v2777_v43 = vand.u32 2147483647, %v6712_v57 }
 0x4d0   :  { %v6752_v2 = vpop.eup %4432  ;;  %4444 = vrcp.f32 %v6736_v33  ;;  %v6764_v24 = vadd.f32 1.0, %v4431_v51  ;;  %v2206_v7 = vsel %vm6801_vm1, %v6714_v16, %v2202_v49 }
 0x4d1   :  { %v6759_v0 = vpop.eup %4434  ;;  %4446 = vrcp.f32 %v6743_v41  ;;  %v6793_v52 = vmul.f32 %v6752_v2, %v6712_v57  ;;  %v2211_v40 = vsel %vm2208_vm3, %v2210_v30, %v2206_v7  ;;  %vm6901_vm15 = vcmp.eq.f32.partialorder %v2777_v43, 8.507059e+37 }
 0x4d2   :  { %v2078_v19 = vpop.f32.mrf.mxu3  ;;  %v6766_v34 = vpop.f32.mrf.mxu2  ;;  %v6797_v12 = vmul.f32 %v6759_v0, %v6716_v20  ;;  %4448 = vrcp.f32 %v6764_v24  ;;  %v2948_v3 = vadd.f32 %v2721_v37, %v2211_v40  ;;  %v2117_v40 = vadd.f32 %v6718_v23, %v6694_v56 }
 0x4d3   :  { %v6768_v8 = vpop.eup %4436  ;;  %v2079_v46 = vadd.f32 %v2078_v19, %v6685_v59  ;;  %v2770_v49 = vsub.f32 1.0, %v6793_v52  ;;  %v2741_v52 = vmul.f32 %v6733_v50, %v2740_v18  ;;  %vm2774_vm3 = vweird.f32 %v6752_v2 }
 0x4d4   :  { %v6782_v38 = vpop.eup %4438  ;;  %v6815_v51 = vmul.f32 %v6768_v8, %v6720_v44  ;;  %v2964_v60 = vmul.f32 %v2948_v3, %v6539_v4  ;;  %v4145_v42 = vmul.f32 -1.442695, %v2117_v40  ;;  %vm2263_vm4 = vweird.f32 %v6764_v24  ;;  %vm6930_vm6 = vmor %vm2773_vm7, %vm2774_vm3 }
 0x4d5   :  { %v6789_v25 = vpop.eup %4440  ;;  %v4146_v47 = vmul.f32 -1.442695, %v2079_v46  ;;  %v6821_v10 = vmul.f32 %v6782_v38, %v6724_v63  ;;  %v2749_v46 = vand.u32 2147483648, %v6706_v6  ;;  %v2771_v27 = vmul.f32 %v6752_v2, %v2770_v49 }
 0x4d6   :  { %v6805_v61 = vpop.eup %4442  ;;  %v6825_v16 = vmul.f32 %v6789_v25, %v6727_v9  ;;  %3040 = vmatmul.f32.vlgmr.msrb.gmra.mxu0 %v2964_v60  ;;  %v2742_v60 = vadd.f32 %v6733_v50, %v2741_v52  ;;  %v2237_v52 = vand.u32 2147483647, %v6731_v39  ;;  %vm2833_vm3 = vweird.f32 %v6720_v44 }
 0x4d7   :  { %v6811_v28 = vpop.eup %4444  ;;  %4450 = vpow2.f32 %v4146_v47  ;;  %v2229_v22 = vmul.f32 %v6805_v61, %v6731_v39  ;;  %v2222_v47 = vand.u32 2147483647, %v6743_v41  ;;  %vm2234_vm8 = vweird.f32 %v6805_v61 }
 0x4d8   :  { %v6827_v32 = vpop.eup %4446  ;;  %4452 = vpow2.f32 %v4143_v11  ;;  %v6845_v4 = vmul.f32 %v6811_v28, %v6736_v33  ;;  %v2750_v11 = vor.u32 1.1754944e-38, %v2749_v46  ;;  %v2746_v23 = vsel %vm6877_vm9, %v6733_v50, %v2742_v60  ;;  %vm2235_vm12 = vmor %vm2233_vm11, %vm2234_vm8 }
 0x4d9   :  { %v6839_v30 = vpop.eup %4448  ;;  %v2214_v13 = vmul.f32 %v6827_v32, %v6743_v41  ;;  %v2230_v18 = vsub.f32 1.0, %v2229_v22  ;;  %vm2238_vm13 = vcmp.eq.f32.partialorder %v2237_v52, 8.507059e+37  ;;  %vm2219_vm14 = vweird.f32 %v6827_v32 }
 0x4da   :  { %v2081_v19 = vpop.f32.mrf.mxu3  ;;  %v6849_v58 = vpop.f32.mrf.mxu2  ;;  %vm6905_vm1 = vcmp.eq.f32.partialorder %v2222_v47, 8.507059e+37  ;;  %v2998_v47 = vld [vmem:[#allocation13 + $0x90] sm:$0xff]  ;;  %vm6944_vm9 = vmor %vm2218_vm10, %vm2219_vm14  ;;  %vm2803_vm10 = vweird.f32 %v6716_v20 }
 0x4db   :  { %v2082_v36 = vadd.f32 %v2081_v19, %v6685_v59  ;;  %v2231_v46 = vmul.f32 %v6805_v61, %v2230_v18  ;;  %v2772_v19 = vadd.f32 %v6752_v2, %v2771_v27  ;;  %3078 = vmatpush.msra.mxu1 %v2998_v47 }
 0x4dd   :  { %v4451_v7 = vpop.eup %4450  ;;  %v4148_v37 = vmul.f32 -1.442695, %v2082_v36  ;;  %v2215_v36 = vsub.f32 1.0, %v2214_v13  ;;  %v2232_v18 = vadd.f32 %v6805_v61, %v2231_v46  ;;  %v2779_v46 = vand.u32 2147483648, %v6712_v57 }
 0x4de   :  { %v6854_v3 = vadd.f32 1.0, %v4451_v7  ;;  %v4453_v22 = vpop.eup %4452  ;;  %v2259_v7 = vmul.f32 %v6839_v30, %v6764_v24  ;;  %v2807_v13 = vand.u32 2147483647, %v6716_v20 }
 0x4df   :  { %4454 = vpow2.f32 %v4148_v37  ;;  %v2239_v37 = vand.u32 2147483648, %v6731_v39  ;;  %v6883_v40 = vadd.f32 1.0, %v4453_v22  ;;  %v2216_v6 = vmul.f32 %v6827_v32, %v2215_v36 }
 0x4e0   :  { %4456 = vrcp.f32 %v6854_v3  ;;  %v2260_v26 = vsub.f32 1.0, %v2259_v7  ;;  %v2236_v22 = vsel %vm2235_vm12, %v6805_v61, %v2232_v18  ;;  %v2751_v36 = vsel %vm6857_vm5, %v2750_v11, %v2746_v23 }
 0x4e1   :  { %v2240_v53 = vor.u32 1.1754944e-38, %v2239_v37  ;;  %4458 = vpow2.f32 %v4145_v42  ;;  %v2120_v42 = vadd.f32 %v6766_v34, %v6694_v56  ;;  %vm2264_vm5 = vweird.f32 %v6839_v30 }
 0x4e2   :  { %4460 = vrcp.f32 %v6883_v40  ;;  %v2261_v11 = vmul.f32 %v6839_v30, %v2260_v26  ;;  %vm6934_vm8 = vmor %vm2263_vm4, %vm2264_vm5  ;;  %vm6979_vm11 = vcmp.eq.f32.partialorder %v2807_v13, 8.507059e+37  ;;  %vm2804_vm12 = vweird.f32 %v6759_v0 }
 0x4e3   :  { %v2241_v60 = vsel %vm2238_vm13, %v2240_v53, %v2236_v22  ;;  %v2217_v53 = vadd.f32 %v6827_v32, %v2216_v6  ;;  %v4147_v26 = vmul.f32 -1.442695, %v2120_v42  ;;  %v2269_v22 = vand.u32 2147483648, %v6764_v24 }
 0x4e4   :  { %v2950_v52 = vadd.f32 %v2751_v36, %v2241_v60  ;;  %v2262_v18 = vadd.f32 %v6839_v30, %v2261_v11  ;;  %v2776_v36 = vsel %vm6930_vm6, %v6752_v2, %v2772_v19  ;;  %v7966_v42 = vsub.f32 1.0, %v6797_v12 }
 0x4e5   :  { %v4455_v48 = vpop.eup %4454  ;;  %v2221_v41 = vsel %vm6944_vm9, %v6827_v32, %v2217_v53  ;;  %v2123_v2 = vadd.f32 %v6849_v58, %v6694_v56  ;;  %vm2293_vm14 = vweird.f32 %v6854_v3  ;;  %vm2834_vm5 = vweird.f32 %v6768_v8 }
 0x4e6   :  { %v6894_v1 = vpop.eup %4456  ;;  %v2084_v39 = vpop.f32.mrf.mxu3  ;;  %v6919_v37 = vadd.f32 1.0, %v4455_v48  ;;  %v2966_v43 = vmul.f32 %v2950_v52, %v6548_v31  ;;  %v2267_v31 = vand.u32 2147483647, %v6764_v24  ;;  %v2266_v60 = vsel %vm6934_vm8, %v6839_v30, %v2262_v18  ;;  %vm7069_vm8 = vmor %vm2833_vm3, %vm2834_vm5 }
 0x4e7   :  { %v6897_v50 = vpop.f32.mrf.mxu2  ;;  %v2085_v7 = vadd.f32 %v2084_v39, %v6685_v59  ;;  %v2289_v23 = vmul.f32 %v6894_v1, %v6854_v3  ;;  %v4459_v48 = vpop.eup %4458  ;;  %v2780_v39 = vor.u32 1.1754944e-38, %v2779_v46  ;;  %v2809_v24 = vand.u32 2147483648, %v6716_v20 }
 0x4e8   :  { %3043 = vmatmul.f32.gmra.mxu0 %v2966_v43  ;;  %v2270_v46 = vor.u32 1.1754944e-38, %v2269_v22  ;;  %v6962_v52 = vpop.eup %4460  ;;  %v6964_v30 = vadd.f32 1.0, %v4459_v48  ;;  %vm2268_vm7 = vcmp.eq.f32.partialorder %v2267_v31, 8.507059e+37  ;;  %vm2294_vm13 = vweird.f32 %v6894_v1 }
 0x4e9   :  { %v4150_v34 = vmul.f32 -1.442695, %v2085_v7  ;;  %v2801_v7 = vmul.f32 %v6759_v0, %v7966_v42  ;;  %v2290_v11 = vsub.f32 1.0, %v2289_v23  ;;  %v2781_v12 = vsel %vm6901_vm15, %v2780_v39, %v2776_v36  ;;  %vm7004_vm15 = vmor %vm2803_vm10, %vm2804_vm12 }
 0x4ea   :  { %v2271_v53 = vsel %vm2268_vm7, %v2270_v46, %v2266_v60  ;;  %v6985_v43 = vmul.f32 %v6962_v52, %v6883_v40  ;;  %v2810_v6 = vor.u32 1.1754944e-38, %v2809_v24  ;;  %v2297_v22 = vand.u32 2147483647, %v6854_v3 }
 0x4eb   :  { %4462 = vpow2.f32 %v4150_v34  ;;  %v6976_v34 = vsel %vm6905_vm1, %v6868_v54, %v2221_v41  ;;  %v2952_v23 = vadd.f32 %v2781_v12, %v2271_v53  ;;  %v2802_v49 = vadd.f32 %v6759_v0, %v2801_v7  ;;  %vm7011_vm1 = vmor %vm2293_vm14, %vm2294_vm13 }
 0x4ec   :  { %4464 = vrcp.f32 %v6919_v37  ;;  %v4149_v54 = vmul.f32 -1.442695, %v2123_v2  ;;  %v2291_v13 = vmul.f32 %v6894_v1, %v2290_v11  ;;  %v2837_v39 = vand.u32 2147483647, %v6720_v44 }
 0x4ed   :  { %4466 = vpow2.f32 %v4147_v26  ;;  %v2968_v61 = vmul.f32 %v2952_v23, %v6557_v55  ;;  %v2245_v60 = vsub.f32 1.0, %v6985_v43  ;;  %v2299_v24 = vand.u32 2147483648, %v6854_v3 }
 0x4ee   :  { %v2087_v19 = vpop.f32.mrf.mxu3  ;;  %4468 = vrcp.f32 %v6964_v30  ;;  %v2292_v31 = vadd.f32 %v6894_v1, %v2291_v13  ;;  %v2806_v20 = vsel %vm7004_vm15, %v6759_v0, %v2802_v49  ;;  %v7973_v11 = vsub.f32 1.0, %v6815_v51 }
 0x4ef   :  { %v6968_v47 = vpop.f32.mrf.mxu2  ;;  %v2088_v32 = vadd.f32 %v2087_v19, %v6685_v59  ;;  %v2300_v19 = vor.u32 1.1754944e-38, %v2299_v24  ;;  %v2839_v0 = vand.u32 2147483648, %v6720_v44  ;;  %vm2298_vm4 = vcmp.eq.f32.partialorder %v2297_v22, 8.507059e+37 }
 0x4f0   :  { %3046 = vmatmul.f32.gmra.mxu0 %v2968_v61  ;;  %v2296_v7 = vsel %vm7011_vm1, %v6894_v1, %v2292_v31  ;;  %v2831_v2 = vmul.f32 %v6768_v8, %v7973_v11  ;;  %v2811_v12 = vsel %vm6979_vm11, %v2810_v6, %v2806_v20  ;;  %vm7039_vm6 = vcmp.eq.f32.partialorder %v2837_v39, 8.507059e+37  ;;  %v4660_v31 = vld [vmem:[%s7807_s14 + $0x8] sm:$0xff]  ;;  %v2997_v11 = vld [vmem:[#allocation13 + $0x88] sm:$0xff] }
 0x4f1   :  { %v4152_v18 = vmul.f32 -1.442695, %v2088_v32  ;;  %v4463_v27 = vpop.eup %4462  ;;  %v2301_v23 = vsel %vm2298_vm4, %v2300_v19, %v2296_v7  ;;  %v7055_v22 = vperm.slane %v4660_v31, 7  ;;  %v2867_v55 = vand.u32 2147483647, %v6724_v63  ;;  %3079 = vmatpush.msra.mxu1 %v2997_v11 }
 0x4f2   :  { %v6992_v48 = vpop.eup %4464  ;;  %v6994_v26 = vadd.f32 1.0, %v4463_v27  ;;  %v2869_v27 = vand.u32 2147483648, %v6724_v63  ;;  %v2954_v58 = vadd.f32 %v2811_v12, %v2301_v23  ;;  %v2832_v13 = vadd.f32 %v6768_v8, %v2831_v2  ;;  %v2996_v23 = vld [vmem:[#allocation13 + $0x80] sm:$0xff] }
 0x4f3   :  { %4470 = vpow2.f32 %v4152_v18  ;;  %v4467_v57 = vpop.eup %4466  ;;  %v2319_v41 = vmul.f32 %v6992_v48, %v6919_v37  ;;  %v7976_v18 = vsub.f32 1.0, %v6821_v10  ;;  %v2840_v10 = vor.u32 1.1754944e-38, %v2839_v0  ;;  %3080 = vmatpush.msra.mxu1 %v2996_v23 }
 0x4f4   :  { %4472 = vrcp.f32 %v6994_v26  ;;  %v7032_v32 = vpop.eup %4468  ;;  %v7034_v53 = vadd.f32 1.0, %v4467_v57  ;;  %v2126_v36 = vadd.f32 %v6897_v50, %v6694_v56  ;;  %v2970_v24 = vmul.f32 %v2954_v58, %v6566_v29 }
 0x4f5   :  { %4474 = vpow2.f32 %v4149_v54  ;;  %v2861_v49 = vmul.f32 %v6782_v38, %v7976_v18  ;;  %v2320_v54 = vsub.f32 1.0, %v2319_v41  ;;  %vm2863_vm9 = vweird.f32 %v6724_v63 }
 0x4f6   :  { %v2090_v46 = vpop.f32.mrf.mxu3  ;;  %vm2864_vm7 = vweird.f32 %v6782_v38  ;;  %v2836_v44 = vsel %vm7069_vm8, %v6768_v8, %v2832_v13  ;;  %v2870_v2 = vor.u32 1.1754944e-38, %v2869_v27  ;;  %vm2324_vm10 = vweird.f32 %v6992_v48 }
 0x4f7   :  { %v7021_v42 = vpop.f32.mrf.mxu2  ;;  %v2091_v3 = vadd.f32 %v2090_v46, %v6685_v59  ;;  %v2862_v41 = vadd.f32 %v6782_v38, %v2861_v49  ;;  %v2321_v7 = vmul.f32 %v6992_v48, %v2320_v54  ;;  %v2327_v0 = vand.u32 2147483647, %v6919_v37  ;;  %vm7096_vm13 = vmor %vm2863_vm9, %vm2864_vm7 }
 0x4f8   :  { %3049 = vmatmul.f32.gmra.mxu0 %v2970_v24  ;;  %vm7085_vm11 = vcmp.eq.f32.partialorder %v2867_v55, 8.507059e+37  ;;  %vm2323_vm12 = vweird.f32 %v6919_v37  ;;  %v2329_v8 = vand.u32 2147483648, %v6919_v37  ;;  %v2841_v54 = vsel %vm7039_vm6, %v2840_v10, %v2836_v44 }
 0x4f9   :  { %v4471_v59 = vpop.eup %4470  ;;  %v4154_v51 = vmul.f32 -1.442695, %v2091_v3  ;;  %vm7100_vm14 = vmor %vm2323_vm12, %vm2324_vm10  ;;  %v2866_v37 = vsel %vm7096_vm13, %v6782_v38, %v2862_v41  ;;  %vm2328_vm15 = vcmp.eq.f32.partialorder %v2327_v0, 8.507059e+37  ;;  %vm2353_vm3 = vweird.f32 %v6994_v26 }
 0x4fa   :  { %v7047_v61 = vadd.f32 1.0, %v4471_v59  ;;  %v7050_v6 = vpop.eup %4472  ;;  %v4151_v59 = vmul.f32 -1.442695, %v2126_v36  ;;  %v2330_v55 = vor.u32 1.1754944e-38, %v2329_v8  ;;  %v7985_v36 = vsub.f32 1.0, %v6825_v16 }
 0x4fb   :  { %4476 = vpow2.f32 %v4154_v51  ;;  %v4475_v39 = vpop.eup %4474  ;;  %v2349_v57 = vmul.f32 %v7050_v6, %v6994_v26  ;;  %v2322_v51 = vadd.f32 %v6992_v48, %v2321_v7  ;;  %vm2354_vm1 = vweird.f32 %v7050_v6 }
 0x4fc   :  { %4478 = vrcp.f32 %v7047_v61  ;;  %v7080_v3 = vadd.f32 1.0, %v4475_v39  ;;  %v2357_v41 = vand.u32 2147483647, %v6994_v26  ;;  %vm7129_vm4 = vmor %vm2353_vm3, %vm2354_vm1  ;;  %v2359_v7 = vand.u32 2147483648, %v6994_v26 }
 0x4fd   :  { %4480 = vrcp.f32 %v7034_v53  ;;  %v2350_v50 = vsub.f32 1.0, %v2349_v57  ;;  %v2326_v31 = vsel %vm7100_vm14, %v6992_v48, %v2322_v51  ;;  %v2891_v48 = vmul.f32 %v6789_v25, %v7985_v36 }
 0x4fe   :  { %v2579_v46 = vpop.f32.mrf.mxu3  ;;  %v2331_v38 = vsel %vm2328_vm15, %v2330_v55, %v2326_v31  ;;  %vm2893_vm5 = vweird.f32 %v6727_v9  ;;  %vm2894_vm6 = vweird.f32 %v6789_v25  ;;  %v2360_v0 = vor.u32 1.1754944e-38, %v2359_v7 }
 0x4ff   :  { %v2620_v29 = vpop.f32.mrf.mxu2  ;;  %v2580_v19 = vadd.f32 %v2579_v46, %v7055_v22  ;;  %v2351_v58 = vmul.f32 %v7050_v6, %v2350_v50  ;;  %v2956_v20 = vadd.f32 %v2841_v54, %v2331_v38  ;;  %v2892_v26 = vadd.f32 %v6789_v25, %v2891_v48  ;;  %vm7160_vm10 = vmor %vm2893_vm5, %vm2894_vm6 }
 0x500   :  { %v2899_v51 = vand.u32 2147483648, %v6727_v9  ;;  %vm2358_vm8 = vcmp.eq.f32.partialorder %v2357_v41, 8.507059e+37  ;;  %vm2383_vm7 = vweird.f32 %v7047_v61  ;;  %v2387_v12 = vand.u32 2147483647, %v7047_v61 }
 0x501   :  { %v4477_v18 = vpop.eup %4476  ;;  %v2621_v49 = vadd.f32 %v2620_v29, %v2580_v19  ;;  %v2352_v57 = vadd.f32 %v7050_v6, %v2351_v58  ;;  %v2972_v16 = vmul.f32 %v2956_v20, %v6575_v5  ;;  %v2897_v19 = vand.u32 2147483647, %v6727_v9 }
 0x502   :  { %v7110_v63 = vpop.eup %4478  ;;  %v7112_v13 = vadd.f32 1.0, %v4477_v18  ;;  %v7992_v9 = vsub.f32 1.0, %v6845_v4  ;;  %v7184_v20 = vmul.f32 %v7032_v32, %v6964_v30  ;;  %vm2388_vm12 = vcmp.eq.f32.partialorder %v2387_v12, 8.507059e+37 }
 0x503   :  { %v7117_v39 = vpop.eup %4480  ;;  %v2379_v1 = vmul.f32 %v7110_v63, %v7047_v61  ;;  %v4173_v10 = vmul.f32 -1.442695, %v2621_v49  ;;  %v2356_v11 = vsel %vm7129_vm4, %v7050_v6, %v2352_v57  ;;  %3052 = vmatmul.f32.gmra.mxu0 %v2972_v16  ;;  %vm2384_vm9 = vweird.f32 %v7110_v63 }
 0x504   :  { %4482 = vrcp.f32 %v7112_v13  ;;  %v2361_v6 = vsel %vm2358_vm8, %v2360_v0, %v2356_v11  ;;  %v2896_v57 = vsel %vm7160_vm10, %v6789_v25, %v2892_v26  ;;  %v2921_v38 = vmul.f32 %v6811_v28, %v7992_v9 }
 0x505   :  { %v2380_v24 = vsub.f32 1.0, %v2379_v1  ;;  %4484 = vpow2.f32 %v4173_v10  ;;  %v2900_v4 = vor.u32 1.1754944e-38, %v2899_v51  ;;  %vm2898_vm13 = vcmp.eq.f32.partialorder %v2897_v19, 8.507059e+37 }
 0x506   :  { %4486 = vpow2.f32 %v4151_v59  ;;  %v2582_v50 = vpop.f32.mrf.mxu3  ;;  %v2871_v59 = vsel %vm7085_vm11, %v2870_v2, %v2866_v37  ;;  %v2389_v2 = vand.u32 2147483648, %v7047_v61  ;;  %vm7168_vm11 = vmor %vm2383_vm7, %vm2384_vm9  ;;  %v2922_v29 = vadd.f32 %v6811_v28, %v2921_v38 }
 0x507   :  { %v2623_v46 = vpop.f32.mrf.mxu2  ;;  %v2583_v44 = vadd.f32 %v2582_v50, %v7055_v22  ;;  %v2381_v5 = vmul.f32 %v7110_v63, %v2380_v24  ;;  %v2958_v58 = vadd.f32 %v2871_v59, %v2361_v6  ;;  %vm2924_vm14 = vweird.f32 %v6811_v28 }
 0x508   :  { %v2390_v10 = vor.u32 1.1754944e-38, %v2389_v2  ;;  %vm2923_vm15 = vweird.f32 %v6736_v33  ;;  %vm2413_vm1 = vweird.f32 %v7112_v13  ;;  %v2927_v11 = vand.u32 2147483647, %v6736_v33 }
 0x509   :  { %v2624_v8 = vadd.f32 %v2623_v46, %v2583_v44  ;;  %v2382_v37 = vadd.f32 %v7110_v63, %v2381_v5  ;;  %v2974_v48 = vmul.f32 %v2958_v58, %v6584_v21  ;;  %v2129_v21 = vadd.f32 %v6968_v47, %v6694_v56  ;;  %vm7204_vm4 = vmor %vm2923_vm15, %vm2924_vm14 }
 0x50a   :  { %v7148_v18 = vpop.eup %4482  ;;  %v2929_v47 = vand.u32 2147483648, %v6736_v33  ;;  %v2417_v26 = vand.u32 2147483647, %v7112_v13  ;;  %v2419_v51 = vand.u32 2147483648, %v7112_v13  ;;  %v2132_v58 = vadd.f32 %v7021_v42, %v6694_v56 }
 0x50b   :  { %v4485_v49 = vpop.eup %4484  ;;  %v2409_v27 = vmul.f32 %v7148_v18, %v7112_v13  ;;  %v4175_v54 = vmul.f32 -1.442695, %v2624_v8  ;;  %v2386_v24 = vsel %vm7168_vm11, %v7110_v63, %v2382_v37  ;;  %v2901_v63 = vsel %vm2898_vm13, %v2900_v4, %v2896_v57  ;;  %3055 = vmatmul.f32.gmra.mxu0 %v2974_v48 }
 0x50c   :  { %v4487_v55 = vpop.eup %4486  ;;  %v7164_v1 = vadd.f32 1.0, %v4485_v49  ;;  %v2391_v46 = vsel %vm2388_vm12, %v2390_v10, %v2386_v24  ;;  %vm2414_vm3 = vweird.f32 %v7148_v18  ;;  %v4153_v6 = vmul.f32 -1.442695, %v2129_v21 }
 0x50d   :  { %v2410_v36 = vsub.f32 1.0, %v2409_v27  ;;  %4488 = vpow2.f32 %v4175_v54  ;;  %v2960_v16 = vadd.f32 %v2901_v63, %v2391_v46  ;;  %v7208_v23 = vadd.f32 1.0, %v4487_v55  ;;  %vm7212_vm5 = vmor %vm2413_vm1, %vm2414_vm3 }
 0x50e   :  { %4490 = vrcp.f32 %v7164_v1  ;;  %v2585_v41 = vpop.f32.mrf.mxu3  ;;  %v2926_v13 = vsel %vm7204_vm4, %v6811_v28, %v2922_v29  ;;  %v2420_v55 = vor.u32 1.1754944e-38, %v2419_v51  ;;  %v2930_v28 = vor.u32 1.1754944e-38, %v2929_v47 }
 0x50f   :  { %v2626_v25 = vpop.f32.mrf.mxu2  ;;  %4492 = vrcp.f32 %v7080_v3  ;;  %v2586_v50 = vadd.f32 %v2585_v41, %v7055_v22  ;;  %v2411_v44 = vmul.f32 %v7148_v18, %v2410_v36  ;;  %v2976_v27 = vmul.f32 %v2960_v16, %v6595_v62 }
 0x510   :  { %vm2418_vm6 = vcmp.eq.f32.partialorder %v2417_v26, 8.507059e+37  ;;  %vm2928_vm8 = vcmp.eq.f32.partialorder %v2927_v11, 8.507059e+37  ;;  %v2732_v62 = vand.u32 2147483647, %v7164_v1  ;;  %v2734_v57 = vand.u32 2147483648, %v7164_v1 }
 0x511   :  { %v2627_v7 = vadd.f32 %v2626_v25, %v2586_v50  ;;  %v2412_v59 = vadd.f32 %v7148_v18, %v2411_v44  ;;  %vm2248_vm9 = vweird.f32 %v6883_v40  ;;  %v2246_v36 = vmul.f32 %v6962_v52, %v2245_v60 }
 0x512   :  { %v2275_v48 = vsub.f32 1.0, %v7184_v20  ;;  %v2304_v24 = vmul.f32 %v7117_v39, %v7034_v53  ;;  %vm2728_vm10 = vweird.f32 %v7164_v1  ;;  %v4155_v46 = vmul.f32 -1.442695, %v2132_v58 }
 0x513   :  { %v4489_v19 = vpop.eup %4488  ;;  %v4177_v0 = vmul.f32 -1.442695, %v2627_v7  ;;  %v2416_v54 = vsel %vm7212_vm5, %v7148_v18, %v2412_v59  ;;  %v2931_v18 = vsel %vm2928_vm8, %v2930_v28, %v2926_v13  ;;  %3058 = vmatmul.f32.gmra.mxu0 %v2976_v27  ;;  %vm2733_vm12 = vcmp.eq.f32.partialorder %v2732_v62, 8.507059e+37 }
 0x514   :  { %v4491_v5 = vpop.eup %4490  ;;  %v7210_v12 = vadd.f32 1.0, %v4489_v19  ;;  %v2421_v9 = vsel %vm2418_vm6, %v2420_v55, %v2416_v54  ;;  %v2735_v43 = vor.u32 1.1754944e-38, %v2734_v57  ;;  %v2305_v29 = vsub.f32 1.0, %v2304_v24 }
 0x515   :  { %v7219_v2 = vpop.eup %4492  ;;  %v2724_v49 = vmul.f32 %v4491_v5, %v7164_v1  ;;  %4494 = vpow2.f32 %v4177_v0  ;;  %vm2729_vm7 = vweird.f32 %v4491_v5  ;;  %v2962_v38 = vadd.f32 %v2931_v18, %v2421_v9 }
 0x516   :  { %4496 = vrcp.f32 %v7210_v12  ;;  %v2588_v37 = vpop.f32.mrf.mxu3  ;;  %vm2730_vm11 = vmor %vm2728_vm10, %vm2729_vm7  ;;  %vm2249_vm13 = vweird.f32 %v6962_v52  ;;  %v2247_v19 = vadd.f32 %v6962_v52, %v2246_v36  ;;  %v2276_v59 = vmul.f32 %v7032_v32, %v2275_v48 }
 0x517   :  { %v2629_v31 = vpop.f32.mrf.mxu2  ;;  %v2725_v61 = vsub.f32 1.0, %v2724_v49  ;;  %v2589_v10 = vadd.f32 %v2588_v37, %v7055_v22  ;;  %4498 = vpow2.f32 %v4153_v6  ;;  %v2978_v63 = vmul.f32 %v2962_v38, %v6604_v45  ;;  %vm7269_vm1 = vmor %vm2248_vm9, %vm2249_vm13 }
 0x518   :  { %4500 = vrcp.f32 %v7208_v23  ;;  %v2252_v45 = vand.u32 2147483647, %v6883_v40  ;;  %v2254_v26 = vand.u32 2147483648, %v6883_v40  ;;  %vm2278_vm14 = vweird.f32 %v6964_v30 }
 0x519   :  { %v2726_v56 = vmul.f32 %v4491_v5, %v2725_v61  ;;  %v2630_v42 = vadd.f32 %v2629_v31, %v2589_v10  ;;  %v7263_v33 = vmul.f32 %v7219_v2, %v7080_v3  ;;  %v2762_v49 = vand.u32 2147483647, %v7210_v12 }
 0x51a   :  { %vm2758_vm3 = vweird.f32 %v7210_v12  ;;  %v2251_v58 = vsel %vm7269_vm1, %v6962_v52, %v2247_v19  ;;  %vm2253_vm4 = vcmp.eq.f32.partialorder %v2252_v45, 8.507059e+37  ;;  %v2255_v55 = vor.u32 1.1754944e-38, %v2254_v26 }
 0x51b   :  { %v4495_v41 = vpop.eup %4494  ;;  %v2727_v25 = vadd.f32 %v4491_v5, %v2726_v56  ;;  %v4179_v4 = vmul.f32 -1.442695, %v2630_v42  ;;  %3061 = vmatmul.f32.gmra.mxu0 %v2978_v63  ;;  %vm2763_vm6 = vcmp.eq.f32.partialorder %v2762_v49, 8.507059e+37  ;;  %vm2279_vm8 = vweird.f32 %v7032_v32 }
 0x51c   :  { %v4497_v50 = vpop.eup %4496  ;;  %v7242_v60 = vadd.f32 1.0, %v4495_v41  ;;  %v2256_v52 = vsel %vm2253_vm4, %v2255_v55, %v2251_v58  ;;  %v2277_v38 = vadd.f32 %v7032_v32, %v2276_v59  ;;  %v2335_v36 = vsub.f32 1.0, %v7263_v33  ;;  %vm7305_vm10 = vmor %vm2278_vm14, %vm2279_vm8 }
 0x51d   :  { %v2731_v20 = vsel %vm2730_vm11, %v4491_v5, %v2727_v25  ;;  %v2754_v21 = vmul.f32 %v4497_v50, %v7210_v12  ;;  %4502 = vpow2.f32 %v4179_v4  ;;  %v4499_v0 = vpop.eup %4498  ;;  %vm2759_vm15 = vweird.f32 %v4497_v50 }
 0x51e   :  { %v2736_v7 = vsel %vm2733_vm12, %v2735_v43, %v2731_v20  ;;  %4504 = vrcp.f32 %v7242_v60  ;;  %v2591_v1 = vpop.f32.mrf.mxu3  ;;  %v7254_v51 = vpop.eup %4500  ;;  %vm2760_vm5 = vmor %vm2758_vm3, %vm2759_vm15  ;;  %v7289_v48 = vadd.f32 1.0, %v4499_v0  ;;  %v2282_v24 = vand.u32 2147483647, %v6964_v30 }
 0x51f   :  { %v2632_v16 = vpop.f32.mrf.mxu2  ;;  %v2755_v44 = vsub.f32 1.0, %v2754_v21  ;;  %v2592_v11 = vadd.f32 %v2591_v1, %v7055_v22  ;;  %v2949_v47 = vadd.f32 %v2736_v7, %v6976_v34  ;;  %4506 = vpow2.f32 %v4155_v46 }
 0x520   :  { %v7259_v34 = vmul.f32 %v7117_v39, %v2305_v29  ;;  %v2284_v41 = vand.u32 2147483648, %v6964_v30  ;;  %vm2308_vm9 = vweird.f32 %v7034_v53  ;;  %v7297_v46 = vmul.f32 %v7254_v51, %v7208_v23 }
 0x521   :  { %v2756_v8 = vmul.f32 %v4497_v50, %v2755_v44  ;;  %v2633_v5 = vadd.f32 %v2632_v16, %v2592_v11  ;;  %v2965_v6 = vmul.f32 %v2949_v47, %v6541_v17  ;;  %v2764_v17 = vand.u32 2147483648, %v7210_v12 }
 0x522   :  { %v2792_v21 = vand.u32 2147483647, %v7242_v60  ;;  %v2794_v63 = vand.u32 2147483648, %v7242_v60  ;;  %vm2788_vm11 = vweird.f32 %v7242_v60  ;;  %v2281_v7 = vsel %vm7305_vm10, %v7032_v32, %v2277_v38 }
 0x523   :  { %v4503_v27 = vpop.eup %4502  ;;  %v4181_v54 = vmul.f32 -1.442695, %v2633_v5  ;;  %4188 = vmatmul.msk.f32.vlgmr.msra.gmra.mxu1 %vm356_vm2, %v2965_v6  ;;  %v2757_v37 = vadd.f32 %v4497_v50, %v2756_v8  ;;  %v2765_v28 = vor.u32 1.1754944e-38, %v2764_v17  ;;  %vm2283_vm12 = vcmp.eq.f32.partialorder %v2282_v24, 8.507059e+37 }
 0x524   :  { %v4505_v40 = vpop.eup %4504  ;;  %v7280_v31 = vadd.f32 1.0, %v4503_v27  ;;  %v2285_v44 = vor.u32 1.1754944e-38, %v2284_v41  ;;  %v2795_v11 = vor.u32 1.1754944e-38, %v2794_v63  ;;  %vm2793_vm14 = vcmp.eq.f32.partialorder %v2792_v21, 8.507059e+37 }
 0x525   :  { %v2784_v61 = vmul.f32 %v4505_v40, %v7242_v60  ;;  %4508 = vpow2.f32 %v4181_v54  ;;  %v2761_v12 = vsel %vm2760_vm5, %v4497_v50, %v2757_v37  ;;  %v4507_v10 = vpop.eup %4506  ;;  %vm2789_vm7 = vweird.f32 %v4505_v40 }
 0x526   :  { %4510 = vrcp.f32 %v7280_v31  ;;  %v2594_v62 = vpop.f32.mrf.mxu3  ;;  %v2766_v9 = vsel %vm2763_vm6, %v2765_v28, %v2761_v12  ;;  %v7299_v43 = vadd.f32 1.0, %v4507_v10  ;;  %vm2790_vm13 = vmor %vm2788_vm11, %vm2789_vm7  ;;  %v2286_v59 = vsel %vm2283_vm12, %v2285_v44, %v2281_v7 }
 0x527   :  { %v2635_v57 = vpop.f32.mrf.mxu2  ;;  %v2785_v18 = vsub.f32 1.0, %v2784_v61  ;;  %v2595_v56 = vadd.f32 %v2594_v62, %v7055_v22  ;;  %v2951_v42 = vadd.f32 %v2766_v9, %v2256_v52  ;;  %vm2309_vm15 = vweird.f32 %v7117_v39 }
 0x528   :  { %v2307_v5 = vadd.f32 %v7117_v39, %v7259_v34  ;;  %v2336_v6 = vmul.f32 %v7219_v2, %v2335_v36  ;;  %v2312_v33 = vand.u32 2147483647, %v7034_v53  ;;  %v2314_v13 = vand.u32 2147483648, %v7034_v53  ;;  %vm7337_vm4 = vmor %vm2308_vm9, %vm2309_vm15 }
 0x529   :  { %v2786_v25 = vmul.f32 %v4505_v40, %v2785_v18  ;;  %v2636_v4 = vadd.f32 %v2635_v57, %v2595_v56  ;;  %v2967_v50 = vmul.f32 %v2951_v42, %v6550_v14  ;;  %vm2338_vm1 = vweird.f32 %v7080_v3 }
 0x52a   :  { %v2365_v54 = vsub.f32 1.0, %v7297_v46  ;;  %v2822_v58 = vand.u32 2147483647, %v7280_v31  ;;  %v2824_v37 = vand.u32 2147483648, %v7280_v31  ;;  %vm2818_vm5 = vweird.f32 %v7280_v31 }
 0x52b   :  { %v4509_v14 = vpop.eup %4508  ;;  %v4183_v29 = vmul.f32 -1.442695, %v2636_v4  ;;  %4189 = vmatmul.msk.f32.gmra.mxu1 %vm356_vm2, %v2967_v50  ;;  %v2787_v1 = vadd.f32 %v4505_v40, %v2786_v25  ;;  %v2311_v55 = vsel %vm7337_vm4, %v7117_v39, %v2307_v5  ;;  %vm2313_vm6 = vcmp.eq.f32.partialorder %v2312_v33, 8.507059e+37 }
 0x52c   :  { %v4511_v30 = vpop.eup %4510  ;;  %v7316_v16 = vadd.f32 1.0, %v4509_v14  ;;  %v2315_v12 = vor.u32 1.1754944e-38, %v2314_v13  ;;  %v2825_v10 = vor.u32 1.1754944e-38, %v2824_v37  ;;  %vm2823_vm9 = vcmp.eq.f32.partialorder %v2822_v58, 8.507059e+37 }
 0x52d   :  { %v2814_v47 = vmul.f32 %v4511_v30, %v7280_v31  ;;  %4512 = vpow2.f32 %v4183_v29  ;;  %v2791_v60 = vsel %vm2790_vm13, %v4505_v40, %v2787_v1  ;;  %vm2819_vm3 = vweird.f32 %v4511_v30 }
 0x52e   :  { %4514 = vrcp.f32 %v7316_v16  ;;  %v2597_v19 = vpop.f32.mrf.mxu3  ;;  %v2796_v32 = vsel %vm2793_vm14, %v2795_v11, %v2791_v60  ;;  %vm2820_vm8 = vmor %vm2818_vm5, %vm2819_vm3  ;;  %v2316_v39 = vsel %vm2313_vm6, %v2315_v12, %v2311_v55  ;;  %vm2339_vm7 = vweird.f32 %v7219_v2 }
 0x52f   :  { %v2638_v0 = vpop.f32.mrf.mxu2  ;;  %v2815_v45 = vsub.f32 1.0, %v2814_v47  ;;  %v2598_v26 = vadd.f32 %v2597_v19, %v7055_v22  ;;  %v2953_v8 = vadd.f32 %v2796_v32, %v2286_v59  ;;  %4516 = vrcp.f32 %v7289_v48  ;;  %vm7372_vm11 = vmor %vm2338_vm1, %vm2339_vm7 }
 0x530   :  { %4518 = vrcp.f32 %v7299_v43  ;;  %v2337_v38 = vadd.f32 %v7219_v2, %v2336_v6  ;;  %v2342_v41 = vand.u32 2147483647, %v7080_v3  ;;  %v2344_v25 = vand.u32 2147483648, %v7080_v3  ;;  %v8005_v6 = vld [vmem:[#allocation28_spill] sm:$0xff] }
 0x531   :  { %v2816_v49 = vmul.f32 %v4511_v30, %v2815_v45  ;;  %v2639_v17 = vadd.f32 %v2638_v0, %v2598_v26  ;;  %v2969_v27 = vmul.f32 %v2953_v8, %v6559_v35  ;;  %v2852_v4 = vand.u32 2147483647, %v7316_v16 }
 0x532   :  { %v2854_v50 = vand.u32 2147483648, %v7316_v16  ;;  %vm2848_vm12 = vweird.f32 %v7316_v16  ;;  %vm2343_vm13 = vcmp.eq.f32.partialorder %v2342_v41, 8.507059e+37  ;;  %v2345_v3 = vor.u32 1.1754944e-38, %v2344_v25 }
 0x533   :  { %v4513_v40 = vpop.eup %4512  ;;  %v4185_v35 = vmul.f32 -1.442695, %v2639_v17  ;;  %4190 = vmatmul.msk.f32.gmra.mxu1 %vm356_vm2, %v2969_v27  ;;  %v2817_v28 = vadd.f32 %v4511_v30, %v2816_v49  ;;  %vm2853_vm15 = vcmp.eq.f32.partialorder %v2852_v4, 8.507059e+37  ;;  %vm2369_vm1 = vweird.f32 %v7254_v51 }
 0x534   :  { %v4515_v53 = vpop.eup %4514  ;;  %v7348_v61 = vadd.f32 1.0, %v4513_v40  ;;  %v2855_v11 = vor.u32 1.1754944e-38, %v2854_v50  ;;  %vm2368_vm3 = vweird.f32 %v7208_v23  ;;  %v2372_v45 = vand.u32 2147483647, %v7208_v23 }
 0x535   :  { %v2844_v62 = vmul.f32 %v4515_v53, %v7316_v16  ;;  %4520 = vpow2.f32 %v4185_v35  ;;  %v2821_v31 = vsel %vm2820_vm8, %v4511_v30, %v2817_v28  ;;  %v7352_v57 = vpop.eup %4516  ;;  %vm2849_vm10 = vweird.f32 %v4515_v53  ;;  %vm7395_vm5 = vmor %vm2368_vm3, %vm2369_vm1 }
 0x536   :  { %4522 = vrcp.f32 %v7348_v61  ;;  %v2600_v52 = vpop.f32.mrf.mxu3  ;;  %v2826_v9 = vsel %vm2823_vm9, %v2825_v10, %v2821_v31  ;;  %v7358_v36 = vpop.eup %4518  ;;  %v2394_v63 = vmul.f32 %v7352_v57, %v7289_v48  ;;  %vm2850_vm14 = vmor %vm2848_vm12, %vm2849_vm10  ;;  %v2374_v26 = vand.u32 2147483648, %v7208_v23 }
 0x537   :  { %v2845_v18 = vsub.f32 1.0, %v2844_v62  ;;  %v2601_v56 = vadd.f32 %v2600_v52, %v7055_v22  ;;  %v2955_v42 = vadd.f32 %v2826_v9, %v2316_v39  ;;  %v2641_v24 = vpop.f32.mrf.mxu2  ;;  %v2366_v22 = vmul.f32 %v7254_v51, %v2365_v54 }
 0x538   :  { %v2395_v16 = vsub.f32 1.0, %v2394_v63  ;;  %v2884_v8 = vand.u32 2147483648, %v7348_v61  ;;  %v2882_v13 = vand.u32 2147483647, %v7348_v61  ;;  %v2424_v49 = vmul.f32 %v7358_v36, %v7299_v43 }
 0x539   :  { %v2846_v46 = vmul.f32 %v4515_v53, %v2845_v18  ;;  %v2642_v20 = vadd.f32 %v2641_v24, %v2601_v56  ;;  %v2971_v21 = vmul.f32 %v2955_v42, %v6568_v15  ;;  %v2341_v15 = vsel %vm7372_vm11, %v7219_v2, %v2337_v38  ;;  %v8008_v18 = vld [vmem:[#allocation32_spill] sm:$0xff] }
 0x53a   :  { %v2346_v19 = vsel %vm2343_vm13, %v2345_v3, %v2341_v15  ;;  %v2367_v32 = vadd.f32 %v7254_v51, %v2366_v22  ;;  %v2396_v54 = vmul.f32 %v7352_v57, %v2395_v16  ;;  %vm2878_vm6 = vweird.f32 %v7348_v61 }
 0x53b   :  { %v4521_v29 = vpop.eup %4520  ;;  %v4187_v7 = vmul.f32 -1.442695, %v2642_v20  ;;  %4191 = vmatmul.msk.f32.gmra.mxu1 %vm356_vm2, %v2971_v21  ;;  %v2847_v1 = vadd.f32 %v4515_v53, %v2846_v46  ;;  %v2375_v40 = vor.u32 1.1754944e-38, %v2374_v26  ;;  %v2885_v35 = vor.u32 1.1754944e-38, %v2884_v8 }
 0x53c   :  { %v4523_v30 = vpop.eup %4522  ;;  %v7381_v44 = vadd.f32 1.0, %v4521_v29  ;;  %v2371_v23 = vsel %vm7395_vm5, %v7254_v51, %v2367_v32  ;;  %vm2373_vm9 = vcmp.eq.f32.partialorder %v2372_v45, 8.507059e+37  ;;  %vm2883_vm7 = vcmp.eq.f32.partialorder %v2882_v13, 8.507059e+37 }
 0x53d   :  { %v2874_v47 = vmul.f32 %v4523_v30, %v7348_v61  ;;  %4524 = vpow2.f32 %v4187_v7  ;;  %v2851_v60 = vsel %vm2850_vm14, %v4515_v53, %v2847_v1  ;;  %vm2879_vm4 = vweird.f32 %v4523_v30  ;;  %v8009_v1 = vld [vmem:[#allocation30_spill] sm:$0xff] }
 0x53e   :  { %4526 = vrcp.f32 %v7381_v44  ;;  %v2856_v0 = vsel %vm2853_vm15, %v2855_v11, %v2851_v60  ;;  %vm2880_vm8 = vmor %vm2878_vm6, %vm2879_vm4  ;;  %v2425_v53 = vsub.f32 1.0, %v2424_v49  ;;  %v2376_v61 = vsel %vm2373_vm9, %v2375_v40, %v2371_v23  ;;  %v3152_v40 = vld [vmem:[#allocation14 + $0x30] sm:$0xff] }
 0x53f   :  { %v2875_v59 = vsub.f32 1.0, %v2874_v47  ;;  %v2957_v2 = vadd.f32 %v2856_v0, %v2346_v19  ;;  %v2397_v51 = vadd.f32 %v7352_v57, %v2396_v54  ;;  %vm2399_vm10 = vweird.f32 %v7352_v57  ;;  %v3160_v54 = vld [vmem:[#allocation14 + $0x70] sm:$0xff] }
 0x540   :  { %vm2398_vm11 = vweird.f32 %v7289_v48  ;;  %v2402_v31 = vand.u32 2147483647, %v7289_v48  ;;  %v2404_v52 = vand.u32 2147483648, %v7289_v48  ;;  %v2914_v39 = vand.u32 2147483648, %v7381_v44  ;;  %3197 = vmatpush.msrb.mxu3 %v3160_v54 }
 0x541   :  { %v2876_v5 = vmul.f32 %v4523_v30, %v2875_v59  ;;  %v2973_v33 = vmul.f32 %v2957_v2, %v8005_v6  ;;  %v2912_v42 = vand.u32 2147483647, %v7381_v44  ;;  %vm2400_vm13 = vmor %vm2398_vm11, %vm2399_vm10  ;;  %v2426_v38 = vmul.f32 %v7358_v36, %v2425_v53  ;;  %v8010_v59 = vld [vmem:[#allocation24_spill] sm:$0xff] }
 0x542   :  { %vm2908_vm14 = vweird.f32 %v7381_v44  ;;  %v2401_v24 = vsel %vm2400_vm13, %v7352_v57, %v2397_v51  ;;  %v2405_v48 = vor.u32 1.1754944e-38, %v2404_v52  ;;  %v2915_v4 = vor.u32 1.1754944e-38, %v2914_v39 }
 0x543   :  { %v4525_v27 = vpop.eup %4524  ;;  %4192 = vmatmul.msk.f32.gmra.mxu1 %vm356_vm2, %v2973_v33  ;;  %v2877_v34 = vadd.f32 %v4523_v30, %v2876_v5  ;;  %vm2403_vm1 = vcmp.eq.f32.partialorder %v2402_v31, 8.507059e+37  ;;  %vm2913_vm3 = vcmp.eq.f32.partialorder %v2912_v42, 8.507059e+37  ;;  %v2427_v14 = vadd.f32 %v7358_v36, %v2426_v38  ;;  %v3146_v42 = vld [vmem:[#allocation14] sm:$0xff]  ;;  %v3157_v38 = vld [vmem:[#allocation14 + $0x58] sm:$0xff] }
 0x544   :  { %v4527_v58 = vpop.eup %4526  ;;  %v7405_v37 = vadd.f32 1.0, %v4525_v27  ;;  %v2406_v20 = vsel %vm2403_vm1, %v2405_v48, %v2401_v24  ;;  %vm2429_vm4 = vweird.f32 %v7358_v36  ;;  %vm2428_vm5 = vweird.f32 %v7299_v43  ;;  %v3155_v24 = vld [vmem:[#allocation14 + $0x48] sm:$0xff]  ;;  %v3149_v48 = vld [vmem:[#allocation14 + $0x18] sm:$0xff] }
 0x545   :  { %v2904_v55 = vmul.f32 %v4527_v58, %v7381_v44  ;;  %v2881_v28 = vsel %vm2880_vm8, %v4523_v30, %v2877_v34  ;;  %vm2909_vm12 = vweird.f32 %v4527_v58  ;;  %v2432_v57 = vand.u32 2147483647, %v7299_v43  ;;  %vm2430_vm8 = vmor %vm2428_vm5, %vm2429_vm4  ;;  %v3158_v34 = vld [vmem:[#allocation14 + $0x60] sm:$0xff] }
 0x546   :  { %4528 = vrcp.f32 %v7405_v37  ;;  %v2886_v12 = vsel %vm2883_vm7, %v2885_v35, %v2881_v28  ;;  %vm2910_vm15 = vmor %vm2908_vm14, %vm2909_vm12  ;;  %v2434_v29 = vand.u32 2147483648, %v7299_v43  ;;  %v2944_v7 = vand.u32 2147483648, %v7405_v37  ;;  %3198 = vmatpush.msrb.mxu3 %v3158_v34  ;;  %v3150_v28 = vld [vmem:[#allocation14 + $0x20] sm:$0xff] }
 0x547   :  { %v2905_v10 = vsub.f32 1.0, %v2904_v55  ;;  %v2959_v62 = vadd.f32 %v2886_v12, %v2376_v61  ;;  %v2942_v44 = vand.u32 2147483647, %v7405_v37  ;;  %vm2938_vm9 = vweird.f32 %v7405_v37 }
 0x548   :  { %v2431_v3 = vsel %vm2430_vm8, %v7358_v36, %v2427_v14  ;;  %v2435_v47 = vor.u32 1.1754944e-38, %v2434_v29  ;;  %v2945_v60 = vor.u32 1.1754944e-38, %v2944_v7  ;;  %vm2433_vm10 = vcmp.eq.f32.partialorder %v2432_v57, 8.507059e+37 }
 0x549   :  { %v2906_v9 = vmul.f32 %v4527_v58, %v2905_v10  ;;  %v2975_v56 = vmul.f32 %v2959_v62, %v8008_v18  ;;  %vm2943_vm11 = vcmp.eq.f32.partialorder %v2942_v44, 8.507059e+37  ;;  %v3161_v18 = vld [vmem:[#allocation14 + $0x78] sm:$0xff] }
 0x54a   :  { %v2436_v16 = vsel %vm2433_vm10, %v2435_v47, %v2431_v3  ;;  %3238 = vmatpush.msrb.mxu2 %v3161_v18  ;;  %v197_v47 = vld [vmem:[%s7807_s14 + $0x10] sm:$0x7] }
 0x54b   :  { %4193 = vmatmul.msk.f32.gmra.mxu1 %vm356_vm2, %v2975_v56  ;;  %v2907_v41 = vadd.f32 %v4527_v58, %v2906_v9  ;;  %v3148_v9 = vld [vmem:[#allocation14 + $0x10] sm:$0xff]  ;;  %v3159_v56 = vld [vmem:[#allocation14 + $0x68] sm:$0xff] }
 0x54c   :  { %v4529_v25 = vpop.eup %4528  ;;  %3239 = vmatpush.msrb.mxu2 %v3159_v56 }
 0x54d   :  { %v2934_v50 = vmul.f32 %v4529_v25, %v7405_v37  ;;  %v2911_v46 = vsel %vm2910_vm15, %v4527_v58, %v2907_v41  ;;  %vm2939_vm6 = vweird.f32 %v4529_v25  ;;  %v3156_v58 = vld [vmem:[#allocation14 + $0x50] sm:$0xff]  ;;  %v3154_v37 = vld [vmem:[#allocation14 + $0x40] sm:$0xff]  ;;  %v3153_v41 = vld [vmem:[#allocation14 + $0x38] sm:$0xff] }
 0x54e   :  { %v2916_v21 = vsel %vm2913_vm3, %v2915_v4, %v2911_v46  ;;  %vm2940_vm7 = vmor %vm2938_vm9, %vm2939_vm6  ;;  %3199 = vmatpush.msrb.mxu3 %v3156_v58  ;;  %3240 = vmatpush.msrb.mxu2 %v3157_v38  ;;  %v3147_v4 = vld [vmem:[#allocation14 + $0x8] sm:$0xff] }
 0x54f   :  { %v2935_v22 = vsub.f32 1.0, %v2934_v50  ;;  %v2961_v63 = vadd.f32 %v2916_v21, %v2406_v20 }
 0x550   :  { %3200 = vmatpush.msrb.mxu3 %v3154_v37  ;;  %3241 = vmatpush.msrb.mxu2 %v3155_v24 }
 0x551   :  { %v2936_v15 = vmul.f32 %v4529_v25, %v2935_v22  ;;  %v2977_v30 = vmul.f32 %v2961_v63, %v8009_v1 }
 0x552   :  { %3201 = vmatpush.msrb.mxu3 %v3152_v40  ;;  %3242 = vmatpush.msrb.mxu2 %v3153_v41 }
 0x553   :  { %4194 = vmatmul.msk.f32.gmra.mxu1 %vm356_vm2, %v2977_v30  ;;  %v2937_v11 = vadd.f32 %v4529_v25, %v2936_v15  ;;  %v3041_v32 = vpop.f32.mrf.mxu0 }
 0x554   :  { %3202 = vmatpush.msrb.mxu3 %v3150_v28 }
 0x555   :  { %v2941_v43 = vsel %vm2940_vm7, %v4529_v25, %v2937_v11  ;;  %v3151_v25 = vld [vmem:[#allocation14 + $0x28] sm:$0xff] }
 0x556   :  { %v2946_v19 = vsel %vm2943_vm11, %v2945_v60, %v2941_v43  ;;  %3203 = vmatpush.msrb.mxu3 %v3148_v9  ;;  %3243 = vmatpush.msrb.mxu2 %v3151_v25  ;;  %v3162_v60 = vperm.slane %v197_v47, 0 }
 0x557   :  { %v2963_v0 = vadd.f32 %v2946_v19, %v2436_v16 }
 0x558   :  { %3204 = vmatpush.msrb.mxu3 %v3146_v42  ;;  %3244 = vmatpush.msrb.mxu2 %v3149_v48 }
 0x559   :  { %v2979_v2 = vmul.f32 %v2963_v0, %v8010_v59 }
 0x55a   :  { %3245 = vmatpush.msrb.mxu2 %v3147_v4 }
 0x55b   :  { %4195 = vmatmul.msk.f32.gmra.mxu1 %vm356_vm2, %v2979_v2  ;;  %vm3164_vm2 = vcmask 523264  }
 0x565   :  { %v3044_v45 = vpop.f32.mrf.mxu0 }
 0x56d   :  { %v3047_v36 = vpop.f32.mrf.mxu0 }
 0x575   :  { %v3050_v33 = vpop.f32.mrf.mxu0 }
 0x580   :  { %v3053_v23 = vpop.f32.mrf.mxu0 }
 0x588   :  { %v3056_v53 = vpop.f32.mrf.mxu0 }
 0x590   :  { %v3059_v10 = vpop.f32.mrf.mxu0 }
 0x598   :  { %v3062_v31 = vpop.f32.mrf.mxu0 }
 0x5a0   :  { %v3082_v26 = vpop.f32.mrf.mxu1 }
 0x5a1   :  { %v7435_v8 = vadd.f32 %v3082_v26, %v3041_v32 }
 0x5a3   :  { %3114 = vrot.lane.b32.xlu1 %v7435_v8, %s4928_s3 }
 0x5a8   :  { %v3085_v5 = vpop.f32.mrf.mxu1 }
 0x5a9   :  { %v7439_v6 = vadd.f32 %v3085_v5, %v3044_v45 }
 0x5ab   :  { %3116 = vrot.lane.b32.xlu2 %v7439_v6, %s4928_s3 }
 0x5b0   :  { %v3088_v13 = vpop.f32.mrf.mxu1 }
 0x5b1   :  { %v7443_v49 = vadd.f32 %v3088_v13, %v3047_v36 }
 0x5b3   :  { %3118 = vrot.lane.b32.xlu0 %v7443_v49, %s4928_s3 }
 0x5b8   :  { %v3091_v17 = vpop.f32.mrf.mxu1 }
 0x5b9   :  { %v7447_v27 = vadd.f32 %v3091_v17, %v3050_v33 }
 0x5bb   :  { %3120 = vrot.lane.b32.xlu1 %v7447_v27, %s4928_s3 }
 0x5c0   :  { %v3094_v35 = vpop.f32.mrf.mxu1 }
 0x5c1   :  { %v3095_v55 = vadd.f32 %v3094_v35, %v3053_v23 }
 0x5c3   :  { %3122 = vrot.lane.b32.xlu2 %v3095_v55, %s4928_s3 }
 0x5c8   :  { %v3097_v61 = vpop.f32.mrf.mxu1 }
 0x5c9   :  { %v3098_v12 = vadd.f32 %v3097_v61, %v3056_v53 }
 0x5cb   :  { %3124 = vrot.lane.b32.xlu0 %v3098_v12, %s4928_s3 }
 0x5d0   :  { %v3100_v62 = vpop.f32.mrf.mxu1 }
 0x5d1   :  { %v3101_v51 = vadd.f32 %v3100_v62, %v3059_v10 }
 0x5d3   :  { %3126 = vrot.lane.b32.xlu1 %v3101_v51, %s4928_s3 }
 0x5d8   :  { %v3103_v52 = vpop.f32.mrf.mxu1 }
 0x5d9   :  { %v3104_v39 = vadd.f32 %v3103_v52, %v3062_v31 }
 0x5db   :  { %3128 = vrot.lane.b32.xlu2 %v3104_v39, %s4928_s3  ;;  %s3973_s3 = sshll.u32 %s7808_s15, 4  ;;  %s3974_s3 = int_to_ptr.hbm [resolvable:$true] %s3973_s3 }
 0x605   :  { %v3117_v20 = vpop.permute.xlu2 %3116 }
 0x606   :  { %v3139_v21 = vmax.f32 %v7439_v6, %v3117_v20 }
 0x615   :  { %v3115_v50 = vpop.permute.xlu1 %3114 }
 0x616   :  { %v3138_v46 = vmax.f32 %v7435_v8, %v3115_v50 }
 0x618   :  { %4196 = vmatmul.msk.f32.vlgmr.msrb.gmra.mxu3 %vm3164_vm2, %v3138_v46  ;;  %4204 = vmatmul.msk.f32.vlgmr.msrb.gmra.mxu2 %vm3164_vm2, %v3138_v46 }
 0x61d   :  { %v3123_v29 = vpop.permute.xlu2 %3122 }
 0x61e   :  { %v3142_v7 = vmax.f32 %v3095_v55, %v3123_v29 }
 0x620   :  { %4197 = vmatmul.msk.f32.gmra.mxu3 %vm3164_vm2, %v3139_v21  ;;  %4205 = vmatmul.msk.f32.gmra.mxu2 %vm3164_vm2, %v3139_v21 }
 0x625   :  { %v3119_v22 = vpop.permute.xlu0 %3118 }
 0x626   :  { %v3140_v63 = vmax.f32 %v7443_v49, %v3119_v22 }
 0x628   :  { %4198 = vmatmul.msk.f32.gmra.mxu3 %vm3164_vm2, %v3140_v63  ;;  %4206 = vmatmul.msk.f32.gmra.mxu2 %vm3164_vm2, %v3140_v63 }
 0x62d   :  { %v3121_v14 = vpop.permute.xlu1 %3120 }
 0x62e   :  { %v3141_v57 = vmax.f32 %v7447_v27, %v3121_v14 }
 0x630   :  { %4199 = vmatmul.msk.f32.gmra.mxu3 %vm3164_vm2, %v3141_v57  ;;  %4207 = vmatmul.msk.f32.gmra.mxu2 %vm3164_vm2, %v3141_v57 }
 0x635   :  { %v3129_v3 = vpop.permute.xlu2 %3128 }
 0x636   :  { %v3145_v11 = vmax.f32 %v3104_v39, %v3129_v3 }
 0x638   :  { %4200 = vmatmul.msk.f32.gmra.mxu3 %vm3164_vm2, %v3142_v7  ;;  %4208 = vmatmul.msk.f32.gmra.mxu2 %vm3164_vm2, %v3142_v7 }
 0x63d   :  { %v3125_v15 = vpop.permute.xlu0 %3124 }
 0x63e   :  { %v3143_v1 = vmax.f32 %v3098_v12, %v3125_v15 }
 0x640   :  { %4201 = vmatmul.msk.f32.gmra.mxu3 %vm3164_vm2, %v3143_v1  ;;  %4209 = vmatmul.msk.f32.gmra.mxu2 %vm3164_vm2, %v3143_v1 }
 0x645   :  { %v3127_v30 = vpop.permute.xlu1 %3126 }
 0x646   :  { %v3144_v44 = vmax.f32 %v3101_v51, %v3127_v30 }
 0x648   :  { %4202 = vmatmul.msk.f32.gmra.mxu3 %vm3164_vm2, %v3144_v44  ;;  %4210 = vmatmul.msk.f32.gmra.mxu2 %vm3164_vm2, %v3144_v44 }
 0x650   :  { %4203 = vmatmul.msk.f32.gmra.mxu3 %vm3164_vm2, %v3145_v11  ;;  %4211 = vmatmul.msk.f32.gmra.mxu2 %vm3164_vm2, %v3145_v11 }
 0x69b   :  { %v3206_v43 = vpop.f32.mrf.mxu3 }
 0x69c   :  { %v3207_v16 = vadd.f32 %v3206_v43, %v3162_v60 }
 0x69e   :  { %4530 = vtanh.f32 %v3207_v16  ;;  %v4212_v35 = vmul.f32 -1.442695, %v3207_v16 }
 0x6a3   :  { %v3209_v19 = vpop.f32.mrf.mxu3 }
 0x6a4   :  { %v4531_v0 = vpop.eup %4530  ;;  %v3210_v59 = vadd.f32 %v3209_v19, %v3162_v60 }
 0x6a5   :  { %3591 = vrot.lane.b32.xlu0 %v4531_v0, %s4929_s26 }
 0x6a6   :  { %4532 = vtanh.f32 %v3210_v59  ;;  %v4213_v28 = vmul.f32 -1.442695, %v3210_v59 }
 0x6ab   :  { %v3212_v2 = vpop.f32.mrf.mxu3 }
 0x6ac   :  { %v4533_v32 = vpop.eup %4532  ;;  %v3213_v45 = vadd.f32 %v3212_v2, %v3162_v60 }
 0x6ad   :  { %3593 = vrot.lane.b32.xlu1 %v4533_v32, %s4929_s26 }
 0x6ae   :  { %4534 = vtanh.f32 %v3213_v45  ;;  %v4214_v55 = vmul.f32 -1.442695, %v3213_v45 }
 0x6b3   :  { %v3215_v26 = vpop.f32.mrf.mxu3 }
 0x6b4   :  { %v4535_v8 = vpop.eup %4534  ;;  %v3216_v36 = vadd.f32 %v3215_v26, %v3162_v60 }
 0x6b5   :  { %3595 = vrot.lane.b32.xlu2 %v4535_v8, %s4929_s26 }
 0x6b6   :  { %4536 = vtanh.f32 %v3216_v36  ;;  %v4215_v39 = vmul.f32 -1.442695, %v3216_v36 }
 0x6bb   :  { %v3218_v5 = vpop.f32.mrf.mxu3 }
 0x6bc   :  { %v4537_v6 = vpop.eup %4536  ;;  %v3219_v33 = vadd.f32 %v3218_v5, %v3162_v60 }
 0x6bd   :  { %3597 = vrot.lane.b32.xlu0 %v4537_v6, %s4929_s26 }
 0x6be   :  { %4538 = vtanh.f32 %v3219_v33  ;;  %v4216_v25 = vmul.f32 -1.442695, %v3219_v33 }
 0x6c3   :  { %v3221_v13 = vpop.f32.mrf.mxu3 }
 0x6c4   :  { %v4539_v49 = vpop.eup %4538  ;;  %v3222_v17 = vadd.f32 %v3221_v13, %v3162_v60 }
 0x6c5   :  { %3599 = vrot.lane.b32.xlu1 %v4539_v49, %s4929_s26 }
 0x6c6   :  { %4540 = vtanh.f32 %v3222_v17  ;;  %v4217_v10 = vmul.f32 -1.442695, %v3222_v17 }
 0x6cb   :  { %v3224_v27 = vpop.f32.mrf.mxu3 }
 0x6cc   :  { %v4541_v54 = vpop.eup %4540  ;;  %v7483_v23 = vadd.f32 %v3224_v27, %v3162_v60 }
 0x6cd   :  { %3601 = vrot.lane.b32.xlu2 %v4541_v54, %s4929_s26 }
 0x6ce   :  { %4542 = vtanh.f32 %v7483_v23  ;;  %v4218_v36 = vmul.f32 -1.442695, %v7483_v23 }
 0x6d3   :  { %v3227_v34 = vpop.f32.mrf.mxu3 }
 0x6d4   :  { %v4543_v58 = vpop.eup %4542  ;;  %v7487_v37 = vadd.f32 %v3227_v34, %v3162_v60 }
 0x6d5   :  { %3603 = vrot.lane.b32.xlu0 %v4543_v58, %s4929_s26 }
 0x6d6   :  { %4544 = vtanh.f32 %v7487_v37  ;;  %v4219_v23 = vmul.f32 -1.442695, %v7487_v37 }
 0x6d7   :  { %4546 = vpow2.f32 %v4212_v35 }
 0x6d8   :  { %4548 = vpow2.f32 %v4214_v55 }
 0x6d9   :  { %4550 = vpow2.f32 %v4213_v28 }
 0x6dc   :  { %v4545_v40 = vpop.eup %4544 }
 0x6dd   :  { %3605 = vrot.lane.b32.xlu2 %v4545_v40, %s4929_s26  ;;  %v4547_v53 = vpop.eup %4546 }
 0x6de   :  { %v3295_v61 = vadd.f32 1.0, %v4547_v53  ;;  %v4549_v12 = vpop.eup %4548 }
 0x6df   :  { %v4551_v62 = vpop.eup %4550  ;;  %v3297_v51 = vadd.f32 1.0, %v4549_v12 }
 0x6e0   :  { %4552 = vrcp.f32 %v3295_v61  ;;  %v7492_v31 = vadd.f32 1.0, %v4551_v62  ;;  %v3314_v57 = vand.u32 2147483648, %v3295_v61  ;;  %vm3308_vm13 = vweird.f32 %v3295_v61 }
 0x6e1   :  { %4554 = vpow2.f32 %v4217_v10  ;;  %v3312_v29 = vand.u32 2147483647, %v3295_v61  ;;  %v3344_v3 = vand.u32 2147483648, %v3297_v51  ;;  %vm3338_vm3 = vweird.f32 %v3297_v51 }
 0x6e2   :  { %4556 = vrcp.f32 %v3297_v51  ;;  %v3315_v11 = vor.u32 1.1754944e-38, %v3314_v57  ;;  %v3342_v60 = vand.u32 2147483647, %v3297_v51  ;;  %v3329_v8 = vand.u32 2147483648, %v7492_v31 }
 0x6e3   :  { %4558 = vrcp.f32 %v7492_v31  ;;  %vm3313_vm1 = vcmp.eq.f32.partialorder %v3312_v29, 8.507059e+37  ;;  %v3345_v26 = vor.u32 1.1754944e-38, %v3344_v3  ;;  %vm3323_vm6 = vweird.f32 %v7492_v31 }
 0x6e4   :  { %4560 = vpow2.f32 %v4215_v39  ;;  %v3327_v6 = vand.u32 2147483647, %v7492_v31  ;;  %vm3343_vm8 = vcmp.eq.f32.partialorder %v3342_v60, 8.507059e+37  ;;  %v3330_v54 = vor.u32 1.1754944e-38, %v3329_v8 }
 0x6e6   :  { %v4553_v52 = vpop.eup %4552  ;;  %vm3328_vm7 = vcmp.eq.f32.partialorder %v3327_v6, 8.507059e+37 }
 0x6e7   :  { %v4555_v9 = vpop.eup %4554  ;;  %v3304_v18 = vmul.f32 %v4553_v52, %v3295_v61  ;;  %vm3309_vm12 = vweird.f32 %v4553_v52 }
 0x6e8   :  { %v4557_v56 = vpop.eup %4556  ;;  %v7495_v42 = vadd.f32 1.0, %v4555_v9  ;;  %vm3310_vm14 = vmor %vm3308_vm13, %vm3309_vm12 }
 0x6e9   :  { %v3305_v38 = vsub.f32 1.0, %v3304_v18  ;;  %v4559_v24 = vpop.eup %4558  ;;  %v3334_v41 = vmul.f32 %v4557_v56, %v3297_v51  ;;  %vm3339_vm15 = vweird.f32 %v4557_v56 }
 0x6ea   :  { %4562 = vrcp.f32 %v7495_v42  ;;  %v4561_v48 = vpop.eup %4560  ;;  %v3319_v50 = vmul.f32 %v4559_v24, %v7492_v31  ;;  %vm7510_vm4 = vmor %vm3338_vm3, %vm3339_vm15  ;;  %vm3324_vm5 = vweird.f32 %v4559_v24  ;;  %v3389_v61 = vand.u32 2147483648, %v7495_v42 }
 0x6eb   :  { %v3306_v4 = vmul.f32 %v4553_v52, %v3305_v38  ;;  %v3335_v46 = vsub.f32 1.0, %v3334_v41  ;;  %4564 = vpow2.f32 %v4216_v25  ;;  %v7499_v20 = vadd.f32 1.0, %v4561_v48  ;;  %vm3325_vm9 = vmor %vm3323_vm6, %vm3324_vm5 }
 0x6ec   :  { %v3320_v22 = vsub.f32 1.0, %v3319_v50  ;;  %vm3383_vm11 = vweird.f32 %v7495_v42  ;;  %v3387_v37 = vand.u32 2147483647, %v7495_v42  ;;  %v3390_v31 = vor.u32 1.1754944e-38, %v3389_v61  ;;  %v3247_v61 = vpop.f32.mrf.mxu2 }
 0x6ed   :  { %v3307_v21 = vadd.f32 %v4553_v52, %v3306_v4  ;;  %v3336_v14 = vmul.f32 %v4557_v56, %v3335_v46  ;;  %4566 = vrcp.f32 %v7499_v20  ;;  %v3359_v41 = vand.u32 2147483648, %v7499_v20 }
 0x6ee   :  { %v3321_v1 = vmul.f32 %v4559_v24, %v3320_v22  ;;  %vm3388_vm12 = vcmp.eq.f32.partialorder %v3387_v37, 8.507059e+37  ;;  %v3357_v48 = vand.u32 2147483647, %v7499_v20 }
 0x6ef   :  { %v3311_v15 = vsel %vm3310_vm14, %v4553_v52, %v3307_v21  ;;  %v3337_v44 = vadd.f32 %v4557_v56, %v3336_v14  ;;  %vm3353_vm14 = vweird.f32 %v7499_v20  ;;  %v3360_v21 = vor.u32 1.1754944e-38, %v3359_v41 }
 0x6f0   :  { %v7501_v63 = vpop.eup %4562  ;;  %v7508_v16 = vsel %vm3313_vm1, %v3315_v11, %v3311_v15  ;;  %v3322_v59 = vadd.f32 %v4559_v24, %v3321_v1  ;;  %vm3358_vm1 = vcmp.eq.f32.partialorder %v3357_v48, 8.507059e+37 }
 0x6f1   :  { %v4565_v7 = vpop.eup %4564  ;;  %v3379_v30 = vmul.f32 %v7501_v63, %v7495_v42  ;;  %v3341_v45 = vsel %vm7510_vm4, %v4557_v56, %v3337_v44  ;;  %vm3384_vm10 = vweird.f32 %v7501_v63 }
 0x6f2   :  { %v7506_v47 = vadd.f32 1.0, %v4565_v7  ;;  %v7524_v33 = vsel %vm3343_vm8, %v3345_v26, %v3341_v45  ;;  %v3326_v13 = vsel %vm3325_vm9, %v4559_v24, %v3322_v59  ;;  %vm3385_vm2 = vmor %vm3383_vm11, %vm3384_vm10 }
 0x6f3   :  { %v3380_v2 = vsub.f32 1.0, %v3379_v30  ;;  %v7515_v32 = vpop.eup %4566  ;;  %v7531_v34 = vsel %vm3328_vm7, %v3330_v54, %v3326_v13 }
 0x6f4   :  { %v3349_v17 = vmul.f32 %v7515_v32, %v7499_v20  ;;  %vm3354_vm13 = vweird.f32 %v7515_v32  ;;  %v3374_v20 = vand.u32 2147483648, %v7506_v47  ;;  %vm3368_vm4 = vweird.f32 %v7506_v47 }
 0x6f5   :  { %v3381_v49 = vmul.f32 %v7501_v63, %v3380_v2  ;;  %vm3355_vm15 = vmor %vm3353_vm14, %vm3354_vm13  ;;  %v3372_v15 = vand.u32 2147483647, %v7506_v47 }
 0x6f6   :  { %v3350_v28 = vsub.f32 1.0, %v3349_v17  ;;  %v3375_v44 = vor.u32 1.1754944e-38, %v3374_v20 }
 0x6f7   :  { %v3382_v55 = vadd.f32 %v7501_v63, %v3381_v49  ;;  %vm3373_vm6 = vcmp.eq.f32.partialorder %v3372_v15, 8.507059e+37 }
 0x6f8   :  { %v3351_v62 = vmul.f32 %v7515_v32, %v3350_v28 }
 0x6f9   :  { %v3386_v10 = vsel %vm3385_vm2, %v7501_v63, %v3382_v55 }
 0x6fa   :  { %v7545_v9 = vsel %vm3388_vm12, %v3390_v31, %v3386_v10  ;;  %v3352_v38 = vadd.f32 %v7515_v32, %v3351_v62  ;;  %v3250_v10 = vpop.f32.mrf.mxu2 }
 0x6fc   :  { %v3356_v4 = vsel %vm3355_vm15, %v7515_v32, %v3352_v38 }
 0x6fd   :  { %v7557_v63 = vsel %vm3358_vm1, %v3360_v21, %v3356_v4 }
 0x702   :  { %v3253_v31 = vpop.f32.mrf.mxu2 }
 0x70f   :  { %v3596_v5 = vpop.permute.xlu2 %3595 }
 0x710   :  { %v3617_v27 = vmul.f32 %v3596_v5, %v7524_v33 }
 0x717   :  { %v3592_v43 = vpop.permute.xlu0 %3591 }
 0x718   :  { %v3615_v0 = vmul.f32 %v3592_v43, %v7508_v16 }
 0x71a   :  { %4568 = vtanh.f32 %v3615_v0 }
 0x71b   :  { %4570 = vrcp.f32 %v7506_v47 }
 0x71c   :  { %4572 = vpow2.f32 %v4218_v36 }
 0x71d   :  { %4574 = vtanh.f32 %v3617_v27 }
 0x71f   :  { %v3594_v58 = vpop.permute.xlu1 %3593 }
 0x720   :  { %v4569_v40 = vpop.eup %4568  ;;  %v3616_v35 = vmul.f32 %v3594_v58, %v7531_v34 }
 0x721   :  { %v4571_v53 = vpop.eup %4570  ;;  %3639 = vrot.lane.b32.xlu1 %v4569_v40, %s4930_s4 }
 0x722   :  { %4576 = vtanh.f32 %v3616_v35  ;;  %v4573_v12 = vpop.eup %4572  ;;  %v3364_v51 = vmul.f32 %v4571_v53, %v7506_v47  ;;  %vm3369_vm3 = vweird.f32 %v4571_v53 }
 0x723   :  { %4578 = vpow2.f32 %v4219_v23  ;;  %v4575_v52 = vpop.eup %4574  ;;  %v7543_v39 = vadd.f32 1.0, %v4573_v12  ;;  %vm3370_vm5 = vmor %vm3368_vm4, %vm3369_vm3  ;;  %v198_v12 = vld [vmem:[%s7807_s14 + $0x18] sm:$0x7] }
 0x724   :  { %v3365_v24 = vsub.f32 1.0, %v3364_v51  ;;  %v7584_v62 = vperm.slane %v198_v12, 0 }
 0x725   :  { %v3404_v26 = vand.u32 2147483648, %v7543_v39  ;;  %vm3398_vm9 = vweird.f32 %v7543_v39  ;;  %v3402_v36 = vand.u32 2147483647, %v7543_v39 }
 0x726   :  { %v3366_v50 = vmul.f32 %v4571_v53, %v3365_v24  ;;  %v3248_v51 = vadd.f32 %v3247_v61, %v7584_v62  ;;  %v3254_v38 = vadd.f32 %v3253_v31, %v7584_v62 }
 0x727   :  { %v3602_v18 = vpop.permute.xlu2 %3601  ;;  %v3405_v6 = vor.u32 1.1754944e-38, %v3404_v26  ;;  %vm3403_vm11 = vcmp.eq.f32.partialorder %v3402_v36, 8.507059e+37 }
 0x728   :  { %v4577_v56 = vpop.eup %4576  ;;  %v3620_v42 = vmul.f32 %v3602_v18, %v7545_v9  ;;  %v3367_v29 = vadd.f32 %v4571_v53, %v3366_v50  ;;  %v4222_v41 = vmul.f32 -1.442695, %v3254_v38 }
 0x729   :  { %3641 = vrot.lane.b32.xlu0 %v4577_v56, %s4930_s4  ;;  %3643 = vrot.lane.b32.xlu1 %v4575_v52, %s4930_s4  ;;  %v4579_v25 = vpop.eup %4578  ;;  %v4220_v52 = vmul.f32 -1.442695, %v3248_v51  ;;  %v3256_v56 = vpop.f32.mrf.mxu2 }
 0x72a   :  { %4580 = vtanh.f32 %v3620_v42  ;;  %v3302_v46 = vadd.f32 1.0, %v4579_v25  ;;  %v3371_v1 = vsel %vm3370_vm5, %v4571_v53, %v3367_v29  ;;  %v3257_v50 = vadd.f32 %v3256_v56, %v7584_v62 }
 0x72b   :  { %4582 = vrcp.f32 %v7543_v39  ;;  %v7565_v11 = vsel %vm3373_vm6, %v3375_v44, %v3371_v1 }
 0x72c   :  { %4584 = vrcp.f32 %v3302_v46  ;;  %v3419_v49 = vand.u32 2147483648, %v3302_v46  ;;  %vm3413_vm2 = vweird.f32 %v3302_v46  ;;  %v3417_v54 = vand.u32 2147483647, %v3302_v46 }
 0x72d   :  { %v4223_v21 = vmul.f32 -1.442695, %v3257_v50 }
 0x72e   :  { %v3420_v40 = vor.u32 1.1754944e-38, %v3419_v49  ;;  %vm3418_vm13 = vcmp.eq.f32.partialorder %v3417_v54, 8.507059e+37 }
 0x72f   :  { %v3598_v22 = vpop.permute.xlu0 %3597 }
 0x730   :  { %v4581_v14 = vpop.eup %4580  ;;  %v3618_v57 = vmul.f32 %v3598_v22, %v7557_v63 }
 0x731   :  { %v4583_v7 = vpop.eup %4582  ;;  %3649 = vrot.lane.b32.xlu1 %v4581_v14, %s4930_s4  ;;  %v3259_v48 = vpop.f32.mrf.mxu2 }
 0x732   :  { %4586 = vtanh.f32 %v3618_v57  ;;  %v3394_v30 = vmul.f32 %v4583_v7, %v7543_v39  ;;  %v4585_v3 = vpop.eup %4584  ;;  %vm3399_vm8 = vweird.f32 %v4583_v7  ;;  %v3251_v39 = vadd.f32 %v3250_v10, %v7584_v62 }
 0x733   :  { %v3409_v59 = vmul.f32 %v4585_v3, %v3302_v46  ;;  %vm3400_vm7 = vmor %vm3398_vm9, %vm3399_vm8  ;;  %vm3414_vm10 = vweird.f32 %v4585_v3  ;;  %v3260_v57 = vadd.f32 %v3259_v48, %v7584_v62 }
 0x734   :  { %v3395_v0 = vsub.f32 1.0, %v3394_v30  ;;  %vm3415_vm12 = vmor %vm3413_vm2, %vm3414_vm10  ;;  %v4221_v18 = vmul.f32 -1.442695, %v3251_v39 }
 0x735   :  { %v3410_v47 = vsub.f32 1.0, %v3409_v59  ;;  %v4224_v1 = vmul.f32 -1.442695, %v3260_v57 }
 0x736   :  { %v3396_v2 = vmul.f32 %v4583_v7, %v3395_v0 }
 0x737   :  { %v3600_v60 = vpop.permute.xlu1 %3599  ;;  %v3411_v8 = vmul.f32 %v4585_v3, %v3410_v47  ;;  %v3606_v35 = vpop.permute.xlu2 %3605 }
 0x738   :  { %v4587_v43 = vpop.eup %4586  ;;  %v3619_v19 = vmul.f32 %v3600_v60, %v7565_v11  ;;  %v3397_v45 = vadd.f32 %v4583_v7, %v3396_v2 }
 0x739   :  { %3645 = vrot.lane.b32.xlu2 %v4587_v43, %s4930_s4  ;;  %v3412_v13 = vadd.f32 %v4585_v3, %v3411_v8 }
 0x73a   :  { %4588 = vtanh.f32 %v3619_v19  ;;  %v3401_v5 = vsel %vm3400_vm7, %v4583_v7, %v3397_v45  ;;  %v3262_v7 = vpop.f32.mrf.mxu2 }
 0x73b   :  { %v7573_v27 = vsel %vm3403_vm11, %v3405_v6, %v3401_v5  ;;  %v3416_v58 = vsel %vm3415_vm12, %v4585_v3, %v3412_v13  ;;  %v3263_v60 = vadd.f32 %v3262_v7, %v7584_v62 }
 0x73c   :  { %v7576_v55 = vsel %vm3418_vm13, %v3420_v40, %v3416_v58 }
 0x73d   :  { %v3622_v28 = vmul.f32 %v3606_v35, %v7576_v55  ;;  %v4225_v2 = vmul.f32 -1.442695, %v3263_v60 }
 0x740   :  { %v4589_v32 = vpop.eup %4588 }
 0x741   :  { %3647 = vrot.lane.b32.xlu0 %v4589_v32, %s4930_s4 }
 0x742   :  { %v3265_v47 = vpop.f32.mrf.mxu2 }
 0x743   :  { %v3266_v13 = vadd.f32 %v3265_v47, %v7584_v62 }
 0x745   :  { %v4226_v12 = vmul.f32 -1.442695, %v3266_v13 }
 0x747   :  { %v3604_v17 = vpop.permute.xlu0 %3603 }
 0x748   :  { %v3621_v23 = vmul.f32 %v3604_v17, %v7573_v27 }
 0x74a   :  { %4590 = vtanh.f32 %v3621_v23  ;;  %v3268_v51 = vpop.f32.mrf.mxu2 }
 0x74b   :  { %4592 = vtanh.f32 %v3622_v28  ;;  %v3269_v56 = vadd.f32 %v3268_v51, %v7584_v62 }
 0x74c   :  { %4594 = vpow2.f32 %v4220_v52 }
 0x74d   :  { %4596 = vpow2.f32 %v4221_v18 }
 0x750   :  { %v4591_v53 = vpop.eup %4590 }
 0x751   :  { %3651 = vrot.lane.b32.xlu1 %v4591_v53, %s4930_s4  ;;  %v4593_v37 = vpop.eup %4592 }
 0x752   :  { %v4595_v42 = vpop.eup %4594 }
 0x753   :  { %v3455_v24 = vadd.f32 1.0, %v4595_v42  ;;  %v4597_v25 = vpop.eup %4596 }
 0x754   :  { %v7589_v4 = vadd.f32 1.0, %v4597_v25 }
 0x755   :  { %4598 = vrcp.f32 %v3455_v24  ;;  %v3474_v32 = vand.u32 2147483648, %v3455_v24  ;;  %vm3468_vm15 = vweird.f32 %v3455_v24  ;;  %v3472_v45 = vand.u32 2147483647, %v3455_v24 }
 0x756   :  { %4600 = vpow2.f32 %v4222_v41  ;;  %vm3483_vm5 = vweird.f32 %v7589_v4  ;;  %v3487_v10 = vand.u32 2147483647, %v7589_v4 }
 0x757   :  { %4602 = vrcp.f32 %v7589_v4  ;;  %v3475_v6 = vor.u32 1.1754944e-38, %v3474_v32  ;;  %vm3473_vm3 = vcmp.eq.f32.partialorder %v3472_v45, 8.507059e+37 }
 0x758   :  { %4604 = vpow2.f32 %v4223_v21  ;;  %vm3488_vm8 = vcmp.eq.f32.partialorder %v3487_v10, 8.507059e+37 }
 0x759   :  { %3653 = vrot.lane.b32.xlu1 %v4593_v37, %s4930_s4  ;;  %v3489_v37 = vand.u32 2147483648, %v7589_v4 }
 0x75b   :  { %v4599_v46 = vpop.eup %4598  ;;  %v3490_v39 = vor.u32 1.1754944e-38, %v3489_v37 }
 0x75c   :  { %v4601_v22 = vpop.eup %4600  ;;  %v3464_v14 = vmul.f32 %v4599_v46, %v3455_v24  ;;  %vm3469_vm14 = vweird.f32 %v4599_v46 }
 0x75d   :  { %v7594_v29 = vadd.f32 1.0, %v4601_v22  ;;  %v4603_v20 = vpop.eup %4602  ;;  %vm3470_vm1 = vmor %vm3468_vm15, %vm3469_vm14 }
 0x75e   :  { %v3465_v15 = vsub.f32 1.0, %v3464_v14  ;;  %v3479_v30 = vmul.f32 %v4603_v20, %v7589_v4  ;;  %v4605_v44 = vpop.eup %4604  ;;  %vm3484_vm4 = vweird.f32 %v4603_v20 }
 0x75f   :  { %4606 = vrcp.f32 %v7594_v29  ;;  %v7599_v43 = vadd.f32 1.0, %v4605_v44  ;;  %vm3485_vm6 = vmor %vm3483_vm5, %vm3484_vm4  ;;  %v3504_v50 = vand.u32 2147483648, %v7594_v29  ;;  %vm3498_vm7 = vweird.f32 %v7594_v29 }
 0x760   :  { %v3466_v3 = vmul.f32 %v4599_v46, %v3465_v15  ;;  %4608 = vpow2.f32 %v4224_v1  ;;  %v3480_v19 = vsub.f32 1.0, %v3479_v30  ;;  %v3502_v62 = vand.u32 2147483647, %v7594_v29 }
 0x761   :  { %4610 = vrcp.f32 %v7599_v43  ;;  %v3505_v57 = vor.u32 1.1754944e-38, %v3504_v50  ;;  %v3519_v60 = vand.u32 2147483648, %v7599_v43  ;;  %vm3513_vm12 = vweird.f32 %v7599_v43 }
 0x762   :  { %v3467_v0 = vadd.f32 %v4599_v46, %v3466_v3  ;;  %v3481_v26 = vmul.f32 %v4603_v20, %v3480_v19  ;;  %4612 = vpow2.f32 %v4225_v2  ;;  %vm3503_vm11 = vcmp.eq.f32.partialorder %v3502_v62, 8.507059e+37 }
 0x763   :  { %v3517_v19 = vand.u32 2147483647, %v7599_v43  ;;  %v3520_v47 = vor.u32 1.1754944e-38, %v3519_v60 }
 0x764   :  { %v3471_v36 = vsel %vm3470_vm1, %v4599_v46, %v3467_v0  ;;  %v3482_v58 = vadd.f32 %v4603_v20, %v3481_v26  ;;  %v4227_v46 = vmul.f32 -1.442695, %v3269_v56  ;;  %v3685_v0 = vld [vmem:[%s7805_s12 + $0x30] sm:$0x3] }
 0x765   :  { %v7601_v59 = vpop.eup %4606  ;;  %v3476_v17 = vsel %vm3473_vm3, %v3475_v6, %v3471_v36  ;;  %4228 = vmatpush.msk.msra.mxu0 %vm230_vm0, %v3685_v0  ;;  %vm3518_vm14 = vcmp.eq.f32.partialorder %v3517_v19, 8.507059e+37 }
 0x766   :  { %v4609_v8 = vpop.eup %4608  ;;  %v3494_v5 = vmul.f32 %v7601_v59, %v7594_v29  ;;  %v3486_v31 = vsel %vm3485_vm6, %v4603_v20, %v3482_v58  ;;  %vm3499_vm9 = vweird.f32 %v7601_v59 }
 0x767   :  { %v7607_v49 = vadd.f32 1.0, %v4609_v8  ;;  %v7614_v61 = vpop.eup %4610  ;;  %v3491_v42 = vsel %vm3488_vm8, %v3490_v39, %v3486_v31  ;;  %vm3500_vm10 = vmor %vm3498_vm7, %vm3499_vm9 }
 0x768   :  { %v3495_v53 = vsub.f32 1.0, %v3494_v5  ;;  %vm3514_vm2 = vweird.f32 %v7614_v61 }
 0x769   :  { %4614 = vrcp.f32 %v7607_v49  ;;  %vm3515_vm13 = vmor %vm3513_vm12, %vm3514_vm2  ;;  %v3534_v6 = vand.u32 2147483648, %v7607_v49  ;;  %vm3528_vm0 = vweird.f32 %v7607_v49  ;;  %v3532_v13 = vand.u32 2147483647, %v7607_v49 }
 0x76a   :  { %v3496_v52 = vmul.f32 %v7601_v59, %v3495_v53  ;;  %4616 = vpow2.f32 %v4226_v12  ;;  %v3681_v53 = vld [vmem:[%s7805_s12 + $0x10] sm:$0xff] }
 0x76b   :  { %vm3533_vm3 = vcmp.eq.f32.partialorder %v3532_v13, 8.507059e+37 }
 0x76c   :  { %v3497_v48 = vadd.f32 %v7601_v59, %v3496_v52 }
 0x76e   :  { %v3501_v22 = vsel %vm3500_vm10, %v7601_v59, %v3497_v48 }
 0x76f   :  { %v3506_v29 = vsel %vm3503_vm11, %v3505_v57, %v3501_v22 }
 0x793   :  { %v3640_v54 = vpop.permute.xlu1 %3639  ;;  %v7609_v23 = vpop.permute.xlu2 %3645 }
 0x794   :  { %v3663_v40 = vmul.f32 %v3640_v54, %v7508_v16  ;;  %v3664_v35 = vmul.f32 %v3640_v54, %v3476_v17  ;;  %v3669_v28 = vmul.f32 %v7609_v23, %v7557_v63  ;;  %v4613_v16 = vpop.eup %4612  ;;  %v3509_v63 = vmul.f32 %v7614_v61, %v7599_v43  ;;  %v3684_v17 = vld [vmem:[%s7805_s12 + $0x28] sm:$0xff]  ;;  %v3683_v54 = vld [vmem:[%s7805_s12 + $0x20] sm:$0xff] }
 0x795   :  { %v7627_v18 = vadd.f32 1.0, %v4613_v16  ;;  %v7633_v4 = vpop.eup %4614  ;;  %3774 = vmatpush.msra.mxu0 %v3684_v17 }
 0x796   :  { %3705 = vrot.lane.b32.xlu0 %v3664_v35, %s4931_s27  ;;  %3703 = vrot.lane.b32.xlu2 %v3663_v40, %s4931_s27  ;;  %v3510_v24 = vsub.f32 1.0, %v3509_v63  ;;  %v3524_v14 = vmul.f32 %v7633_v4, %v7607_v49  ;;  %vm3529_vm15 = vweird.f32 %v7633_v4  ;;  %v3682_v49 = vld [vmem:[%s7805_s12 + $0x18] sm:$0xff] }
 0x797   :  { %3715 = vrot.lane.b32.xlu1 %v3669_v28, %s4931_s27  ;;  %4618 = vrcp.f32 %v7627_v18  ;;  %vm3530_vm1 = vmor %vm3528_vm0, %vm3529_vm15  ;;  %v3535_v28 = vor.u32 1.1754944e-38, %v3534_v6  ;;  %3775 = vmatpush.msra.mxu0 %v3683_v54  ;;  %v3549_v52 = vand.u32 2147483648, %v7627_v18  ;;  %vm3543_vm5 = vweird.f32 %v7627_v18  ;;  %v3825_v6 = vld [vmem:[#allocation16 + $0x60] sm:$0xff]  ;;  %v3824_v54 = vld [vmem:[#allocation16 + $0x58] sm:$0xff] }
 0x798   :  { %v3511_v21 = vmul.f32 %v7614_v61, %v3510_v24  ;;  %4620 = vpow2.f32 %v4227_v46  ;;  %v3525_v3 = vsub.f32 1.0, %v3524_v14  ;;  %v3547_v39 = vand.u32 2147483647, %v7627_v18 }
 0x799   :  { %3776 = vmatpush.msra.mxu0 %v3682_v49  ;;  %vm3735_vm15 = vcmask 228352   ;;  %vm3744_vm0 = vcmask 408576   ;;  %v3821_v49 = vld [vmem:[#allocation16 + $0x40] sm:$0xff] }
 0x79a   :  { %v3512_v1 = vadd.f32 %v7614_v61, %v3511_v21  ;;  %v3526_v43 = vmul.f32 %v7633_v4, %v3525_v3  ;;  %vm3548_vm8 = vcmp.eq.f32.partialorder %v3547_v39, 8.507059e+37  ;;  %v3679_v3 = vld [vmem:[%s7805_s12] sm:$0xff]  ;;  %v3814_v39 = vld [vmem:[#allocation16 + $0x8] sm:$0xff] }
 0x79b   :  { %v3642_v38 = vpop.permute.xlu0 %3641  ;;  %v3644_v7 = vpop.permute.xlu1 %3643  ;;  %3777 = vmatpush.msra.mxu0 %v3681_v53 }
 0x79c   :  { %v3665_v41 = vmul.f32 %v3642_v38, %v7531_v34  ;;  %v3666_v25 = vmul.f32 %v3642_v38, %v3491_v42  ;;  %v4617_v34 = vpop.eup %4616  ;;  %v3667_v30 = vmul.f32 %v3644_v7, %v7524_v33  ;;  %v3668_v44 = vmul.f32 %v3644_v7, %v3506_v29 }
 0x79d   :  { %v7645_v20 = vadd.f32 1.0, %v4617_v34  ;;  %v7648_v15 = vpop.eup %4618  ;;  %v3516_v2 = vsel %vm3515_vm13, %v7614_v61, %v3512_v1  ;;  %v3527_v36 = vadd.f32 %v7633_v4, %v3526_v43  ;;  %v3550_v42 = vor.u32 1.1754944e-38, %v3549_v52  ;;  %v3815_v52 = vld [vmem:[#allocation16 + $0x10] sm:$0xff] }
 0x79e   :  { %3709 = vrot.lane.b32.xlu0 %v3666_v25, %s4931_s27  ;;  %3707 = vrot.lane.b32.xlu2 %v3665_v41, %s4931_s27  ;;  %v3539_v33 = vmul.f32 %v7648_v15, %v7627_v18  ;;  %v4621_v59 = vpop.eup %4620  ;;  %v3521_v45 = vsel %vm3518_vm14, %v3520_v47, %v3516_v2  ;;  %vm3544_vm4 = vweird.f32 %v7648_v15 }
 0x79f   :  { %4622 = vrcp.f32 %v7645_v20  ;;  %v7666_v32 = vadd.f32 1.0, %v4621_v59  ;;  %v3670_v8 = vmul.f32 %v7609_v23, %v3521_v45  ;;  %v3531_v58 = vsel %vm3530_vm1, %v7633_v4, %v3527_v36  ;;  %vm3545_vm6 = vmor %vm3543_vm5, %vm3544_vm4  ;;  %v3827_v36 = vld [vmem:[#allocation16 + $0x70] sm:$0xff] }
 0x7a0   :  { %v3540_v26 = vsub.f32 1.0, %v3539_v33  ;;  %v3536_v37 = vsel %vm3533_vm3, %v3535_v28, %v3531_v58  ;;  %v3564_v25 = vand.u32 2147483648, %v7645_v20  ;;  %vm3558_vm7 = vweird.f32 %v7645_v20  ;;  %v3823_v58 = vld [vmem:[#allocation16 + $0x50] sm:$0xff] }
 0x7a1   :  { %4624 = vrcp.f32 %v7666_v32  ;;  %v3562_v48 = vand.u32 2147483647, %v7645_v20  ;;  %v3579_v57 = vand.u32 2147483648, %v7666_v32  ;;  %vm3573_vm12 = vweird.f32 %v7666_v32 }
 0x7a2   :  { %v3541_v23 = vmul.f32 %v7648_v15, %v3540_v26  ;;  %v3565_v46 = vor.u32 1.1754944e-38, %v3564_v25  ;;  %v3577_v7 = vand.u32 2147483647, %v7666_v32 }
 0x7a3   :  { %v3650_v35 = vpop.permute.xlu1 %3649  ;;  %vm3563_vm11 = vcmp.eq.f32.partialorder %v3562_v48, 8.507059e+37  ;;  %v3580_v29 = vor.u32 1.1754944e-38, %v3579_v57 }
 0x7a4   :  { %v3542_v61 = vadd.f32 %v7648_v15, %v3541_v23  ;;  %v3673_v10 = vmul.f32 %v3650_v35, %v7545_v9  ;;  %vm3578_vm14 = vcmp.eq.f32.partialorder %v3577_v7, 8.507059e+37 }
 0x7a5   :  { %v4623_v5 = vpop.eup %4622 }
 0x7a6   :  { %3713 = vrot.lane.b32.xlu0 %v3668_v44, %s4931_s27  ;;  %3711 = vrot.lane.b32.xlu2 %v3667_v30, %s4931_s27  ;;  %v3554_v40 = vmul.f32 %v4623_v5, %v7645_v20  ;;  %v3546_v9 = vsel %vm3545_vm6, %v7648_v15, %v3542_v61  ;;  %vm3559_vm9 = vweird.f32 %v4623_v5  ;;  %v3680_v44 = vld [vmem:[%s7805_s12 + $0x8] sm:$0xff] }
 0x7a7   :  { %v4625_v31 = vpop.eup %4624  ;;  %v3551_v38 = vsel %vm3548_vm8, %v3550_v42, %v3546_v9  ;;  %vm3560_vm10 = vmor %vm3558_vm7, %vm3559_vm9  ;;  %3778 = vmatpush.msra.mxu0 %v3680_v44  ;;  %v3820_v61 = vld [vmem:[#allocation16 + $0x38] sm:$0xff]  ;;  %v3813_v42 = vld [vmem:[#allocation16] sm:$0xff] }
 0x7a8   :  { %v3555_v63 = vsub.f32 1.0, %v3554_v40  ;;  %v3569_v56 = vmul.f32 %v4625_v31, %v7666_v32  ;;  %v3674_v24 = vmul.f32 %v3650_v35, %v3551_v38  ;;  %vm3574_vm2 = vweird.f32 %v4625_v31  ;;  %v3822_v40 = vld [vmem:[#allocation16 + $0x48] sm:$0xff]  ;;  %v4661_v38 = vld [vmem:[%s7807_s14 + $0x10] sm:$0x7]  ;;  %s4932_s14 = smov [#allocation17]  }
 0x7a9   :  { %vm3575_vm13 = vmor %vm3573_vm12, %vm3574_vm2  ;;  %3779 = vmatpush.msra.mxu0 %v3679_v3  ;;  %s3971_s23 = sshll.u32 %s4932_s14, 4  ;;  %s3972_s23 = int_to_ptr.vmem [resolvable:$true] %s3971_s23 }
 0x7aa   :  { %v3570_v18 = vsub.f32 1.0, %v3569_v56 }
 0x7ac   :  { %v3571_v50 = vmul.f32 %v4625_v31, %v3570_v18 }
 0x7ae   :  { %3717 = vrot.lane.b32.xlu2 %v3670_v8, %s4931_s27  ;;  %v3572_v14 = vadd.f32 %v4625_v31, %v3571_v50  ;;  %v3828_v8 = vld [vmem:[#allocation16 + $0x78] sm:$0xff] }
 0x7af   :  { %3830 = vmatpush.msrb.mxu1 %v3828_v8 }
 0x7b0   :  { %v3576_v20 = vsel %vm3575_vm13, %v4625_v31, %v3572_v14  ;;  %v3816_v31 = vld [vmem:[#allocation16 + $0x18] sm:$0xff] }
 0x7b1   :  { %v3581_v15 = vsel %vm3578_vm14, %v3580_v29, %v3576_v20  ;;  %3831 = vmatpush.msrb.mxu1 %v3827_v36 }
 0x7b3   :  { %v3648_v12 = vpop.permute.xlu0 %3647 }
 0x7b4   :  { %v3671_v16 = vmul.f32 %v3648_v12, %v7565_v11  ;;  %v3672_v51 = vmul.f32 %v3648_v12, %v3536_v37  ;;  %v3556_v11 = vmul.f32 %v4623_v5, %v3555_v63  ;;  %v3819_v37 = vld [vmem:[#allocation16 + $0x30] sm:$0xff]  ;;  %v3818_v12 = vld [vmem:[#allocation16 + $0x28] sm:$0xff] }
 0x7b6   :  { %3719 = vrot.lane.b32.xlu0 %v3671_v16, %s4931_s27  ;;  %3723 = vrot.lane.b32.xlu2 %v3673_v10, %s4931_s27  ;;  %v3557_v41 = vadd.f32 %v4623_v5, %v3556_v11  ;;  %v3817_v10 = vld [vmem:[#allocation16 + $0x20] sm:$0xff] }
 0x7b7   :  { %3721 = vrot.lane.b32.xlu1 %v3672_v51, %s4931_s27 }
 0x7b8   :  { %v3561_v4 = vsel %vm3560_vm10, %v4623_v5, %v3557_v41  ;;  %v3826_v5 = vld [vmem:[#allocation16 + $0x68] sm:$0xff] }
 0x7b9   :  { %v3566_v62 = vsel %vm3563_vm11, %v3565_v46, %v3561_v4  ;;  %3832 = vmatpush.msrb.mxu1 %v3826_v5 }
 0x7bb   :  { %3833 = vmatpush.msrb.mxu1 %v3825_v6 }
 0x7bd   :  { %3834 = vmatpush.msrb.mxu1 %v3824_v54 }
 0x7be   :  { %3725 = vrot.lane.b32.xlu0 %v3674_v24, %s4931_s27  ;;  %v3686_v24 = vperm.slane %v4661_v38, 1 }
 0x7bf   :  { %3835 = vmatpush.msrb.mxu1 %v3823_v58 }
 0x7c1   :  { %3836 = vmatpush.msrb.mxu1 %v3822_v40 }
 0x7c3   :  { %v3652_v34 = vpop.permute.xlu1 %3651  ;;  %3837 = vmatpush.msrb.mxu1 %v3821_v49 }
 0x7c4   :  { %v3675_v21 = vmul.f32 %v3652_v34, %v7573_v27  ;;  %v3676_v22 = vmul.f32 %v3652_v34, %v3566_v62 }
 0x7c5   :  { %3838 = vmatpush.msrb.mxu1 %v3820_v61 }
 0x7c6   :  { %3729 = vrot.lane.b32.xlu2 %v3676_v22, %s4931_s27  ;;  %3727 = vrot.lane.b32.xlu1 %v3675_v21, %s4931_s27 }
 0x7c7   :  { %3839 = vmatpush.msrb.mxu1 %v3819_v37 }
 0x7c9   :  { %3840 = vmatpush.msrb.mxu1 %v3818_v12 }
 0x7cb   :  { %v3654_v1 = vpop.permute.xlu1 %3653  ;;  %3841 = vmatpush.msrb.mxu1 %v3817_v10 }
 0x7cc   :  { %v3677_v27 = vmul.f32 %v3654_v1, %v7576_v55  ;;  %v3678_v30 = vmul.f32 %v3654_v1, %v3581_v15 }
 0x7cd   :  { %3842 = vmatpush.msrb.mxu1 %v3816_v31 }
 0x7ce   :  { %3731 = vrot.lane.b32.xlu0 %v3677_v27, %s4931_s27  ;;  %3733 = vrot.lane.b32.xlu1 %v3678_v30, %s4931_s27 }
 0x7cf   :  { %3843 = vmatpush.msrb.mxu1 %v3815_v52 }
 0x7d1   :  { %3844 = vmatpush.msrb.mxu1 %v3814_v39 }
 0x7d3   :  { %3845 = vmatpush.msrb.mxu1 %v3813_v42 }
 0x7f0   :  { %v3704_v60 = vpop.permute.xlu2 %3703 }
 0x7f8   :  { %v3708_v0 = vpop.permute.xlu2 %3707 }
 0x800   :  { %v3712_v2 = vpop.permute.xlu2 %3711 }
 0x808   :  { %v3706_v19 = vpop.permute.xlu0 %3705  ;;  %v3718_v45 = vpop.permute.xlu2 %3717 }
 0x809   :  { %v3736_v55 = vsel %vm3735_vm15, %v3704_v60, %v3706_v19  ;;  %v3716_v32 = vpop.permute.xlu1 %3715 }
 0x80a   :  { %4229 = vmatmul.msk.f32.vlgmr.msra.gmra.mxu0 %vm3744_vm0, %v3736_v55  ;;  %v3739_v26 = vsel %vm3735_vm15, %v3716_v32, %v3718_v45  ;;  %v3829_v55 = vperm.slane %v4661_v38, 2 }
 0x810   :  { %v3710_v33 = vpop.permute.xlu0 %3709  ;;  %v3724_v35 = vpop.permute.xlu2 %3723 }
 0x811   :  { %v3737_v59 = vsel %vm3735_vm15, %v3708_v0, %v3710_v33 }
 0x812   :  { %4230 = vmatmul.msk.f32.gmra.mxu0 %vm3744_vm0, %v3737_v59 }
 0x818   :  { %v3714_v43 = vpop.permute.xlu0 %3713 }
 0x819   :  { %v3738_v47 = vsel %vm3735_vm15, %v3712_v2, %v3714_v43 }
 0x81a   :  { %4231 = vmatmul.msk.f32.gmra.mxu0 %vm3744_vm0, %v3738_v47 }
 0x820   :  { %v3730_v16 = vpop.permute.xlu2 %3729 }
 0x822   :  { %4232 = vmatmul.msk.f32.gmra.mxu0 %vm3744_vm0, %v3739_v26 }
 0x828   :  { %v3720_v13 = vpop.permute.xlu0 %3719 }
 0x829   :  { %v3722_v17 = vpop.permute.xlu1 %3721 }
 0x82a   :  { %v3740_v23 = vsel %vm3735_vm15, %v3720_v13, %v3722_v17 }
 0x82b   :  { %4233 = vmatmul.msk.f32.gmra.mxu0 %vm3744_vm0, %v3740_v23 }
 0x830   :  { %v3726_v28 = vpop.permute.xlu0 %3725 }
 0x831   :  { %v3741_v53 = vsel %vm3735_vm15, %v3724_v35, %v3726_v28 }
 0x833   :  { %4234 = vmatmul.msk.f32.gmra.mxu0 %vm3744_vm0, %v3741_v53 }
 0x838   :  { %v3728_v51 = vpop.permute.xlu1 %3727 }
 0x839   :  { %v3742_v63 = vsel %vm3735_vm15, %v3728_v51, %v3730_v16 }
 0x83b   :  { %4235 = vmatmul.msk.f32.gmra.mxu0 %vm3744_vm0, %v3742_v63 }
 0x840   :  { %v3732_v9 = vpop.permute.xlu0 %3731  ;;  %v3734_v11 = vpop.permute.xlu1 %3733 }
 0x841   :  { %v3743_v56 = vsel %vm3735_vm15, %v3732_v9, %v3734_v11 }
 0x843   :  { %4236 = vmatmul.msk.f32.gmra.mxu0 %vm3744_vm0, %v3743_v56 }
 0x887   :  { %v3781_v41 = vpop.f32.mrf.mxu0 }
 0x888   :  { %v3782_v18 = vadd.f32 %v3781_v41, %v3686_v24 }
 0x88a   :  { %v3805_v25 = vmax.f32 %v3782_v18, 0.0 }
 0x88c   :  { %3846 = vmatmul.f32.vlgmr.msrb.gmra.mxu1 %v3805_v25 }
 0x88f   :  { %v3784_v48 = vpop.f32.mrf.mxu0 }
 0x890   :  { %v3785_v4 = vadd.f32 %v3784_v48, %v3686_v24 }
 0x892   :  { %v3806_v50 = vmax.f32 %v3785_v4, 0.0 }
 0x894   :  { %3849 = vmatmul.f32.gmra.mxu1 %v3806_v50 }
 0x897   :  { %v3787_v46 = vpop.f32.mrf.mxu0 }
 0x898   :  { %v3788_v62 = vadd.f32 %v3787_v46, %v3686_v24 }
 0x89a   :  { %v3807_v34 = vmax.f32 %v3788_v62, 0.0 }
 0x89c   :  { %3852 = vmatmul.f32.gmra.mxu1 %v3807_v34 }
 0x89f   :  { %v3790_v21 = vpop.f32.mrf.mxu0 }
 0x8a0   :  { %v3791_v22 = vadd.f32 %v3790_v21, %v3686_v24 }
 0x8a2   :  { %v3808_v14 = vmax.f32 %v3791_v22, 0.0 }
 0x8a4   :  { %3855 = vmatmul.f32.gmra.mxu1 %v3808_v14 }
 0x8a8   :  { %v3793_v57 = vpop.f32.mrf.mxu0 }
 0x8a9   :  { %v3794_v7 = vadd.f32 %v3793_v57, %v3686_v24 }
 0x8ab   :  { %v3809_v20 = vmax.f32 %v3794_v7, 0.0 }
 0x8ad   :  { %3858 = vmatmul.f32.gmra.mxu1 %v3809_v20 }
 0x8b0   :  { %v3796_v29 = vpop.f32.mrf.mxu0 }
 0x8b1   :  { %v3797_v15 = vadd.f32 %v3796_v29, %v3686_v24 }
 0x8b3   :  { %v3810_v1 = vmax.f32 %v3797_v15, 0.0 }
 0x8b5   :  { %3861 = vmatmul.f32.gmra.mxu1 %v3810_v1 }
 0x8b8   :  { %v3799_v27 = vpop.f32.mrf.mxu0 }
 0x8b9   :  { %v3800_v30 = vadd.f32 %v3799_v27, %v3686_v24 }
 0x8bb   :  { %v3811_v44 = vmax.f32 %v3800_v30, 0.0 }
 0x8bd   :  { %3864 = vmatmul.f32.gmra.mxu1 %v3811_v44 }
 0x8c0   :  { %v3802_v3 = vpop.f32.mrf.mxu0 }
 0x8c1   :  { %v3803_v60 = vadd.f32 %v3802_v3, %v3686_v24 }
 0x8c3   :  { %v3812_v19 = vmax.f32 %v3803_v60, 0.0 }
 0x8c5   :  { %3867 = vmatmul.f32.gmra.mxu1 %v3812_v19 }
 0x909   :  { %v3847_v0 = vpop.f32.mrf.mxu1 }
 0x90a   :  { %v7743_v33 = vadd.f32 %v3847_v0, %v3829_v55 }
 0x90c   :  { %3871 = vmax.xlane.f32.xlu2 %v7743_v33 }
 0x911   :  { %v3850_v59 = vpop.f32.mrf.mxu1 }
 0x912   :  { %v7746_v2 = vadd.f32 %v3850_v59, %v3829_v55 }
 0x914   :  { %3873 = vmax.xlane.f32.xlu0 %v7746_v2 }
 0x919   :  { %v3853_v43 = vpop.f32.mrf.mxu1 }
 0x91a   :  { %v7749_v47 = vadd.f32 %v3853_v43, %v3829_v55 }
 0x91c   :  { %3875 = vmax.xlane.f32.xlu1 %v7749_v47 }
 0x921   :  { %v3856_v32 = vpop.f32.mrf.mxu1 }
 0x922   :  { %v7752_v45 = vadd.f32 %v3856_v32, %v3829_v55 }
 0x924   :  { %3877 = vmax.xlane.f32.xlu2 %v7752_v45 }
 0x92a   :  { %v3859_v26 = vpop.f32.mrf.mxu1 }
 0x92b   :  { %v7755_v8 = vadd.f32 %v3859_v26, %v3829_v55 }
 0x92d   :  { %3879 = vmax.xlane.f32.xlu2 %v7755_v8 }
 0x932   :  { %v3862_v36 = vpop.f32.mrf.mxu1 }
 0x933   :  { %v7758_v5 = vadd.f32 %v3862_v36, %v3829_v55 }
 0x935   :  { %3881 = vmax.xlane.f32.xlu0 %v7758_v5 }
 0x93a   :  { %v3865_v6 = vpop.f32.mrf.mxu1 }
 0x93b   :  { %v7761_v13 = vadd.f32 %v3865_v6, %v3829_v55 }
 0x93d   :  { %3883 = vmax.xlane.f32.xlu1 %v7761_v13 }
 0x942   :  { %v3868_v17 = vpop.f32.mrf.mxu1 }
 0x943   :  { %v7764_v54 = vadd.f32 %v3868_v17, %v3829_v55 }
 0x945   :  { %3885 = vmax.xlane.f32.xlu2 %v7764_v54 }
 0x97f   :  { %v3872_v23 = vpop.xlane.xlu2 %3871 }
 0x980   :  { %v3887_v58 = vsub.f32 %v7743_v33, %v3872_v23 }
 0x982   :  { %v3895_v40 = vmul.f32 1.442695, %v3887_v58 }
 0x984   :  { %4626 = vpow2.f32 %v3895_v40 }
 0x987   :  { %v3874_v49 = vpop.xlane.xlu0 %3873 }
 0x988   :  { %v3888_v35 = vsub.f32 %v7746_v2, %v3874_v49 }
 0x98a   :  { %v4627_v28 = vpop.eup %4626  ;;  %v3897_v53 = vmul.f32 1.442695, %v3888_v35 }
 0x98b   :  { %3911 = vadd.xlane.f32.xlu0 %v4627_v28 }
 0x98c   :  { %4628 = vpow2.f32 %v3897_v53 }
 0x98f   :  { %v3876_v61 = vpop.xlane.xlu1 %3875 }
 0x990   :  { %v3889_v37 = vsub.f32 %v7749_v47, %v3876_v61 }
 0x992   :  { %v4629_v12 = vpop.eup %4628  ;;  %v3899_v10 = vmul.f32 1.442695, %v3889_v37 }
 0x993   :  { %3913 = vadd.xlane.f32.xlu1 %v4629_v12 }
 0x994   :  { %4630 = vpow2.f32 %v3899_v10 }
 0x997   :  { %v3878_v16 = vpop.xlane.xlu2 %3877 }
 0x998   :  { %v3890_v51 = vsub.f32 %v7752_v45, %v3878_v16 }
 0x99a   :  { %v4631_v63 = vpop.eup %4630  ;;  %v3901_v31 = vmul.f32 1.442695, %v3890_v51 }
 0x99b   :  { %3915 = vadd.xlane.f32.xlu2 %v4631_v63 }
 0x99c   :  { %4632 = vpow2.f32 %v3901_v31 }
 0x9a0   :  { %v3880_v52 = vpop.xlane.xlu2 %3879 }
 0x9a1   :  { %v3891_v39 = vsub.f32 %v7755_v8, %v3880_v52 }
 0x9a2   :  { %v4633_v9 = vpop.eup %4632 }
 0x9a3   :  { %v3903_v11 = vmul.f32 1.442695, %v3891_v39  ;;  %3917 = vadd.xlane.f32.xlu0 %v4633_v9 }
 0x9a5   :  { %4634 = vpow2.f32 %v3903_v11 }
 0x9a8   :  { %v3882_v56 = vpop.xlane.xlu0 %3881 }
 0x9a9   :  { %v3892_v42 = vsub.f32 %v7758_v5, %v3882_v56 }
 0x9ab   :  { %v4635_v38 = vpop.eup %4634  ;;  %v3905_v24 = vmul.f32 1.442695, %v3892_v42 }
 0x9ac   :  { %3919 = vadd.xlane.f32.xlu1 %v4635_v38 }
 0x9ad   :  { %4636 = vpow2.f32 %v3905_v24 }
 0x9b0   :  { %v3884_v41 = vpop.xlane.xlu1 %3883 }
 0x9b1   :  { %v3893_v18 = vsub.f32 %v7761_v13, %v3884_v41 }
 0x9b3   :  { %v4637_v25 = vpop.eup %4636  ;;  %v3907_v48 = vmul.f32 1.442695, %v3893_v18 }
 0x9b4   :  { %3921 = vadd.xlane.f32.xlu2 %v4637_v25 }
 0x9b5   :  { %4638 = vpow2.f32 %v3907_v48 }
 0x9b8   :  { %v7774_v4 = vpop.xlane.xlu2 %3885 }
 0x9b9   :  { %v3894_v50 = vsub.f32 %v7764_v54, %v7774_v4 }
 0x9bb   :  { %v4639_v46 = vpop.eup %4638  ;;  %v3909_v62 = vmul.f32 1.442695, %v3894_v50 }
 0x9bc   :  { %3923 = vadd.xlane.f32.xlu0 %v4639_v46 }
 0x9bd   :  { %4640 = vpow2.f32 %v3909_v62 }
 0x9c3   :  { %v4641_v34 = vpop.eup %4640 }
 0x9c4   :  { %3925 = vadd.xlane.f32.xlu1 %v4641_v34 }
 0x9fe   :  { %v3912_v21 = vpop.xlane.xlu0 %3911 }
 0x9ff   :  { %4642 = vlog2.f32 %v3912_v21 }
 0xa05   :  { %v4643_v22 = vpop.eup %4642 }
 0xa06   :  { %v3928_v14 = vmul.f32 0.6931472, %v4643_v22  ;;  %v3914_v57 = vpop.xlane.xlu1 %3913 }
 0xa07   :  { %4644 = vlog2.f32 %v3914_v57 }
 0xa08   :  { %v3943_v7 = vadd.f32 %v3928_v14, %v3872_v23 }
 0xa0a   :  { %v3951_v20 = vsub.f32 %v7743_v33, %v3943_v7 }
 0xa0c   :  { %3959 = vst [vmem:[#allocation17] sm:$0xff] %v3951_v20 }
 0xa0d   :  { %v4645_v29 = vpop.eup %4644 }
 0xa0e   :  { %v3930_v15 = vmul.f32 0.6931472, %v4645_v29  ;;  %v3916_v1 = vpop.xlane.xlu2 %3915 }
 0xa0f   :  { %4646 = vlog2.f32 %v3916_v1 }
 0xa10   :  { %v3944_v27 = vadd.f32 %v3930_v15, %v3874_v49 }
 0xa12   :  { %v3952_v30 = vsub.f32 %v7746_v2, %v3944_v27 }
 0xa14   :  { %3960 = vst [vmem:[#allocation17 + $0x8] sm:$0xff] %v3952_v30 }
 0xa15   :  { %v4647_v44 = vpop.eup %4646 }
 0xa16   :  { %v3932_v3 = vmul.f32 0.6931472, %v4647_v44  ;;  %v3918_v60 = vpop.xlane.xlu0 %3917 }
 0xa17   :  { %4648 = vlog2.f32 %v3918_v60 }
 0xa18   :  { %v3945_v19 = vadd.f32 %v3932_v3, %v3876_v61 }
 0xa1a   :  { %v3953_v55 = vsub.f32 %v7749_v47, %v3945_v19 }
 0xa1c   :  { %3961 = vst [vmem:[#allocation17 + $0x10] sm:$0xff] %v3953_v55 }
 0xa1d   :  { %v4649_v0 = vpop.eup %4648 }
 0xa1e   :  { %v3934_v59 = vmul.f32 0.6931472, %v4649_v0 }
 0xa1f   :  { %v3920_v33 = vpop.xlane.xlu1 %3919 }
 0xa20   :  { %v3946_v43 = vadd.f32 %v3934_v59, %v3878_v16  ;;  %4650 = vlog2.f32 %v3920_v33 }
 0xa22   :  { %v3954_v32 = vsub.f32 %v7752_v45, %v3946_v43 }
 0xa24   :  { %3962 = vst [vmem:[#allocation17 + $0x18] sm:$0xff] %v3954_v32 }
 0xa26   :  { %v4651_v26 = vpop.eup %4650 }
 0xa27   :  { %v3936_v36 = vmul.f32 0.6931472, %v4651_v26  ;;  %v3922_v2 = vpop.xlane.xlu2 %3921 }
 0xa28   :  { %4652 = vlog2.f32 %v3922_v2 }
 0xa29   :  { %v3947_v6 = vadd.f32 %v3936_v36, %v3880_v52 }
 0xa2b   :  { %v3955_v17 = vsub.f32 %v7755_v8, %v3947_v6 }
 0xa2d   :  { %3963 = vst [vmem:[#allocation17 + $0x20] sm:$0xff] %v3955_v17 }
 0xa2e   :  { %v4653_v23 = vpop.eup %4652 }
 0xa2f   :  { %v3938_v58 = vmul.f32 0.6931472, %v4653_v23  ;;  %v3924_v47 = vpop.xlane.xlu0 %3923 }
 0xa30   :  { %4654 = vlog2.f32 %v3924_v47 }
 0xa31   :  { %v3948_v40 = vadd.f32 %v3938_v58, %v3882_v56 }
 0xa33   :  { %v3956_v49 = vsub.f32 %v7758_v5, %v3948_v40 }
 0xa35   :  { %3964 = vst [vmem:[#allocation17 + $0x28] sm:$0xff] %v3956_v49 }
 0xa36   :  { %v4655_v35 = vpop.eup %4654 }
 0xa37   :  { %v3940_v28 = vmul.f32 0.6931472, %v4655_v35  ;;  %v3926_v45 = vpop.xlane.xlu1 %3925 }
 0xa38   :  { %4656 = vlog2.f32 %v3926_v45 }
 0xa39   :  { %v3949_v53 = vadd.f32 %v3940_v28, %v3884_v41 }
 0xa3b   :  { %v3957_v61 = vsub.f32 %v7761_v13, %v3949_v53 }
 0xa3d   :  { %3965 = vst [vmem:[#allocation17 + $0x30] sm:$0xff] %v3957_v61 }
 0xa3e   :  { %v4657_v37 = vpop.eup %4656 }
 0xa3f   :  { %v3942_v12 = vmul.f32 0.6931472, %v4657_v37 }
 0xa41   :  { %v3950_v8 = vadd.f32 %v3942_v12, %v7774_v4 }
 0xa43   :  { %v3958_v5 = vsub.f32 %v7764_v54, %v3950_v8 }
 0xa45   :  { %3966 = vst [vmem:[#allocation17 + $0x38] sm:$0xff] %v3958_v5 }
 0xa46   :  { %3979 = dma.vmem_to_hbm [thread:$0]  %s3972_s23, 1024, %s3974_s3, [#allocation4], %s4924_s24, %s4924_s24, %s4925_s9  }
 0xa47   :  { %4912 = dma.done.wait [#allocation4], 1024  }
 0xa48   :  { %4913 = vsyncadd [#allocation4], 4294966272 }
 0xa49   :  { %3984 = vsyncpa [#allocation3], 1 }
 0xa4a   :  { %3985 = vsyncpa [#allocation6], 1 }
 0xa4b   :  { %3986 = vsyncpa [#allocation9], 1 }
 0xa4c   :  { %3987 = vsyncpa [#allocation12], 1 }
 0xa4d   :  { %3988 = vsyncpa [#allocation15], 1 }
 0xa4e   :  { %3989 = vsyncpa [#allocation4], 1 }

</bundles_post_ra>
